<compile_context>
chip_gen: v6e
topology: v6e:2x2x1
jax: 0.10.0
libtpu: 0.0.40
codegen_flags: <defaults>
</compile_context>

<pallas_src>
import math
import jax
import jax.numpy as jnp
from jax.experimental import pallas as pl
from jax.experimental.pallas import tpu as pltpu

SEQ_LEN = 132      # fixed by BatchNorm1d(num_features=132)
IN_CH = 21
EXP_CH = 40        # expander out channels (gated -> 20)
K1, P1 = 21, 10
CMP_IN = 20
CMP_CH = 6         # compressor out channels (gated -> 3)
K2, P2 = 11, 5
EMB = 3
OUT_CH = 21
BN_EPS = 1e-5

EXPL = 144                 # expander rows computed per sample (>= SEQ_LEN + P2, mult of 8)
XLEN = 168                 # padded per-sample input rows (>= EXPL + K1 - 1 = 164, mult of 8)
HOFF = 8                   # leading zero rows in the h buffer (>= P2, mult of 8)
HBUF = HOFF + EXPL         # 152 rows; compressor reads rows [3, 149)
LP = 136                   # 8-aligned per-sample row tile for emb / output (>= SEQ_LEN)
KFOLD = K2 * CMP_IN        # 220: folded compressor contraction depth


def conv_stage_kernel(x_ref, w1k_ref, b1_ref, w2f_ref, b2_ref, emb_ref, hbuf_ref):
    """Per-sample conv1 + gating + conv2 + gating (one grid step = one sample).

    x_ref   : (1, 168, 21) bf16   zero-padded one-hot sample (10 left / 26 right)
    w1k_ref : (21, 21, 40) f32    expander weights, tap-major (k, Cin, Cout)
    b1_ref  : (1, 40) f32
    w2f_ref : (220, 6) f32        compressor weights flattened, row = k*20 + Cin
    b2_ref  : (1, 6) f32
    emb_ref : (1, 136, 3) f32     gated embedding (rows 132..135 are padding junk)
    hbuf_ref: (152, 20) f32       scratch: zero-padded gated expander output
    """
    xwin = x_ref[0].astype(jnp.float32)                                   # (168, 21)

    # ---- expander Conv1d(21->40, k=21, pad=10): 21 tap matmuls ----
    acc = jnp.zeros((EXPL, EXP_CH), jnp.float32)
    for k in range(K1):                                    # fixed 21-tap unroll
        acc = acc + jnp.dot(xwin[k:k + EXPL, :], w1k_ref[k],
                            preferred_element_type=jnp.float32)
    y1 = acc + b1_ref[...]                                                # (144, 40)

    # gated activation + in-kernel validity mask (positions >= 132 are junk)
    valid = (jax.lax.broadcasted_iota(jnp.int32, (EXPL, 1), 0)
             < SEQ_LEN).astype(jnp.float32)
    h = y1[:, :CMP_IN] * jax.nn.sigmoid(y1[:, CMP_IN:]) * valid           # (144, 20)

    # zero-padded per-sample h buffer: rows [0,8) are the compressor's left pad,
    # masked rows >= 132 are its right pad.  Re-written fully every grid step.
    hbuf_ref[0:HOFF, :] = jnp.zeros((HOFF, CMP_IN), jnp.float32)
    hbuf_ref[HOFF:HOFF + EXPL, :] = h

    # ---- compressor Conv1d(20->6, k=11, pad=5) folded into ONE K=220 matmul ----
    # patches[j, k*20 + ci] = h[j - 5 + k, ci]  (shifted copies concatenated on lanes)
    patches = jnp.concatenate(
        [hbuf_ref[3 + k:3 + k + LP, :] for k in range(K2)], axis=1)       # (136, 220)
    e = jnp.dot(patches, w2f_ref[...],
                preferred_element_type=jnp.float32) + b2_ref[...]         # (136, 6)
    emb_ref[0] = e[:, :EMB] * jax.nn.sigmoid(e[:, EMB:])                  # (136, 3)


def head_stage_kernel(emb_ref, w3_ref, b3_ref, out_ref):
    """BatchNorm1d(132, affine=False, batch stats) + Linear(3->21) + softmax.

    emb_ref : (N, 136, 3) f32   gated embeddings (rows 132..135 per sample are junk)
    w3_ref  : (3, 21) f32
    b3_ref  : (1, 21) f32
    out_ref : (N, 136, 21) f32
    """
    n = emb_ref.shape[0]
    inv_cnt = 1.0 / float(n * EMB)

    # per-position mean over (batch, emb-channel)  -- fori_loop, no Python unroll
    def sum_body(c, acc):
        return acc + emb_ref[c]
    msum = jax.lax.fori_loop(0, n, sum_body, jnp.zeros((LP, EMB), jnp.float32))
    mean_l = jnp.sum(msum, axis=1, keepdims=True) * inv_cnt               # (136, 1)

    # two-pass (centered) variance for accuracy
    def var_body(c, acc):
        d = emb_ref[c] - mean_l
        return acc + jnp.sum(d * d, axis=1, keepdims=True)
    vsum = jax.lax.fori_loop(0, n, var_body, jnp.zeros((LP, 1), jnp.float32))
    inv_std = jax.lax.rsqrt(vsum * inv_cnt + BN_EPS)                      # (136, 1)

    w3 = w3_ref[...]
    b3 = b3_ref[...]

    # per-sample BN apply + Linear + softmax on 8-aligned 136-row tiles
    def out_body(c, carry):
        e = (emb_ref[c] - mean_l) * inv_std                               # (136, 3)
        logits = jnp.dot(e, w3, preferred_element_type=jnp.float32) + b3  # (136, 21)
        logits = logits - jnp.max(logits, axis=-1, keepdims=True)
        p = jnp.exp(logits)
        s = jnp.sum(p, axis=-1, keepdims=True)
        r = pl.reciprocal(s, approx=True)          # EUP reciprocal (free slot) ...
        r = r * (2.0 - s * r)                      # ... + one Newton step
        out_ref[c] = p * r
        return carry
    jax.lax.fori_loop(0, n, out_body, 0)


def autoencoder_forward(x, params):
    """x: (N, 132, 21) float32 one-hot.  Returns softmax reconstruction (N, 132, 21)."""
    w1, b1, w2, b2, w3, b3 = params                # PyTorch layouts
    N, L, C = x.shape
    assert L == SEQ_LEN and C == IN_CH

    # raw one-hot input on a per-sample zero-padded layout, bf16 (exact for 0/1):
    # this replaces the old 24x-inflated wrapper-side im2col + mask inputs.
    xpad = jnp.pad(x, ((0, 0), (P1, XLEN - P1 - SEQ_LEN), (0, 0))).astype(jnp.bfloat16)

    # weights re-laid out for NLC matmuls (kept f32 for accuracy headroom)
    w1k = jnp.transpose(w1, (2, 1, 0))                                   # (21, 21, 40)
    w2f = jnp.transpose(w2, (2, 1, 0)).reshape(KFOLD, CMP_CH)            # (220, 6)
    w3t = jnp.transpose(w3, (1, 0))                                      # (3, 21)
    b1r = b1.reshape(1, EXP_CH)
    b2r = b2.reshape(1, CMP_CH)
    b3r = b3.reshape(1, OUT_CH)

    # ---- stage A: conv1 + conv2, gridded over the batch ("parallel") ----
    emb = pl.pallas_call(
        conv_stage_kernel,
        out_shape=jax.ShapeDtypeStruct((N, LP, EMB), jnp.float32),
        grid=(N,),
        in_specs=[
            pl.BlockSpec((1, XLEN, IN_CH), lambda c: (c, 0, 0)),
            pl.BlockSpec((K1, IN_CH, EXP_CH), lambda c: (0, 0, 0)),
            pl.BlockSpec((1, EXP_CH), lambda c: (0, 0)),
            pl.BlockSpec((KFOLD, CMP_CH), lambda c: (0, 0)),
            pl.BlockSpec((1, CMP_CH), lambda c: (0, 0)),
        ],
        out_specs=pl.BlockSpec((1, LP, EMB), lambda c: (c, 0, 0)),
        scratch_shapes=[pltpu.VMEM((HBUF, CMP_IN), jnp.float32)],
        compiler_params=pltpu.CompilerParams(dimension_semantics=("parallel",)),
    )(xpad, w1k, b1r, w2f, b2r)

    # ---- stage B: BatchNorm (batch statistics) + Linear(3->21) + softmax ----
    head_bytes = (N * LP * (EMB + OUT_CH) + EMB * OUT_CH + OUT_CH) * 4
    head_params = None
    if head_bytes > 16 * 1024 * 1024:
        # TODO(synk): at very large N, grid the head stage too (batch-stat
        # accumulation on a trailing "arbitrary" axis) instead of raising VMEM.
        head_params = pltpu.CompilerParams(
            vmem_limit_bytes=min(2 * head_bytes, 100 * 1024 * 1024))
    vmem = pl.BlockSpec(memory_space=pltpu.MemorySpace.VMEM)
    out = pl.pallas_call(
        head_stage_kernel,
        out_shape=jax.ShapeDtypeStruct((N, LP, OUT_CH), jnp.float32),
        in_specs=[vmem, vmem, vmem],
        out_specs=vmem,
        compiler_params=head_params,
    )(emb, w3t, b3r)

    # drop the 4 alignment-padding rows per sample (keeps all kernel stores
    # 8-sublane aligned; the slice is cheap wrapper-side layout plumbing)
    return out[:, :SEQ_LEN, :]


def reference_forward(x, params):
    """Pure-JAX reference matching the PyTorch forward (decode=True)."""
    w1, b1, w2, b2, w3, b3 = params
    hi = jax.lax.Precision.HIGHEST
    xt = jnp.transpose(x, (0, 2, 1))                           # (N, 21, L)
    y1 = jax.lax.conv_general_dilated(
        xt, w1, (1,), [(P1, P1)],
        dimension_numbers=('NCH', 'OIH', 'NCH'), precision=hi) + b1[None, :, None]
    h = y1[:, :CMP_IN] * jax.nn.sigmoid(y1[:, CMP_IN:])
    y2 = jax.lax.conv_general_dilated(
        h, w2, (1,), [(P2, P2)],
        dimension_numbers=('NCH', 'OIH', 'NCH'), precision=hi) + b2[None, :, None]
    e = jnp.transpose(y2, (0, 2, 1))                           # (N, L, 6)
    e = e[:, :, :EMB] * jax.nn.sigmoid(e[:, :, EMB:])
    mean = jnp.mean(e, axis=(0, 2), keepdims=True)
    var = jnp.mean((e - mean) ** 2, axis=(0, 2), keepdims=True)
    e = (e - mean) / jnp.sqrt(var + BN_EPS)
    logits = jnp.einsum('nlc,oc->nlo', e, w3, precision=hi) + b3
    return jax.nn.softmax(logits, axis=-1)


def init_params(key):
    """Deterministic parameter init (PyTorch-style uniform(-1/sqrt(fan_in), ...))."""
    ks = jax.random.split(key, 6)

    def u(k, shape, fan_in):
        b = 1.0 / math.sqrt(fan_in)
        return jax.random.uniform(k, shape, jnp.float32, -b, b)

    w1 = u(ks[0], (EXP_CH, IN_CH, K1), IN_CH * K1)     # Conv1d(21, 40, 21)
    b1 = u(ks[1], (EXP_CH,), IN_CH * K1)
    w2 = u(ks[2], (CMP_CH, CMP_IN, K2), CMP_IN * K2)   # Conv1d(20, 6, 11)
    b2 = u(ks[3], (CMP_CH,), CMP_IN * K2)
    w3 = u(ks[4], (OUT_CH, EMB), EMB)                  # Linear(3, 21)
    b3 = u(ks[5], (OUT_CH,), EMB)
    return (w1, b1, w2, b2, w3, b3)


if __name__ == "__main__":
    key = jax.random.PRNGKey(0)
    kp, kx = jax.random.split(key)
    params = init_params(kp)

    # small deterministic one-hot input: batch=2, seq=132 (fixed by BN), 21 aas
    N = 2
    idx = jax.random.randint(kx, (N, SEQ_LEN), 0, IN_CH)
    x = jax.nn.one_hot(idx, IN_CH, dtype=jnp.float32)          # (2, 132, 21)

    out = autoencoder_forward(x, params)
    out = jax.block_until_ready(out)

    ref = reference_forward(x, params)
    assert out.shape == (N, SEQ_LEN, OUT_CH), out.shape
    assert bool(jnp.all(jnp.isfinite(out)))
    assert bool(jnp.allclose(out, ref, atol=1e-4, rtol=1e-4)), (
        float(jnp.max(jnp.abs(out - ref))))

    print("KERNEL_OK")
</pallas_src>

<mosaic_0001>
module attributes {stable_mosaic.version = 11 : i64} {
  func.func @conv_stage_kernel(%arg0: i32, %arg1: memref<1x168x21xbf16, #tpu.memory_space<vmem>>, %arg2: memref<21x21x40xf32, #tpu.memory_space<vmem>>, %arg3: memref<1x40xf32, #tpu.memory_space<vmem>>, %arg4: memref<220x6xf32, #tpu.memory_space<vmem>>, %arg5: memref<1x6xf32, #tpu.memory_space<vmem>>, %arg6: memref<1x136x3xf32, #tpu.memory_space<vmem>>, %arg7: memref<152x20xf32, #tpu.memory_space<vmem>>) attributes {dimension_semantics = [#tpu.dimension_semantics<parallel>], iteration_bounds = array<i64: 2>, scalar_prefetch = 0 : i64, scratch_operands = 1 : i64, tpu.core_type = #tpu.core_type<tc>, window_params = [{transform_indices = @transform_0, window_bounds = array<i64: 1, 168, 21>}, {pipeline_mode = #tpu.pipeline_mode<synchronous>, transform_indices = @transform_1, window_bounds = array<i64: 21, 21, 40>}, {pipeline_mode = #tpu.pipeline_mode<synchronous>, transform_indices = @transform_2, window_bounds = array<i64: 1, 40>}, {pipeline_mode = #tpu.pipeline_mode<synchronous>, transform_indices = @transform_3, window_bounds = array<i64: 220, 6>}, {pipeline_mode = #tpu.pipeline_mode<synchronous>, transform_indices = @transform_4, window_bounds = array<i64: 1, 6>}, {transform_indices = @transform_5, window_bounds = array<i64: 1, 136, 3>}]} {
    %c0 = arith.constant 0 : index
    %c0_0 = arith.constant 0 : index
    %c0_1 = arith.constant 0 : index
    %0 = vector.load %arg1[%c0, %c0_0, %c0_1] : memref<1x168x21xbf16, #tpu.memory_space<vmem>>, vector<1x168x21xbf16>
    %1 = vector.shape_cast %0 : vector<1x168x21xbf16> to vector<168x21xbf16>
    %2 = arith.extf %1 : vector<168x21xbf16> to vector<168x21xf32>
    %cst = arith.constant 0.000000e+00 : f32
    %3 = vector.broadcast %cst : f32 to vector<144x40xf32>
    %4 = vector.extract_strided_slice %2 {offsets = [0, 0], sizes = [144, 21], strides = [1, 1]} : vector<168x21xf32> to vector<144x21xf32>
    %c0_2 = arith.constant 0 : index
    %c0_3 = arith.constant 0 : index
    %c0_4 = arith.constant 0 : index
    %5 = vector.load %arg2[%c0_2, %c0_3, %c0_4] : memref<21x21x40xf32, #tpu.memory_space<vmem>>, vector<1x21x40xf32>
    %6 = vector.shape_cast %5 : vector<1x21x40xf32> to vector<21x40xf32>
    %cst_5 = arith.constant dense<0.000000e+00> : vector<144x40xf32>
    %7 = tpu.matmul %4, %6, %cst_5 {dimension_numbers = #tpu.dot_dimension_numbers<[1], [0], [0], [1], [0, 0, 1, 1], [], []>} : vector<144x21xf32>, vector<21x40xf32>, vector<144x40xf32> -> vector<144x40xf32>
    %8 = arith.addf %3, %7 : vector<144x40xf32>
    %9 = vector.extract_strided_slice %2 {offsets = [1, 0], sizes = [144, 21], strides = [1, 1]} : vector<168x21xf32> to vector<144x21xf32>
    %c1 = arith.constant 1 : index
    %c0_6 = arith.constant 0 : index
    %c0_7 = arith.constant 0 : index
    %10 = vector.load %arg2[%c1, %c0_6, %c0_7] : memref<21x21x40xf32, #tpu.memory_space<vmem>>, vector<1x21x40xf32>
    %11 = vector.shape_cast %10 : vector<1x21x40xf32> to vector<21x40xf32>
    %cst_8 = arith.constant dense<0.000000e+00> : vector<144x40xf32>
    %12 = tpu.matmul %9, %11, %cst_8 {dimension_numbers = #tpu.dot_dimension_numbers<[1], [0], [0], [1], [0, 0, 1, 1], [], []>} : vector<144x21xf32>, vector<21x40xf32>, vector<144x40xf32> -> vector<144x40xf32>
    %13 = arith.addf %8, %12 : vector<144x40xf32>
    %14 = vector.extract_strided_slice %2 {offsets = [2, 0], sizes = [144, 21], strides = [1, 1]} : vector<168x21xf32> to vector<144x21xf32>
    %c2 = arith.constant 2 : index
    %c0_9 = arith.constant 0 : index
    %c0_10 = arith.constant 0 : index
    %15 = vector.load %arg2[%c2, %c0_9, %c0_10] : memref<21x21x40xf32, #tpu.memory_space<vmem>>, vector<1x21x40xf32>
    %16 = vector.shape_cast %15 : vector<1x21x40xf32> to vector<21x40xf32>
    %cst_11 = arith.constant dense<0.000000e+00> : vector<144x40xf32>
    %17 = tpu.matmul %14, %16, %cst_11 {dimension_numbers = #tpu.dot_dimension_numbers<[1], [0], [0], [1], [0, 0, 1, 1], [], []>} : vector<144x21xf32>, vector<21x40xf32>, vector<144x40xf32> -> vector<144x40xf32>
    %18 = arith.addf %13, %17 : vector<144x40xf32>
    %19 = vector.extract_strided_slice %2 {offsets = [3, 0], sizes = [144, 21], strides = [1, 1]} : vector<168x21xf32> to vector<144x21xf32>
    %c3 = arith.constant 3 : index
    %c0_12 = arith.constant 0 : index
    %c0_13 = arith.constant 0 : index
    %20 = vector.load %arg2[%c3, %c0_12, %c0_13] : memref<21x21x40xf32, #tpu.memory_space<vmem>>, vector<1x21x40xf32>
    %21 = vector.shape_cast %20 : vector<1x21x40xf32> to vector<21x40xf32>
    %cst_14 = arith.constant dense<0.000000e+00> : vector<144x40xf32>
    %22 = tpu.matmul %19, %21, %cst_14 {dimension_numbers = #tpu.dot_dimension_numbers<[1], [0], [0], [1], [0, 0, 1, 1], [], []>} : vector<144x21xf32>, vector<21x40xf32>, vector<144x40xf32> -> vector<144x40xf32>
    %23 = arith.addf %18, %22 : vector<144x40xf32>
    %24 = vector.extract_strided_slice %2 {offsets = [4, 0], sizes = [144, 21], strides = [1, 1]} : vector<168x21xf32> to vector<144x21xf32>
    %c4 = arith.constant 4 : index
    %c0_15 = arith.constant 0 : index
    %c0_16 = arith.constant 0 : index
    %25 = vector.load %arg2[%c4, %c0_15, %c0_16] : memref<21x21x40xf32, #tpu.memory_space<vmem>>, vector<1x21x40xf32>
    %26 = vector.shape_cast %25 : vector<1x21x40xf32> to vector<21x40xf32>
    %cst_17 = arith.constant dense<0.000000e+00> : vector<144x40xf32>
    %27 = tpu.matmul %24, %26, %cst_17 {dimension_numbers = #tpu.dot_dimension_numbers<[1], [0], [0], [1], [0, 0, 1, 1], [], []>} : vector<144x21xf32>, vector<21x40xf32>, vector<144x40xf32> -> vector<144x40xf32>
    %28 = arith.addf %23, %27 : vector<144x40xf32>
    %29 = vector.extract_strided_slice %2 {offsets = [5, 0], sizes = [144, 21], strides = [1, 1]} : vector<168x21xf32> to vector<144x21xf32>
    %c5 = arith.constant 5 : index
    %c0_18 = arith.constant 0 : index
    %c0_19 = arith.constant 0 : index
    %30 = vector.load %arg2[%c5, %c0_18, %c0_19] : memref<21x21x40xf32, #tpu.memory_space<vmem>>, vector<1x21x40xf32>
    %31 = vector.shape_cast %30 : vector<1x21x40xf32> to vector<21x40xf32>
    %cst_20 = arith.constant dense<0.000000e+00> : vector<144x40xf32>
    %32 = tpu.matmul %29, %31, %cst_20 {dimension_numbers = #tpu.dot_dimension_numbers<[1], [0], [0], [1], [0, 0, 1, 1], [], []>} : vector<144x21xf32>, vector<21x40xf32>, vector<144x40xf32> -> vector<144x40xf32>
    %33 = arith.addf %28, %32 : vector<144x40xf32>
    %34 = vector.extract_strided_slice %2 {offsets = [6, 0], sizes = [144, 21], strides = [1, 1]} : vector<168x21xf32> to vector<144x21xf32>
    %c6 = arith.constant 6 : index
    %c0_21 = arith.constant 0 : index
    %c0_22 = arith.constant 0 : index
    %35 = vector.load %arg2[%c6, %c0_21, %c0_22] : memref<21x21x40xf32, #tpu.memory_space<vmem>>, vector<1x21x40xf32>
    %36 = vector.shape_cast %35 : vector<1x21x40xf32> to vector<21x40xf32>
    %cst_23 = arith.constant dense<0.000000e+00> : vector<144x40xf32>
    %37 = tpu.matmul %34, %36, %cst_23 {dimension_numbers = #tpu.dot_dimension_numbers<[1], [0], [0], [1], [0, 0, 1, 1], [], []>} : vector<144x21xf32>, vector<21x40xf32>, vector<144x40xf32> -> vector<144x40xf32>
    %38 = arith.addf %33, %37 : vector<144x40xf32>
    %39 = vector.extract_strided_slice %2 {offsets = [7, 0], sizes = [144, 21], strides = [1, 1]} : vector<168x21xf32> to vector<144x21xf32>
    %c7 = arith.constant 7 : index
    %c0_24 = arith.constant 0 : index
    %c0_25 = arith.constant 0 : index
    %40 = vector.load %arg2[%c7, %c0_24, %c0_25] : memref<21x21x40xf32, #tpu.memory_space<vmem>>, vector<1x21x40xf32>
    %41 = vector.shape_cast %40 : vector<1x21x40xf32> to vector<21x40xf32>
    %cst_26 = arith.constant dense<0.000000e+00> : vector<144x40xf32>
    %42 = tpu.matmul %39, %41, %cst_26 {dimension_numbers = #tpu.dot_dimension_numbers<[1], [0], [0], [1], [0, 0, 1, 1], [], []>} : vector<144x21xf32>, vector<21x40xf32>, vector<144x40xf32> -> vector<144x40xf32>
    %43 = arith.addf %38, %42 : vector<144x40xf32>
    %44 = vector.extract_strided_slice %2 {offsets = [8, 0], sizes = [144, 21], strides = [1, 1]} : vector<168x21xf32> to vector<144x21xf32>
    %c8 = arith.constant 8 : index
    %c0_27 = arith.constant 0 : index
    %c0_28 = arith.constant 0 : index
    %45 = vector.load %arg2[%c8, %c0_27, %c0_28] : memref<21x21x40xf32, #tpu.memory_space<vmem>>, vector<1x21x40xf32>
    %46 = vector.shape_cast %45 : vector<1x21x40xf32> to vector<21x40xf32>
    %cst_29 = arith.constant dense<0.000000e+00> : vector<144x40xf32>
    %47 = tpu.matmul %44, %46, %cst_29 {dimension_numbers = #tpu.dot_dimension_numbers<[1], [0], [0], [1], [0, 0, 1, 1], [], []>} : vector<144x21xf32>, vector<21x40xf32>, vector<144x40xf32> -> vector<144x40xf32>
    %48 = arith.addf %43, %47 : vector<144x40xf32>
    %49 = vector.extract_strided_slice %2 {offsets = [9, 0], sizes = [144, 21], strides = [1, 1]} : vector<168x21xf32> to vector<144x21xf32>
    %c9 = arith.constant 9 : index
    %c0_30 = arith.constant 0 : index
    %c0_31 = arith.constant 0 : index
    %50 = vector.load %arg2[%c9, %c0_30, %c0_31] : memref<21x21x40xf32, #tpu.memory_space<vmem>>, vector<1x21x40xf32>
    %51 = vector.shape_cast %50 : vector<1x21x40xf32> to vector<21x40xf32>
    %cst_32 = arith.constant dense<0.000000e+00> : vector<144x40xf32>
    %52 = tpu.matmul %49, %51, %cst_32 {dimension_numbers = #tpu.dot_dimension_numbers<[1], [0], [0], [1], [0, 0, 1, 1], [], []>} : vector<144x21xf32>, vector<21x40xf32>, vector<144x40xf32> -> vector<144x40xf32>
    %53 = arith.addf %48, %52 : vector<144x40xf32>
    %54 = vector.extract_strided_slice %2 {offsets = [10, 0], sizes = [144, 21], strides = [1, 1]} : vector<168x21xf32> to vector<144x21xf32>
    %c10 = arith.constant 10 : index
    %c0_33 = arith.constant 0 : index
    %c0_34 = arith.constant 0 : index
    %55 = vector.load %arg2[%c10, %c0_33, %c0_34] : memref<21x21x40xf32, #tpu.memory_space<vmem>>, vector<1x21x40xf32>
    %56 = vector.shape_cast %55 : vector<1x21x40xf32> to vector<21x40xf32>
    %cst_35 = arith.constant dense<0.000000e+00> : vector<144x40xf32>
    %57 = tpu.matmul %54, %56, %cst_35 {dimension_numbers = #tpu.dot_dimension_numbers<[1], [0], [0], [1], [0, 0, 1, 1], [], []>} : vector<144x21xf32>, vector<21x40xf32>, vector<144x40xf32> -> vector<144x40xf32>
    %58 = arith.addf %53, %57 : vector<144x40xf32>
    %59 = vector.extract_strided_slice %2 {offsets = [11, 0], sizes = [144, 21], strides = [1, 1]} : vector<168x21xf32> to vector<144x21xf32>
    %c11 = arith.constant 11 : index
    %c0_36 = arith.constant 0 : index
    %c0_37 = arith.constant 0 : index
    %60 = vector.load %arg2[%c11, %c0_36, %c0_37] : memref<21x21x40xf32, #tpu.memory_space<vmem>>, vector<1x21x40xf32>
    %61 = vector.shape_cast %60 : vector<1x21x40xf32> to vector<21x40xf32>
    %cst_38 = arith.constant dense<0.000000e+00> : vector<144x40xf32>
    %62 = tpu.matmul %59, %61, %cst_38 {dimension_numbers = #tpu.dot_dimension_numbers<[1], [0], [0], [1], [0, 0, 1, 1], [], []>} : vector<144x21xf32>, vector<21x40xf32>, vector<144x40xf32> -> vector<144x40xf32>
    %63 = arith.addf %58, %62 : vector<144x40xf32>
    %64 = vector.extract_strided_slice %2 {offsets = [12, 0], sizes = [144, 21], strides = [1, 1]} : vector<168x21xf32> to vector<144x21xf32>
    %c12 = arith.constant 12 : index
    %c0_39 = arith.constant 0 : index
    %c0_40 = arith.constant 0 : index
    %65 = vector.load %arg2[%c12, %c0_39, %c0_40] : memref<21x21x40xf32, #tpu.memory_space<vmem>>, vector<1x21x40xf32>
    %66 = vector.shape_cast %65 : vector<1x21x40xf32> to vector<21x40xf32>
    %cst_41 = arith.constant dense<0.000000e+00> : vector<144x40xf32>
    %67 = tpu.matmul %64, %66, %cst_41 {dimension_numbers = #tpu.dot_dimension_numbers<[1], [0], [0], [1], [0, 0, 1, 1], [], []>} : vector<144x21xf32>, vector<21x40xf32>, vector<144x40xf32> -> vector<144x40xf32>
    %68 = arith.addf %63, %67 : vector<144x40xf32>
    %69 = vector.extract_strided_slice %2 {offsets = [13, 0], sizes = [144, 21], strides = [1, 1]} : vector<168x21xf32> to vector<144x21xf32>
    %c13 = arith.constant 13 : index
    %c0_42 = arith.constant 0 : index
    %c0_43 = arith.constant 0 : index
    %70 = vector.load %arg2[%c13, %c0_42, %c0_43] : memref<21x21x40xf32, #tpu.memory_space<vmem>>, vector<1x21x40xf32>
    %71 = vector.shape_cast %70 : vector<1x21x40xf32> to vector<21x40xf32>
    %cst_44 = arith.constant dense<0.000000e+00> : vector<144x40xf32>
    %72 = tpu.matmul %69, %71, %cst_44 {dimension_numbers = #tpu.dot_dimension_numbers<[1], [0], [0], [1], [0, 0, 1, 1], [], []>} : vector<144x21xf32>, vector<21x40xf32>, vector<144x40xf32> -> vector<144x40xf32>
    %73 = arith.addf %68, %72 : vector<144x40xf32>
    %74 = vector.extract_strided_slice %2 {offsets = [14, 0], sizes = [144, 21], strides = [1, 1]} : vector<168x21xf32> to vector<144x21xf32>
    %c14 = arith.constant 14 : index
    %c0_45 = arith.constant 0 : index
    %c0_46 = arith.constant 0 : index
    %75 = vector.load %arg2[%c14, %c0_45, %c0_46] : memref<21x21x40xf32, #tpu.memory_space<vmem>>, vector<1x21x40xf32>
    %76 = vector.shape_cast %75 : vector<1x21x40xf32> to vector<21x40xf32>
    %cst_47 = arith.constant dense<0.000000e+00> : vector<144x40xf32>
    %77 = tpu.matmul %74, %76, %cst_47 {dimension_numbers = #tpu.dot_dimension_numbers<[1], [0], [0], [1], [0, 0, 1, 1], [], []>} : vector<144x21xf32>, vector<21x40xf32>, vector<144x40xf32> -> vector<144x40xf32>
    %78 = arith.addf %73, %77 : vector<144x40xf32>
    %79 = vector.extract_strided_slice %2 {offsets = [15, 0], sizes = [144, 21], strides = [1, 1]} : vector<168x21xf32> to vector<144x21xf32>
    %c15 = arith.constant 15 : index
    %c0_48 = arith.constant 0 : index
    %c0_49 = arith.constant 0 : index
    %80 = vector.load %arg2[%c15, %c0_48, %c0_49] : memref<21x21x40xf32, #tpu.memory_space<vmem>>, vector<1x21x40xf32>
    %81 = vector.shape_cast %80 : vector<1x21x40xf32> to vector<21x40xf32>
    %cst_50 = arith.constant dense<0.000000e+00> : vector<144x40xf32>
    %82 = tpu.matmul %79, %81, %cst_50 {dimension_numbers = #tpu.dot_dimension_numbers<[1], [0], [0], [1], [0, 0, 1, 1], [], []>} : vector<144x21xf32>, vector<21x40xf32>, vector<144x40xf32> -> vector<144x40xf32>
    %83 = arith.addf %78, %82 : vector<144x40xf32>
    %84 = vector.extract_strided_slice %2 {offsets = [16, 0], sizes = [144, 21], strides = [1, 1]} : vector<168x21xf32> to vector<144x21xf32>
    %c16 = arith.constant 16 : index
    %c0_51 = arith.constant 0 : index
    %c0_52 = arith.constant 0 : index
    %85 = vector.load %arg2[%c16, %c0_51, %c0_52] : memref<21x21x40xf32, #tpu.memory_space<vmem>>, vector<1x21x40xf32>
    %86 = vector.shape_cast %85 : vector<1x21x40xf32> to vector<21x40xf32>
    %cst_53 = arith.constant dense<0.000000e+00> : vector<144x40xf32>
    %87 = tpu.matmul %84, %86, %cst_53 {dimension_numbers = #tpu.dot_dimension_numbers<[1], [0], [0], [1], [0, 0, 1, 1], [], []>} : vector<144x21xf32>, vector<21x40xf32>, vector<144x40xf32> -> vector<144x40xf32>
    %88 = arith.addf %83, %87 : vector<144x40xf32>
    %89 = vector.extract_strided_slice %2 {offsets = [17, 0], sizes = [144, 21], strides = [1, 1]} : vector<168x21xf32> to vector<144x21xf32>
    %c17 = arith.constant 17 : index
    %c0_54 = arith.constant 0 : index
    %c0_55 = arith.constant 0 : index
    %90 = vector.load %arg2[%c17, %c0_54, %c0_55] : memref<21x21x40xf32, #tpu.memory_space<vmem>>, vector<1x21x40xf32>
    %91 = vector.shape_cast %90 : vector<1x21x40xf32> to vector<21x40xf32>
    %cst_56 = arith.constant dense<0.000000e+00> : vector<144x40xf32>
    %92 = tpu.matmul %89, %91, %cst_56 {dimension_numbers = #tpu.dot_dimension_numbers<[1], [0], [0], [1], [0, 0, 1, 1], [], []>} : vector<144x21xf32>, vector<21x40xf32>, vector<144x40xf32> -> vector<144x40xf32>
    %93 = arith.addf %88, %92 : vector<144x40xf32>
    %94 = vector.extract_strided_slice %2 {offsets = [18, 0], sizes = [144, 21], strides = [1, 1]} : vector<168x21xf32> to vector<144x21xf32>
    %c18 = arith.constant 18 : index
    %c0_57 = arith.constant 0 : index
    %c0_58 = arith.constant 0 : index
    %95 = vector.load %arg2[%c18, %c0_57, %c0_58] : memref<21x21x40xf32, #tpu.memory_space<vmem>>, vector<1x21x40xf32>
    %96 = vector.shape_cast %95 : vector<1x21x40xf32> to vector<21x40xf32>
    %cst_59 = arith.constant dense<0.000000e+00> : vector<144x40xf32>
    %97 = tpu.matmul %94, %96, %cst_59 {dimension_numbers = #tpu.dot_dimension_numbers<[1], [0], [0], [1], [0, 0, 1, 1], [], []>} : vector<144x21xf32>, vector<21x40xf32>, vector<144x40xf32> -> vector<144x40xf32>
    %98 = arith.addf %93, %97 : vector<144x40xf32>
    %99 = vector.extract_strided_slice %2 {offsets = [19, 0], sizes = [144, 21], strides = [1, 1]} : vector<168x21xf32> to vector<144x21xf32>
    %c19 = arith.constant 19 : index
    %c0_60 = arith.constant 0 : index
    %c0_61 = arith.constant 0 : index
    %100 = vector.load %arg2[%c19, %c0_60, %c0_61] : memref<21x21x40xf32, #tpu.memory_space<vmem>>, vector<1x21x40xf32>
    %101 = vector.shape_cast %100 : vector<1x21x40xf32> to vector<21x40xf32>
    %cst_62 = arith.constant dense<0.000000e+00> : vector<144x40xf32>
    %102 = tpu.matmul %99, %101, %cst_62 {dimension_numbers = #tpu.dot_dimension_numbers<[1], [0], [0], [1], [0, 0, 1, 1], [], []>} : vector<144x21xf32>, vector<21x40xf32>, vector<144x40xf32> -> vector<144x40xf32>
    %103 = arith.addf %98, %102 : vector<144x40xf32>
    %104 = vector.extract_strided_slice %2 {offsets = [20, 0], sizes = [144, 21], strides = [1, 1]} : vector<168x21xf32> to vector<144x21xf32>
    %c20 = arith.constant 20 : index
    %c0_63 = arith.constant 0 : index
    %c0_64 = arith.constant 0 : index
    %105 = vector.load %arg2[%c20, %c0_63, %c0_64] : memref<21x21x40xf32, #tpu.memory_space<vmem>>, vector<1x21x40xf32>
    %106 = vector.shape_cast %105 : vector<1x21x40xf32> to vector<21x40xf32>
    %cst_65 = arith.constant dense<0.000000e+00> : vector<144x40xf32>
    %107 = tpu.matmul %104, %106, %cst_65 {dimension_numbers = #tpu.dot_dimension_numbers<[1], [0], [0], [1], [0, 0, 1, 1], [], []>} : vector<144x21xf32>, vector<21x40xf32>, vector<144x40xf32> -> vector<144x40xf32>
    %108 = arith.addf %103, %107 : vector<144x40xf32>
    %c0_66 = arith.constant 0 : index
    %c0_67 = arith.constant 0 : index
    %109 = vector.load %arg3[%c0_66, %c0_67] : memref<1x40xf32, #tpu.memory_space<vmem>>, vector<1x40xf32>
    %110 = vector.broadcast %109 : vector<1x40xf32> to vector<144x40xf32>
    %111 = arith.addf %108, %110 : vector<144x40xf32>
    %112 = tpu.iota {dimensions = array<i32: 0>} : vector<144x1xi32>
    %c132_i32 = arith.constant 132 : i32
    %113 = vector.broadcast %c132_i32 : i32 to vector<144x1xi32>
    %114 = arith.cmpi slt, %112, %113 : vector<144x1xi32>
    %115 = arith.extui %114 : vector<144x1xi1> to vector<144x1xi32>
    %116 = arith.sitofp %115 : vector<144x1xi32> to vector<144x1xf32>
    %117 = vector.extract_strided_slice %111 {offsets = [0, 0], sizes = [144, 20], strides = [1, 1]} : vector<144x40xf32> to vector<144x20xf32>
    %118 = vector.extract_strided_slice %111 {offsets = [0, 20], sizes = [144, 20], strides = [1, 1]} : vector<144x40xf32> to vector<144x20xf32>
    %119 = arith.negf %118 : vector<144x20xf32>
    %120 = math.exp %119 : vector<144x20xf32>
    %cst_68 = arith.constant 1.000000e+00 : f32
    %121 = vector.broadcast %cst_68 : f32 to vector<144x20xf32>
    %122 = arith.addf %121, %120 : vector<144x20xf32>
    %123 = arith.divf %121, %122 : vector<144x20xf32>
    %124 = arith.mulf %117, %123 : vector<144x20xf32>
    %125 = vector.broadcast %116 : vector<144x1xf32> to vector<144x20xf32>
    %126 = arith.mulf %124, %125 : vector<144x20xf32>
    %cst_69 = arith.constant 0.000000e+00 : f32
    %127 = vector.broadcast %cst_69 : f32 to vector<8x20xf32>
    %c0_70 = arith.constant 0 : index
    %c0_71 = arith.constant 0 : index
    %128 = vector.load %arg7[%c0_70, %c0_71] : memref<152x20xf32, #tpu.memory_space<vmem>>, vector<8x20xf32>
    tpu.vector_store %arg7[%c0_70, %c0_71], %127 {strides = array<i32>} : memref<152x20xf32, #tpu.memory_space<vmem>>, vector<8x20xf32>,
    %c8_72 = arith.constant 8 : index
    %c0_73 = arith.constant 0 : index
    %129 = vector.load %arg7[%c8_72, %c0_73] : memref<152x20xf32, #tpu.memory_space<vmem>>, vector<144x20xf32>
    tpu.vector_store %arg7[%c8_72, %c0_73], %126 {strides = array<i32>} : memref<152x20xf32, #tpu.memory_space<vmem>>, vector<144x20xf32>,
    %c3_74 = arith.constant 3 : index
    %c0_75 = arith.constant 0 : index
    %130 = vector.load %arg7[%c3_74, %c0_75] : memref<152x20xf32, #tpu.memory_space<vmem>>, vector<136x20xf32>
    %c4_76 = arith.constant 4 : index
    %c0_77 = arith.constant 0 : index
    %131 = vector.load %arg7[%c4_76, %c0_77] : memref<152x20xf32, #tpu.memory_space<vmem>>, vector<136x20xf32>
    %c5_78 = arith.constant 5 : index
    %c0_79 = arith.constant 0 : index
    %132 = vector.load %arg7[%c5_78, %c0_79] : memref<152x20xf32, #tpu.memory_space<vmem>>, vector<136x20xf32>
    %c6_80 = arith.constant 6 : index
    %c0_81 = arith.constant 0 : index
    %133 = vector.load %arg7[%c6_80, %c0_81] : memref<152x20xf32, #tpu.memory_space<vmem>>, vector<136x20xf32>
    %c7_82 = arith.constant 7 : index
    %c0_83 = arith.constant 0 : index
    %134 = vector.load %arg7[%c7_82, %c0_83] : memref<152x20xf32, #tpu.memory_space<vmem>>, vector<136x20xf32>
    %c8_84 = arith.constant 8 : index
    %c0_85 = arith.constant 0 : index
    %135 = vector.load %arg7[%c8_84, %c0_85] : memref<152x20xf32, #tpu.memory_space<vmem>>, vector<136x20xf32>
    %c9_86 = arith.constant 9 : index
    %c0_87 = arith.constant 0 : index
    %136 = vector.load %arg7[%c9_86, %c0_87] : memref<152x20xf32, #tpu.memory_space<vmem>>, vector<136x20xf32>
    %c10_88 = arith.constant 10 : index
    %c0_89 = arith.constant 0 : index
    %137 = vector.load %arg7[%c10_88, %c0_89] : memref<152x20xf32, #tpu.memory_space<vmem>>, vector<136x20xf32>
    %c11_90 = arith.constant 11 : index
    %c0_91 = arith.constant 0 : index
    %138 = vector.load %arg7[%c11_90, %c0_91] : memref<152x20xf32, #tpu.memory_space<vmem>>, vector<136x20xf32>
    %c12_92 = arith.constant 12 : index
    %c0_93 = arith.constant 0 : index
    %139 = vector.load %arg7[%c12_92, %c0_93] : memref<152x20xf32, #tpu.memory_space<vmem>>, vector<136x20xf32>
    %c13_94 = arith.constant 13 : index
    %c0_95 = arith.constant 0 : index
    %140 = vector.load %arg7[%c13_94, %c0_95] : memref<152x20xf32, #tpu.memory_space<vmem>>, vector<136x20xf32>
    %141 = tpu.concatenate %130, %131, %132, %133, %134, %135, %136, %137, %138, %139, %140 in 1 : vector<136x20xf32>, vector<136x20xf32>, vector<136x20xf32>, vector<136x20xf32>, vector<136x20xf32>, vector<136x20xf32>, vector<136x20xf32>, vector<136x20xf32>, vector<136x20xf32>, vector<136x20xf32>, vector<136x20xf32> -> vector<136x220xf32>
    %c0_96 = arith.constant 0 : index
    %c0_97 = arith.constant 0 : index
    %142 = vector.load %arg4[%c0_96, %c0_97] : memref<220x6xf32, #tpu.memory_space<vmem>>, vector<220x6xf32>
    %cst_98 = arith.constant dense<0.000000e+00> : vector<136x6xf32>
    %143 = tpu.matmul %141, %142, %cst_98 {dimension_numbers = #tpu.dot_dimension_numbers<[1], [0], [0], [1], [0, 0, 1, 1], [], []>} : vector<136x220xf32>, vector<220x6xf32>, vector<136x6xf32> -> vector<136x6xf32>
    %c0_99 = arith.constant 0 : index
    %c0_100 = arith.constant 0 : index
    %144 = vector.load %arg5[%c0_99, %c0_100] : memref<1x6xf32, #tpu.memory_space<vmem>>, vector<1x6xf32>
    %145 = vector.broadcast %144 : vector<1x6xf32> to vector<136x6xf32>
    %146 = arith.addf %143, %145 : vector<136x6xf32>
    %147 = vector.extract_strided_slice %146 {offsets = [0, 0], sizes = [136, 3], strides = [1, 1]} : vector<136x6xf32> to vector<136x3xf32>
    %148 = vector.extract_strided_slice %146 {offsets = [0, 3], sizes = [136, 3], strides = [1, 1]} : vector<136x6xf32> to vector<136x3xf32>
    %149 = arith.negf %148 : vector<136x3xf32>
    %150 = math.exp %149 : vector<136x3xf32>
    %cst_101 = arith.constant 1.000000e+00 : f32
    %151 = vector.broadcast %cst_101 : f32 to vector<136x3xf32>
    %152 = arith.addf %151, %150 : vector<136x3xf32>
    %153 = arith.divf %151, %152 : vector<136x3xf32>
    %154 = arith.mulf %147, %153 : vector<136x3xf32>
    %c0_102 = arith.constant 0 : index
    %c0_103 = arith.constant 0 : index
    %c0_104 = arith.constant 0 : index
    %155 = vector.load %arg6[%c0_102, %c0_103, %c0_104] : memref<1x136x3xf32, #tpu.memory_space<vmem>>, vector<1x136x3xf32>
    %156 = vector.shape_cast %155 : vector<1x136x3xf32> to vector<136x3xf32>
    %157 = vector.shape_cast %154 : vector<136x3xf32> to vector<1x136x3xf32>
    tpu.vector_store %arg6[%c0_102, %c0_103, %c0_104], %157 {strides = array<i32>} : memref<1x136x3xf32, #tpu.memory_space<vmem>>, vector<1x136x3xf32>,
    return
  }
  func.func @transform_0(%arg0: i32) -> (i32, i32, i32) {
    %c0_i32 = arith.constant 0 : i32
    %c0_i32_0 = arith.constant 0 : i32
    %c0_i32_1 = arith.constant 0 : i32
    return %arg0, %c0_i32, %c0_i32_0 : i32, i32, i32
  }
  func.func @transform_1(%arg0: i32) -> (i32, i32, i32) {
    %c0_i32 = arith.constant 0 : i32
    %c0_i32_0 = arith.constant 0 : i32
    %c0_i32_1 = arith.constant 0 : i32
    %c0_i32_2 = arith.constant 0 : i32
    return %c0_i32, %c0_i32_0, %c0_i32_1 : i32, i32, i32
  }
  func.func @transform_2(%arg0: i32) -> (i32, i32) {
    %c0_i32 = arith.constant 0 : i32
    %c0_i32_0 = arith.constant 0 : i32
    %c0_i32_1 = arith.constant 0 : i32
    return %c0_i32, %c0_i32_0 : i32, i32
  }
  func.func @transform_3(%arg0: i32) -> (i32, i32) {
    %c0_i32 = arith.constant 0 : i32
    %c0_i32_0 = arith.constant 0 : i32
    %c0_i32_1 = arith.constant 0 : i32
    return %c0_i32, %c0_i32_0 : i32, i32
  }
  func.func @transform_4(%arg0: i32) -> (i32, i32) {
    %c0_i32 = arith.constant 0 : i32
    %c0_i32_0 = arith.constant 0 : i32
    %c0_i32_1 = arith.constant 0 : i32
    return %c0_i32, %c0_i32_0 : i32, i32
  }
  func.func @transform_5(%arg0: i32) -> (i32, i32, i32) {
    %c0_i32 = arith.constant 0 : i32
    %c0_i32_0 = arith.constant 0 : i32
    %c0_i32_1 = arith.constant 0 : i32
    return %arg0, %c0_i32, %c0_i32_0 : i32, i32, i32
  }
}

</mosaic_0001>

<bundles_post_ra>
// kernel: tpu_custom_call.1
= control target key start
LH: loop header
LB: loop body
LE: loop exit
PB: predicated region body
PF: predicated region fallthrough
CT: control target
= control target key end

     0   :  { %10 = vsyncpa [#allocation4], 0  ;;  %s8576_s18 = smov 0   ;;  %s11807_s0 = inlined_call_operand.vmem [shape: bf16[2,168,21], index: 0, kind: input, shape index: {}]   ;;  %s11808_s1 = inlined_call_operand.hbm [shape: f32[21,21,40], index: 1, kind: input, shape index: {}]   ;;  %s11809_s2 = inlined_call_operand.vmem [shape: f32[1,40], index: 2, kind: input, shape index: {}]   ;;  %s11810_s3 = inlined_call_operand.vmem [shape: f32[220,6], index: 3, kind: input, shape index: {}]   ;;  %s11811_s4 = inlined_call_operand.vmem [shape: f32[1,6], index: 4, kind: input, shape index: {}]   ;;  %s11812_s5 = inlined_call_operand.vmem [shape: f32[2,136,3], index: 5, kind: output, shape index: {}]  }
   0x1 LB: > { %s6461_s19 = sadd.s32 4294967295, %s8528_s18   ;;  %p6463_p0 = scmp.ge.s32.totalorder %s8528_s18, 1  ;;  %s8528_s18 = sphi %s8576_s18, %s16_s18  }
   0x2   : > { %p157_p1 = scmp.lt.s32.totalorder %s8528_s18, 3  ;;  %s8530_s20 = smov [#allocation3]  }
   0x3   : > { %s169_s21 = sshll.u32 %s8530_s20, 4  ;;  %p8126_p3 = scmp.eq.s32.totalorder %s6461_s19, 0  ;;  %s170_s21 = int_to_ptr.vmem [resolvable:$true] %s169_s21 }
   0x4   : > { %p8584_p2 = pnand %p6463_p0, %p157_p1  ;;  %s8503_s23 = scalar_lea.vmem %s170_s21, 8064 }
   0x5   : > { %p8504_p7 = scmp.ne.s32.totalorder %s170_s21, %s8503_s23  ;;  %p8511_p10 = scmp.lt.s32.totalorder %s170_s21, %s170_s21 }
   0x6   : > { %p8122_p4 = pneg %p8584_p2  ;;  %p8512_p11 = scmp.lt.s32.totalorder %s8503_s23, %s8503_s23 }
   0x8   : > { %p8123_p5 = pnand %p8126_p3, %p8122_p4  ;;  %p8513_p12 = por %p8512_p11, %p8511_p10 }
   0xa   : > { %p8494_p6 = pneg %p8123_p5 }
   0xc   : > { %p8506_p8 = pnand %p8504_p7, %p8494_p6 }
   0xe   : > { %p8507_p9 = pneg %p8506_p8 }
  0x10   : > { %p8514_p13 = pnand %p8513_p12, %p8507_p9 }
  0x12   : > { %8517 = shalt.err (!%p8514_p13)
}
  0x13   : > { %s8531_s24 = smov 128   ;;  %s8532_s25 = smov 8  }
  0x14   : > { %8125 = dma.hbm_to_vmem [thread:$0]  (!%p8123_p5), %s11808_s1, 8064, %s170_s21, [#allocation4], %s8531_s24, %s8531_s24, %s8532_s25  }
  0x15   : > { %202 = sbr.rel (%p8584_p2) target bundleno = 1508 (0x5e4), region = 40 }
  0x1a   : > { %8523 = dma.done.wait (%p8126_p3), [#allocation4], 8064  }
  0x1b   : > { %8525 = vsyncadd (%p8126_p3), [#allocation4], 4294959232  ;;  %p230_p0 = scmp.lt.s32.totalorder %s6461_s19, 1  ;;  %vm383_vm0 = vcmask 1044480   ;;  %v288_v0 = vld [vmem:[#allocation3 + $0x28] sm:$0x1f] }
  0x1c   : > { %v287_v1 = vld [vmem:[#allocation3 + $0x20] sm:$0xff]  ;;  %7417 = vmatprep.subr.msk.mxu0 %vm383_vm0, %v288_v0  ;;  %v284_v4 = vld [vmem:[#allocation3 + $0x10] sm:$0x1f]  ;;  %v286_v5 = vld [vmem:[#allocation3 + $0x18] sm:$0xff]  ;;  %vm308_vm1 = vcmask 1046528   ;;  %vm346_vm2 = vcmask 171008  }
  0x1d   : > { %s12313_s19 = smov (!%p230_p0, %s6461_s19), 1  ;;  %7418 = vmatpush3.msk.msra.mxu0 %vm383_vm0, %v288_v0  ;;  %8110 = vmatprep.subr.msk.mxu1 %vm383_vm0, %v284_v4  ;;  %v283_v14 = vld [vmem:[#allocation3 + $0x8] sm:$0xff]  ;;  %v282_v19 = vld [vmem:[#allocation3] sm:$0xff]  ;;  %v993_v29 = vld [vmem:[#allocation3 + $0x58] sm:$0x1f]  ;;  %vm1501_vm3 = vcmask 1042432  }
  0x1e   : > { %s8116_s28 = smul.u32 84, %s12313_s19  ;;  %7419 = vmatprep.subr.mxu0 %v287_v1  ;;  %8113 = vmatpush3.msk.msra.mxu1 %vm383_vm0, %v284_v4  ;;  %v8671_v39 = vld [vmem:[#allocation3 + $0x40] sm:$0x1f]  ;;  %v992_v45 = vld [vmem:[#allocation3 + $0x50] sm:$0xff]  ;;  %v991_v50 = vld [vmem:[#allocation3 + $0x48] sm:$0xff]  ;;  %vm740_vm4 = vcmask 1045504  }
  0x1f   : > { %7420 = vmatpush3.msra.mxu0 %v287_v1  ;;  %8111 = vmatprep.subr.mxu1 %v283_v14  ;;  %v1500_v58 = vld [vmem:[#allocation3 + $0x88] sm:$0x1f]  ;;  %vm2009_vm5 = vcmask 1040384   ;;  %vm1247_vm6 = vcmask 1043456   ;;  %vm1755_vm7 = vcmask 1041408   ;;  %vm4963_vm8 = vcmask 162816  }
  0x20   : > { %s8604_s6 = scalar_lea.vmem %s11807_s0, %s8116_s28  ;;  %7421 = vmatprep.subr.mxu0 %v286_v5  ;;  %8114 = vmatpush3.msra.mxu1 %v283_v14  ;;  %s8534_s9 = smov 108   ;;  %vm5877_vm10 = vcmask 97280   ;;  %vm5895_vm11 = vcmask 261120   ;;  %vm5787_vm12 = vcmask 326656   ;;  %vm5913_vm13 = vcmask 424960  }
  0x21   : > { %v6928_v2 = vld [vmem:[%s8604_s6] sm:$0xff]   ;;  %v6967_v3 = vld [vmem:[%s8604_s6 + $0x8] sm:$0xff]   ;;  %v6968_v10 = vld [vmem:[%s8604_s6 + $0x10] sm:$0xff]   ;;  %7422 = vmatpush3.msra.mxu0 %v286_v5  ;;  %8112 = vmatprep.subr.mxu1 %v282_v19  ;;  %s8535_s8 = smov 40   ;;  %s8537_s10 = smov 12   ;;  %vm5931_vm14 = vcmask 588800  }
  0x22   : > { %v8610_v6 = vunpack.c.l.bf16 %v6928_v2  ;;  %v8612_v7 = vunpack.c.h.bf16 %v6928_v2  ;;  %v8614_v8 = vunpack.c.l.bf16 %v6967_v3  ;;  %v8616_v9 = vunpack.c.h.bf16 %v6967_v3  ;;  %v6969_v11 = vld [vmem:[%s8604_s6 + $0x18] sm:$0xff]   ;;  %v6970_v27 = vld [vmem:[%s8604_s6 + $0x20] sm:$0xff]   ;;  %7450 = vmatprep.subr.msk.mxu0 %vm383_vm0, %v284_v4  ;;  %8115 = vmatpush3.msra.mxu1 %v282_v19  ;;  %v6971_v37 = vld [vmem:[%s8604_s6 + $0x28] sm:$0xff]   ;;  %s8538_s11 = smov 120   ;;  %s8539_s12 = smov 32  }
  0x23   : > { %v8621_v12 = vunpack.c.l.bf16 %v6968_v10  ;;  %v8623_v13 = vunpack.c.h.bf16 %v6968_v10  ;;  %v8631_v21 = vunpack.c.l.bf16 %v6969_v11  ;;  %v8633_v22 = vunpack.c.h.bf16 %v6969_v11  ;;  %v6973_v28 = vld [vmem:[%s8604_s6 + $0x38] sm:$0xff]   ;;  %v6974_v38 = vld [vmem:[%s8604_s6 + $0x40] sm:$0xff]   ;;  %7516 = vmatprep.subr.msk.mxu1 %vm383_vm0, %v993_v29  ;;  %v6972_v49 = vld [vmem:[%s8604_s6 + $0x30] sm:$0xff]   ;;  %s8540_s13 = smov 60   ;;  %s8541_s14 = smov 52  }
  0x24   : > { %11976 = vst [vmem:[#allocation6_spill] sm:$0xff] %v8614_v8  ;;  %11977 = vst [vmem:[#allocation7_spill] sm:$0xff] %v8616_v9  ;;  %v309_v15 = vrot.slane %v8610_v6, 1  ;;  %v310_v16 = vrot.slane %v8612_v7, 1  ;;  %v312_v17 = vrot.slane %v8614_v8, 1  ;;  %v314_v18 = vrot.slane %v8616_v9, 1 }
  0x25   : > { %11978 = vst [vmem:[#allocation8_spill] sm:$0xff] %v8621_v12  ;;  %11979 = vst [vmem:[#allocation9_spill] sm:$0xff] %v8623_v13  ;;  %v316_v20 = vrot.slane %v8621_v12, 1  ;;  %v318_v26 = vrot.slane %v8623_v13, 1  ;;  %v320_v31 = vrot.slane %v8631_v21, 1  ;;  %v8656_v32 = vunpack.c.l.bf16 %v6970_v27  ;;  %v1499_v10 = vld [vmem:[#allocation3 + $0x80] sm:$0xff] }
  0x26   : > { %11980 = vst [vmem:[#allocation10_spill] sm:$0xff] %v8631_v21  ;;  %11981 = vst [vmem:[#allocation11_spill] sm:$0xff] %v8633_v22  ;;  %v311_v23 = vsel %vm308_vm1, %v309_v15, %v310_v16  ;;  %v8637_v24 = vsel %vm308_vm1, %v310_v16, %v312_v17  ;;  %v8640_v25 = vsel %vm308_vm1, %v312_v17, %v314_v18  ;;  %v8658_v33 = vunpack.c.l.bf16 %v6973_v28  ;;  %v1498_v17 = vld [vmem:[#allocation3 + $0x78] sm:$0xff]  ;;  %s8542_s15 = smov 80   ;;  %s8543_s16 = smov 72  }
  0x27   : > { %11982 = vst [vmem:[#allocation12_spill] sm:$0xff] %v8640_v25  ;;  %7423 = vmatprep.mubr.msk.f32.mxu0 %vm346_vm2, %v311_v23  ;;  %v8653_v30 = vsel %vm308_vm1, %v314_v18, %v316_v20  ;;  %11984 = vst [vmem:[#allocation14_spill] sm:$0xff] %v8656_v32  ;;  %v8661_v34 = vsel %vm308_vm1, %v316_v20, %v318_v26  ;;  %v322_v35 = vrot.slane %v8633_v22, 1  ;;  %v8664_v36 = vunpack.c.h.bf16 %v6970_v27  ;;  %s8544_s17 = smov 100  }
  0x28   : > { %7424 = vmatmul.mubr.msk.f32.vlgmr.msra.gmra.mxu0 %vm346_vm2, %v8637_v24  ;;  %11983 = vst [vmem:[#allocation13_spill] sm:$0xff] %v8653_v30  ;;  %11985 = vst [vmem:[#allocation15_spill] sm:$0xff] %v8658_v33  ;;  %7477 = vmatprep.mubr.msk.f32.mxu1 %vm346_vm2, %v8658_v33  ;;  %v8675_v40 = vunpack.c.h.bf16 %v6973_v28  ;;  %v8680_v41 = vsel %vm308_vm1, %v318_v26, %v320_v31  ;;  %v324_v42 = vrot.slane %v8656_v32, 1  ;;  %v8683_v43 = vunpack.c.l.bf16 %v6971_v37  ;;  %v8769_v26 = vld [vmem:[#allocation3 + $0xb8] sm:$0x1f] }
  0x29   : > { %7451 = vmatpush3.msk.msra.mxu0 %vm383_vm0, %v284_v4  ;;  %7426 = vmatprep.mubr.msk.f32.mxu0 %vm346_vm2, %v8640_v25  ;;  %11986 = vst [vmem:[#allocation16_spill] sm:$0xff] %v8664_v36  ;;  %v8685_v44 = vunpack.c.l.bf16 %v6974_v38  ;;  %v8688_v46 = vsel %vm308_vm1, %v320_v31, %v322_v35  ;;  %v326_v47 = vrot.slane %v8664_v36, 1  ;;  %v8691_v48 = vunpack.c.h.bf16 %v6971_v37 }
  0x2a   : > { %7452 = vmatprep.subr.mxu0 %v283_v14  ;;  %11987 = vst [vmem:[#allocation17_spill] sm:$0xff] %v8675_v40  ;;  %11988 = vst [vmem:[#allocation18_spill] sm:$0xff] %v8683_v43  ;;  %7478 = vmatmul.mubr.msk.f32.vlgmr.msra.gmra.mxu1 %vm346_vm2, %v8675_v40  ;;  %v994_v51 = vrot.slane %v8610_v6, 3  ;;  %v8704_v52 = vunpack.c.h.bf16 %v6974_v38  ;;  %v995_v53 = vrot.slane %v8612_v7, 3  ;;  %v997_v54 = vrot.slane %v8614_v8, 3 }
  0x2b   : > { %7453 = vmatpush3.msra.mxu0 %v283_v14  ;;  %11989 = vst [vmem:[#allocation19_spill] sm:$0xff] %v8685_v44  ;;  %11990 = vst [vmem:[#allocation20_spill] sm:$0xff] %v8691_v48  ;;  %7480 = vmatprep.mubr.msk.f32.mxu1 %vm346_vm2, %v8685_v44  ;;  %v8711_v55 = vsel %vm308_vm1, %v322_v35, %v324_v42  ;;  %v328_v56 = vrot.slane %v8683_v43, 1  ;;  %v8714_v57 = vunpack.c.l.bf16 %v6972_v49  ;;  %v330_v60 = vrot.slane %v8691_v48, 1 }
  0x2c   : > { %7427 = vmatmul.mubr.msk.f32.gmra.mxu0 %vm346_vm2, %v8653_v30  ;;  %7454 = vmatprep.subr.mxu0 %v282_v19  ;;  %11991 = vst [vmem:[#allocation21_spill] sm:$0xff] %v8704_v52  ;;  %v8717_v59 = vsel %vm308_vm1, %v324_v42, %v326_v47  ;;  %v8720_v61 = vunpack.c.h.bf16 %v6972_v49  ;;  %v996_v62 = vsel %vm383_vm0, %v994_v51, %v995_v53  ;;  %v999_v0 = vrot.slane %v8616_v9, 3 }
  0x2d   : > { %7429 = vmatprep.mubr.msk.f32.mxu0 %vm346_vm2, %v8661_v34  ;;  %7455 = vmatpush3.msra.mxu0 %v282_v19  ;;  %11992 = vst [vmem:[#allocation22_spill] sm:$0xff] %v8714_v57  ;;  %11993 = vst [vmem:[#allocation23_spill] sm:$0xff] %v8717_v59  ;;  %v8727_v63 = vsel %vm383_vm0, %v995_v53, %v997_v54  ;;  %v1001_v1 = vrot.slane %v8621_v12, 3  ;;  %v1003_v2 = vrot.slane %v8623_v13, 3  ;;  %v332_v4 = vrot.slane %v8714_v57, 1 }
  0x2e   : > { %7483 = vmatprep.subr.msk.mxu0 %vm383_vm0, %v8671_v39  ;;  %7517 = vmatpush3.msk.msra.mxu1 %vm383_vm0, %v993_v29  ;;  %11994 = vst [vmem:[#allocation24_spill] sm:$0xff] %v8720_v61  ;;  %v8738_v3 = vsel %vm308_vm1, %v326_v47, %v328_v56  ;;  %v8742_v5 = vsel %vm383_vm0, %v997_v54, %v999_v0  ;;  %v334_v14 = vrot.slane %v8720_v61, 1  ;;  %v1005_v16 = vrot.slane %v8631_v21, 3  ;;  %v8776_v29 = vld [vmem:[%s8604_s6 + $0x48] sm:$0xff]  }
  0x2f   : > { %7518 = vmatprep.subr.mxu1 %v992_v45  ;;  %7481 = vmatmul.mubr.msk.f32.gmra.mxu1 %vm346_vm2, %v8704_v52  ;;  %11995 = vst [vmem:[#allocation25_spill] sm:$0xff] %v8738_v3  ;;  %11996 = vst [vmem:[#allocation26_spill] sm:$0xff] %v8742_v5  ;;  %v8745_v11 = vsel %vm308_vm1, %v328_v56, %v330_v60  ;;  %v8753_v15 = vsel %vm383_vm0, %v999_v0, %v1001_v1  ;;  %v1007_v19 = vrot.slane %v8633_v22, 3  ;;  %vm5805_vm15 = vcmask 490496  }
  0x30   : > { %7430 = vmatmul.mubr.msk.f32.gmra.mxu0 %vm346_vm2, %v8680_v41  ;;  %7519 = vmatpush3.msra.mxu1 %v992_v45  ;;  %11997 = vst [vmem:[#allocation27_spill] sm:$0xff] %v8753_v15  ;;  %v8760_v18 = vsel %vm383_vm0, %v1001_v1, %v1003_v2  ;;  %v8766_v20 = vsel %vm308_vm1, %v330_v60, %v332_v4  ;;  %v336_v23 = vrot.slane %v8658_v33, 1  ;;  %v338_v28 = vrot.slane %v8675_v40, 1 }
  0x31   : > { %7432 = vmatprep.mubr.msk.f32.mxu0 %vm346_vm2, %v8688_v46  ;;  %7520 = vmatprep.subr.mxu1 %v991_v50  ;;  %11998 = vst [vmem:[#allocation28_spill] sm:$0xff] %v8760_v18  ;;  %v8772_v27 = vsel %vm308_vm1, %v332_v4, %v334_v14  ;;  %v8783_v31 = vsel %vm383_vm0, %v1003_v2, %v1005_v16  ;;  %v1009_v35 = vrot.slane %v8656_v32, 3  ;;  %v1011_v38 = vrot.slane %v8664_v36, 3 }
  0x32   : > { %7521 = vmatpush3.msra.mxu1 %v991_v50  ;;  %7522 = vmatprep.mubr.msk.f32.mxu1 %vm346_vm2, %v996_v62  ;;  %11999 = vst [vmem:[#allocation29_spill] sm:$0xff] %v8772_v27  ;;  %12000 = vst [vmem:[#allocation30_spill] sm:$0xff] %v8783_v31  ;;  %v8789_v37 = vsel %vm383_vm0, %v1005_v16, %v1007_v19  ;;  %v8797_v42 = vsel %vm308_vm1, %v334_v14, %v336_v23  ;;  %v340_v45 = vrot.slane %v8685_v44, 1 }
  0x33   : > { %7582 = vmatprep.subr.msk.mxu1 %vm383_vm0, %v1500_v58  ;;  %7523 = vmatmul.mubr.msk.f32.vlgmr.msra.gmra.mxu1 %vm346_vm2, %v8727_v63  ;;  %12001 = vst [vmem:[#allocation31_spill] sm:$0xff] %v8789_v37  ;;  %v8801_v47 = vunpack.c.l.bf16 %v8776_v29  ;;  %v8804_v49 = vsel %vm308_vm1, %v336_v23, %v338_v28  ;;  %v342_v50 = vrot.slane %v8704_v52, 1  ;;  %v8812_v51 = vsel %vm383_vm0, %v1007_v19, %v1009_v35  ;;  %v738_v23 = vld [vmem:[#allocation3 + $0x38] sm:$0xff] }
  0x34   : > { %7433 = vmatmul.mubr.msk.f32.gmra.mxu0 %vm346_vm2, %v8711_v55  ;;  %7525 = vmatprep.mubr.msk.f32.mxu1 %vm346_vm2, %v8742_v5  ;;  %12002 = vst [vmem:[#allocation32_spill] sm:$0xff] %v8804_v49  ;;  %12003 = vst [vmem:[#allocation33_spill] sm:$0xff] %v8812_v51  ;;  %v1013_v53 = vrot.slane %v8683_v43, 3  ;;  %v8818_v54 = vsel %vm383_vm0, %v1009_v35, %v1011_v38  ;;  %v1015_v56 = vrot.slane %v8691_v48, 3  ;;  %v1017_v1 = vrot.slane %v8714_v57, 3 }
  0x35   : > { %7435 = vmatprep.mubr.msk.f32.mxu0 %vm346_vm2, %v8717_v59  ;;  %7583 = vmatpush3.msk.msra.mxu1 %vm383_vm0, %v1500_v58  ;;  %12004 = vst [vmem:[#allocation34_spill] sm:$0xff] %v8818_v54  ;;  %v8824_v58 = vsel %vm308_vm1, %v338_v28, %v340_v45  ;;  %v11814_v60 = vrot.slane %v8801_v47, 1  ;;  %v8828_v62 = vsel %vm308_vm1, %v340_v45, %v342_v50  ;;  %v1019_v4 = vrot.slane %v8720_v61, 3 }
  0x36   : > { %7584 = vmatprep.subr.mxu1 %v1499_v10  ;;  %12005 = vst [vmem:[#allocation35_spill] sm:$0xff] %v8824_v58  ;;  %12006 = vst [vmem:[#allocation36_spill] sm:$0xff] %v8828_v62  ;;  %v8835_v0 = vsel %vm383_vm0, %v1011_v38, %v1013_v53  ;;  %v8841_v2 = vsel %vm383_vm0, %v1013_v53, %v1015_v56  ;;  %v8856_v14 = vsel %vm383_vm0, %v1015_v56, %v1017_v1  ;;  %v8887_v53 = vld [vmem:[#allocation3 + $0x70] sm:$0x1f] }
  0x37   : > { %7585 = vmatpush3.msra.mxu1 %v1499_v10  ;;  %12007 = vst [vmem:[#allocation37_spill] sm:$0xff] %v8835_v0  ;;  %12008 = vst [vmem:[#allocation38_spill] sm:$0xff] %v8841_v2  ;;  %v8849_v10 = vsel %vm308_vm1, %v342_v50, %v11814_v60  ;;  %v1021_v16 = vrot.slane %v8658_v33, 3  ;;  %v1023_v19 = vrot.slane %v8675_v40, 3  ;;  %v1025_v35 = vrot.slane %v8685_v44, 3  ;;  %v737_v50 = vld [vmem:[#allocation3 + $0x30] sm:$0xff] }
  0x38   : > { %7436 = vmatmul.mubr.msk.f32.gmra.mxu0 %vm346_vm2, %v8738_v3  ;;  %7526 = vmatmul.mubr.msk.f32.gmra.mxu1 %vm346_vm2, %v8753_v15  ;;  %12009 = vst [vmem:[#allocation39_spill] sm:$0xff] %v8849_v10  ;;  %12010 = vst [vmem:[#allocation40_spill] sm:$0xff] %v8856_v14  ;;  %v1027_v45 = vrot.slane %v8704_v52, 3  ;;  %v1511_v60 = vrot.slane %v8623_v13, 5 }
  0x39   : > { %7438 = vmatprep.mubr.msk.f32.mxu0 %vm346_vm2, %v8745_v11  ;;  %7586 = vmatprep.subr.mxu1 %v1498_v17  ;;  %v8872_v28 = vsel %vm383_vm0, %v1019_v4, %v1021_v16  ;;  %v8878_v38 = vsel %vm383_vm0, %v1021_v16, %v1023_v19  ;;  %v8892_v56 = vsel %vm383_vm0, %v1023_v19, %v1025_v35  ;;  %v1503_v16 = vrot.slane %v8612_v7, 5 }
  0x3a   : > { %7528 = vmatprep.mubr.msk.f32.mxu1 %vm346_vm2, %v8760_v18  ;;  %7587 = vmatpush3.msra.mxu1 %v1498_v17  ;;  %v8862_v17 = vsel %vm383_vm0, %v1017_v1, %v1019_v4  ;;  %12012 = vst [vmem:[#allocation42_spill] sm:$0xff] %v8872_v28  ;;  %12013 = vst [vmem:[#allocation43_spill] sm:$0xff] %v8878_v38  ;;  %v11813_v1 = vrot.slane %v8801_v47, 3  ;;  %v1502_v4 = vrot.slane %v8610_v6, 5 }
  0x3b   : > { %7648 = vmatprep.subr.msk.mxu1 %vm383_vm0, %v8769_v26  ;;  %12011 = vst [vmem:[#allocation41_spill] sm:$0xff] %v8862_v17  ;;  %12014 = vst [vmem:[#allocation44_spill] sm:$0xff] %v8892_v56 }
  0x3c   : > { %7439 = vmatmul.mubr.msk.f32.gmra.mxu0 %vm346_vm2, %v8766_v20  ;;  %7529 = vmatmul.mubr.msk.f32.gmra.mxu1 %vm346_vm2, %v8783_v31  ;;  %v8913_v19 = vsel %vm383_vm0, %v1027_v45, %v11813_v1  ;;  %v1509_v1 = vrot.slane %v8621_v12, 5 }
  0x3d   : > { %7441 = vmatprep.mubr.msk.f32.mxu0 %vm346_vm2, %v8772_v27  ;;  %7531 = vmatprep.mubr.msk.f32.mxu1 %vm346_vm2, %v8789_v37  ;;  %12016 = vst [vmem:[#allocation46_spill] sm:$0xff] %v8913_v19 }
  0x40   : > { %7442 = vmatmul.mubr.msk.f32.gmra.mxu0 %vm346_vm2, %v8797_v42  ;;  %7532 = vmatmul.mubr.msk.f32.gmra.mxu1 %vm346_vm2, %v8812_v51 }
  0x41   : > { %7444 = vmatprep.mubr.msk.f32.mxu0 %vm346_vm2, %v8804_v49  ;;  %7534 = vmatprep.mubr.msk.f32.mxu1 %vm346_vm2, %v8818_v54 }
  0x44   : > { %7445 = vmatmul.mubr.msk.f32.gmra.mxu0 %vm346_vm2, %v8824_v58  ;;  %7535 = vmatmul.mubr.msk.f32.gmra.mxu1 %vm346_vm2, %v8835_v0 }
  0x45   : > { %7447 = vmatprep.mubr.msk.f32.mxu0 %vm346_vm2, %v8828_v62  ;;  %7537 = vmatprep.mubr.msk.f32.mxu1 %vm346_vm2, %v8841_v2 }
  0x48   : > { %7448 = vmatmul.mubr.msk.f32.gmra.mxu0 %vm346_vm2, %v8849_v10  ;;  %7538 = vmatmul.mubr.msk.f32.gmra.mxu1 %vm346_vm2, %v8856_v14  ;;  %v1245_v14 = vld [vmem:[#allocation3 + $0x68] sm:$0xff] }
  0x49   : > { %7456 = vmatprep.mubr.msk.f32.mxu0 %vm346_vm2, %v8610_v6  ;;  %7540 = vmatprep.mubr.msk.f32.mxu1 %vm346_vm2, %v8862_v17  ;;  %v750_v17 = vrot.slane %v8623_v13, 2 }
  0x4c   : > { %7457 = vmatmul.mubr.msk.f32.vlgmr.msra.gmra.mxu0 %vm346_vm2, %v8612_v7  ;;  %7541 = vmatmul.mubr.msk.f32.gmra.mxu1 %vm346_vm2, %v8872_v28 }
  0x4d   : > { %7484 = vmatpush3.msk.msra.mxu0 %vm383_vm0, %v8671_v39  ;;  %7459 = vmatprep.mubr.msk.f32.mxu0 %vm346_vm2, %v8614_v8  ;;  %v8898_v39 = vsel %vm383_vm0, %v1025_v35, %v1027_v45  ;;  %v1504_v35 = vsel %vm1501_vm3, %v1502_v4, %v1503_v16 }
  0x4e   : > { %7485 = vmatprep.subr.mxu0 %v738_v23  ;;  %7543 = vmatprep.mubr.msk.f32.mxu1 %vm346_vm2, %v8878_v38  ;;  %12015 = vst [vmem:[#allocation45_spill] sm:$0xff] %v8898_v39  ;;  %v1519_v38 = vrot.slane %v8664_v36, 5 }
  0x4f   : > { %7486 = vmatpush3.msra.mxu0 %v738_v23  ;;  %v1505_v23 = vrot.slane %v8614_v8, 5 }
  0x50   : > { %7460 = vmatmul.mubr.msk.f32.gmra.mxu0 %vm346_vm2, %v8616_v9  ;;  %7487 = vmatprep.subr.mxu0 %v737_v50 }
  0x51   : > { %7462 = vmatprep.mubr.msk.f32.mxu0 %vm346_vm2, %v8621_v12  ;;  %7488 = vmatpush3.msra.mxu0 %v737_v50  ;;  %v1507_v50 = vrot.slane %v8616_v9, 5  ;;  %v8926_v45 = vsel %vm1501_vm3, %v1503_v16, %v1505_v23 }
  0x52   : > { %7549 = vmatprep.subr.msk.mxu0 %vm383_vm0, %v8887_v53  ;;  %7544 = vmatmul.mubr.msk.f32.gmra.mxu1 %vm346_vm2, %v8892_v56  ;;  %12017 = vst [vmem:[#allocation47_spill] sm:$0xff] %v8926_v45  ;;  %v1517_v56 = vrot.slane %v8656_v32, 5 }
  0x53   : > { %7546 = vmatprep.mubr.msk.f32.mxu1 %vm346_vm2, %v8898_v39  ;;  %v8932_v4 = vsel %vm1501_vm3, %v1505_v23, %v1507_v50  ;;  %v2007_v39 = vld [vmem:[#allocation3 + $0xb0] sm:$0xff]  ;;  %v8942_v16 = vsel %vm1501_vm3, %v1507_v50, %v1509_v1  ;;  %v2006_v23 = vld [vmem:[#allocation3 + $0xa8] sm:$0xff] }
  0x54   : > { %7463 = vmatmul.mubr.msk.f32.gmra.mxu0 %vm346_vm2, %v8623_v13  ;;  %12018 = vst [vmem:[#allocation48_spill] sm:$0xff] %v8932_v4  ;;  %12019 = vst [vmem:[#allocation49_spill] sm:$0xff] %v8942_v16  ;;  %v8955_v50 = vld [vmem:[#allocation3 + $0xe8] sm:$0x1f]  ;;  %v8991_v28 = vsel %vm1501_vm3, %v1517_v56, %v1519_v38 }
  0x55   : > { %7465 = vmatprep.mubr.msk.f32.mxu0 %vm346_vm2, %v8631_v21  ;;  %12024 = vst [vmem:[#allocation54_spill] sm:$0xff] %v8991_v28 }
  0x56   : > { %7547 = vmatmul.mubr.msk.f32.gmra.mxu1 %vm346_vm2, %v8913_v19  ;;  %v8950_v19 = vsel %vm1501_vm3, %v1509_v1, %v1511_v60 }
  0x57   : > { %7588 = vmatprep.mubr.msk.f32.mxu1 %vm346_vm2, %v1504_v35  ;;  %v1513_v35 = vrot.slane %v8631_v21, 5  ;;  %12020 = vst [vmem:[#allocation50_spill] sm:$0xff] %v8950_v19 }
  0x58   : > { %7466 = vmatmul.mubr.msk.f32.gmra.mxu0 %vm346_vm2, %v8633_v22 }
  0x59   : > { %7468 = vmatprep.mubr.msk.f32.mxu0 %vm346_vm2, %v8656_v32  ;;  %v8964_v1 = vsel %vm1501_vm3, %v1511_v60, %v1513_v35  ;;  %v744_v60 = vrot.slane %v8614_v8, 2 }
  0x5a   : > { %7589 = vmatmul.mubr.msk.f32.vlgmr.msra.gmra.mxu1 %vm346_vm2, %v8926_v45  ;;  %v1515_v45 = vrot.slane %v8633_v22, 5  ;;  %12021 = vst [vmem:[#allocation51_spill] sm:$0xff] %v8964_v1 }
  0x5b   : > { %7591 = vmatprep.mubr.msk.f32.mxu1 %vm346_vm2, %v8932_v4  ;;  %7649 = vmatpush3.msk.msra.mxu1 %vm383_vm0, %v8769_v26  ;;  %v741_v4 = vrot.slane %v8610_v6, 2  ;;  %v742_v26 = vrot.slane %v8612_v7, 2 }
  0x5c   : > { %7469 = vmatmul.mubr.msk.f32.gmra.mxu0 %vm346_vm2, %v8664_v36  ;;  %7650 = vmatprep.subr.mxu1 %v2007_v39 }
  0x5d   : > { %7471 = vmatprep.mubr.msk.f32.mxu0 %vm346_vm2, %v8683_v43  ;;  %7651 = vmatpush3.msra.mxu1 %v2007_v39  ;;  %v8970_v39 = vsel %vm1501_vm3, %v1513_v35, %v1515_v45  ;;  %v8985_v35 = vsel %vm1501_vm3, %v1515_v45, %v1517_v56 }
  0x5e   : > { %7592 = vmatmul.mubr.msk.f32.gmra.mxu1 %vm346_vm2, %v8942_v16  ;;  %7652 = vmatprep.subr.mxu1 %v2006_v23  ;;  %12022 = vst [vmem:[#allocation52_spill] sm:$0xff] %v8970_v39  ;;  %12023 = vst [vmem:[#allocation53_spill] sm:$0xff] %v8985_v35  ;;  %v1521_v16 = vrot.slane %v8683_v43, 5 }
  0x5f   : > { %7594 = vmatprep.mubr.msk.f32.mxu1 %vm346_vm2, %v8950_v19  ;;  %7653 = vmatpush3.msra.mxu1 %v2006_v23  ;;  %v743_v19 = vsel %vm740_vm4, %v741_v4, %v742_v26  ;;  %v746_v23 = vrot.slane %v8616_v9, 2  ;;  %v1523_v4 = vrot.slane %v8691_v48, 5 }
  0x60   : > { %7472 = vmatmul.mubr.msk.f32.gmra.mxu0 %vm346_vm2, %v8691_v48  ;;  %7714 = vmatprep.subr.msk.mxu1 %vm383_vm0, %v8955_v50  ;;  %v9008_v56 = vsel %vm1501_vm3, %v1519_v38, %v1521_v16  ;;  %v752_v38 = vrot.slane %v8631_v21, 2 }
  0x61   : > { %7474 = vmatprep.mubr.msk.f32.mxu0 %vm346_vm2, %v8714_v57  ;;  %v9000_v45 = vsel %vm740_vm4, %v744_v60, %v746_v23  ;;  %12027 = vst [vmem:[#allocation57_spill] sm:$0xff] %v9008_v56 }
  0x62   : > { %7595 = vmatmul.mubr.msk.f32.gmra.mxu1 %vm346_vm2, %v8964_v1  ;;  %v8996_v1 = vsel %vm740_vm4, %v742_v26, %v744_v60  ;;  %12026 = vst [vmem:[#allocation56_spill] sm:$0xff] %v9000_v45  ;;  %v9014_v26 = vsel %vm1501_vm3, %v1521_v16, %v1523_v4  ;;  %v1527_v60 = vrot.slane %v8720_v61, 5  ;;  %v754_v16 = vrot.slane %v8633_v22, 2 }
  0x63   : > { %7597 = vmatprep.mubr.msk.f32.mxu1 %vm346_vm2, %v8970_v39  ;;  %12025 = vst [vmem:[#allocation55_spill] sm:$0xff] %v8996_v1  ;;  %v748_v39 = vrot.slane %v8621_v12, 2  ;;  %12028 = vst [vmem:[#allocation58_spill] sm:$0xff] %v9014_v26 }
  0x64   : > { %7475 = vmatmul.mubr.msk.f32.gmra.mxu0 %vm346_vm2, %v8720_v61 }
  0x65   : > { %7489 = vmatprep.mubr.msk.f32.mxu0 %vm346_vm2, %v743_v19  ;;  %v1525_v19 = vrot.slane %v8714_v57, 5  ;;  %v9026_v2 = vsel %vm740_vm4, %v748_v39, %v750_v17 }
  0x66   : > { %7598 = vmatmul.mubr.msk.f32.gmra.mxu1 %vm346_vm2, %v8985_v35  ;;  %v1244_v35 = vld [vmem:[#allocation3 + $0x60] sm:$0xff]  ;;  %12030 = vst [vmem:[#allocation60_spill] sm:$0xff] %v9026_v2 }
  0x67   : > { %7600 = vmatprep.mubr.msk.f32.mxu1 %vm346_vm2, %v8991_v28  ;;  %v9022_v28 = vsel %vm740_vm4, %v746_v23, %v748_v39  ;;  %v9036_v23 = vsel %vm1501_vm3, %v1523_v4, %v1525_v19  ;;  %v9042_v39 = vsel %vm1501_vm3, %v1525_v19, %v1527_v60  ;;  %v756_v4 = vrot.slane %v8656_v32, 2 }
  0x68   : > { %7490 = vmatmul.mubr.msk.f32.vlgmr.msra.gmra.mxu0 %vm346_vm2, %v8996_v1  ;;  %12029 = vst [vmem:[#allocation59_spill] sm:$0xff] %v9022_v28  ;;  %12031 = vst [vmem:[#allocation61_spill] sm:$0xff] %v9036_v23  ;;  %v1533_v19 = vrot.slane %v8685_v44, 5  ;;  %v774_v1 = vrot.slane %v8704_v52, 2 }
  0x69   : > { %7550 = vmatpush3.msk.msra.mxu0 %vm383_vm0, %v8887_v53  ;;  %7492 = vmatprep.mubr.msk.f32.mxu0 %vm346_vm2, %v9000_v45  ;;  %v9031_v53 = vld [vmem:[#allocation3 + $0xa0] sm:$0x1f]  ;;  %v1529_v45 = vrot.slane %v8658_v33, 5  ;;  %12032 = vst [vmem:[#allocation62_spill] sm:$0xff] %v9042_v39 }
  0x6a   : > { %7551 = vmatprep.subr.mxu0 %v1245_v14  ;;  %7601 = vmatmul.mubr.msk.f32.gmra.mxu1 %vm346_vm2, %v9008_v56  ;;  %v1531_v56 = vrot.slane %v8675_v40, 5 }
  0x6b   : > { %7552 = vmatpush3.msra.mxu0 %v1245_v14  ;;  %7603 = vmatprep.mubr.msk.f32.mxu1 %vm346_vm2, %v9014_v26  ;;  %v9048_v14 = vsel %vm740_vm4, %v750_v17, %v752_v38  ;;  %v9052_v26 = vsel %vm740_vm4, %v752_v38, %v754_v16  ;;  %v9062_v17 = vsel %vm1501_vm3, %v1527_v60, %v1529_v45  ;;  %v1535_v38 = vrot.slane %v8704_v52, 5 }
  0x6c   : > { %7493 = vmatmul.mubr.msk.f32.gmra.mxu0 %vm346_vm2, %v9022_v28  ;;  %7553 = vmatprep.subr.mxu0 %v1244_v35  ;;  %12033 = vst [vmem:[#allocation63_spill] sm:$0xff] %v9048_v14  ;;  %12034 = vst [vmem:[#allocation64_spill] sm:$0xff] %v9052_v26  ;;  %v758_v28 = vrot.slane %v8664_v36, 2 }
  0x6d   : > { %7495 = vmatprep.mubr.msk.f32.mxu0 %vm346_vm2, %v9026_v2  ;;  %7554 = vmatpush3.msra.mxu0 %v1244_v35  ;;  %12035 = vst [vmem:[#allocation65_spill] sm:$0xff] %v9062_v17  ;;  %v9068_v35 = vsel %vm1501_vm3, %v1529_v45, %v1531_v56  ;;  %v9074_v2 = vsel %vm740_vm4, %v754_v16, %v756_v4 }
  0x6e   : > { %7615 = vmatprep.subr.msk.mxu0 %vm383_vm0, %v9031_v53  ;;  %7604 = vmatmul.mubr.msk.f32.gmra.mxu1 %vm346_vm2, %v9036_v23  ;;  %12036 = vst [vmem:[#allocation66_spill] sm:$0xff] %v9068_v35  ;;  %12037 = vst [vmem:[#allocation67_spill] sm:$0xff] %v9074_v2  ;;  %v9078_v60 = vsel %vm740_vm4, %v756_v4, %v758_v28  ;;  %v762_v23 = vrot.slane %v8691_v48, 2  ;;  %v9086_v45 = vsel %vm1501_vm3, %v1531_v56, %v1533_v19 }
  0x6f   : > { %7606 = vmatprep.mubr.msk.f32.mxu1 %vm346_vm2, %v9042_v39  ;;  %v760_v39 = vrot.slane %v8683_v43, 2  ;;  %12038 = vst [vmem:[#allocation68_spill] sm:$0xff] %v9078_v60  ;;  %12039 = vst [vmem:[#allocation69_spill] sm:$0xff] %v9086_v45  ;;  %v9092_v16 = vsel %vm1501_vm3, %v1533_v19, %v1535_v38  ;;  %v2010_v4 = vrot.slane %v8610_v6, 7  ;;  %v764_v56 = vrot.slane %v8714_v57, 2 }
  0x70   : > { %7496 = vmatmul.mubr.msk.f32.gmra.mxu0 %vm346_vm2, %v9048_v14  ;;  %12040 = vst [vmem:[#allocation70_spill] sm:$0xff] %v9092_v16  ;;  %v2011_v14 = vrot.slane %v8612_v7, 7  ;;  %v12043_v19 = vrot.slane %v8801_v47, 5 }
  0x71   : > { %7498 = vmatprep.mubr.msk.f32.mxu0 %vm346_vm2, %v9052_v26  ;;  %v9103_v26 = vsel %vm740_vm4, %v760_v39, %v762_v23 }
  0x72   : > { %7607 = vmatmul.mubr.msk.f32.gmra.mxu1 %vm346_vm2, %v9062_v17  ;;  %12042 = vst [vmem:[#allocation72_spill] sm:$0xff] %v9103_v26  ;;  %v2015_v17 = vrot.slane %v8616_v9, 7 }
  0x73   : > { %7609 = vmatprep.mubr.msk.f32.mxu1 %vm346_vm2, %v9068_v35  ;;  %v9099_v35 = vsel %vm740_vm4, %v758_v28, %v760_v39  ;;  %v2013_v28 = vrot.slane %v8614_v8, 7  ;;  %v2012_v39 = vsel %vm2009_vm5, %v2010_v4, %v2011_v14 }
  0x74   : > { %7499 = vmatmul.mubr.msk.f32.gmra.mxu0 %vm346_vm2, %v9074_v2  ;;  %12041 = vst [vmem:[#allocation71_spill] sm:$0xff] %v9099_v35  ;;  %v766_v2 = vrot.slane %v8720_v61, 2 }
  0x75   : > { %7501 = vmatprep.mubr.msk.f32.mxu0 %vm346_vm2, %v9078_v60  ;;  %v9113_v60 = vsel %vm1501_vm3, %v1535_v38, %v12043_v19  ;;  %v770_v19 = vrot.slane %v8675_v40, 2  ;;  %v9134_v4 = vsel %vm2009_vm5, %v2011_v14, %v2013_v28  ;;  %v2443_v14 = vld [vmem:[#allocation3 + $0xe0] sm:$0xff] }
  0x76   : > { %7610 = vmatmul.mubr.msk.f32.gmra.mxu1 %vm346_vm2, %v9086_v45  ;;  %12044 = vst [vmem:[#allocation73_spill] sm:$0xff] %v9113_v60  ;;  %v9123_v45 = vsel %vm740_vm4, %v762_v23, %v764_v56  ;;  %v9127_v38 = vsel %vm740_vm4, %v764_v56, %v766_v2  ;;  %12047 = vst [vmem:[#allocation76_spill] sm:$0xff] %v9134_v4  ;;  %v9140_v23 = vsel %vm2009_vm5, %v2013_v28, %v2015_v17 }
  0x77   : > { %7612 = vmatprep.mubr.msk.f32.mxu1 %vm346_vm2, %v9092_v16  ;;  %12045 = vst [vmem:[#allocation74_spill] sm:$0xff] %v9123_v45  ;;  %v768_v16 = vrot.slane %v8658_v33, 2  ;;  %12046 = vst [vmem:[#allocation75_spill] sm:$0xff] %v9127_v38  ;;  %v2019_v56 = vrot.slane %v8623_v13, 7 }
  0x78   : > { %7502 = vmatmul.mubr.msk.f32.gmra.mxu0 %vm346_vm2, %v9099_v35  ;;  %12048 = vst [vmem:[#allocation77_spill] sm:$0xff] %v9140_v23 }
  0x79   : > { %7504 = vmatprep.mubr.msk.f32.mxu0 %vm346_vm2, %v9103_v26  ;;  %v2017_v26 = vrot.slane %v8621_v12, 7  ;;  %v9150_v35 = vsel %vm740_vm4, %v768_v16, %v770_v19 }
  0x7a   : > { %7613 = vmatmul.mubr.msk.f32.gmra.mxu1 %vm346_vm2, %v9113_v60  ;;  %v9146_v60 = vsel %vm740_vm4, %v766_v2, %v768_v16  ;;  %12050 = vst [vmem:[#allocation79_spill] sm:$0xff] %v9150_v35  ;;  %v2021_v2 = vrot.slane %v8631_v21, 7 }
  0x7b   : > { %7654 = vmatprep.mubr.msk.f32.mxu1 %vm346_vm2, %v2012_v39  ;;  %12049 = vst [vmem:[#allocation78_spill] sm:$0xff] %v9146_v60  ;;  %v772_v39 = vrot.slane %v8685_v44, 2  ;;  %v9158_v28 = vsel %vm2009_vm5, %v2015_v17, %v2017_v26  ;;  %v9166_v16 = vsel %vm2009_vm5, %v2017_v26, %v2019_v56  ;;  %v1248_v26 = vrot.slane %v8610_v6, 4 }
  0x7c   : > { %7505 = vmatmul.mubr.msk.f32.gmra.mxu0 %vm346_vm2, %v9123_v45  ;;  %12051 = vst [vmem:[#allocation80_spill] sm:$0xff] %v9158_v28  ;;  %12052 = vst [vmem:[#allocation81_spill] sm:$0xff] %v9166_v16 }
  0x7d   : > { %7507 = vmatprep.mubr.msk.f32.mxu0 %vm346_vm2, %v9127_v38  ;;  %v2442_v38 = vld [vmem:[#allocation3 + $0xd8] sm:$0xff]  ;;  %v9172_v17 = vsel %vm740_vm4, %v770_v19, %v772_v39  ;;  %v9178_v45 = vsel %vm740_vm4, %v772_v39, %v774_v1  ;;  %v9187_v19 = vsel %vm2009_vm5, %v2019_v56, %v2021_v2  ;;  %v12057_v56 = vrot.slane %v8801_v47, 2 }
  0x7e   : > { %7655 = vmatmul.mubr.msk.f32.vlgmr.msra.gmra.mxu1 %vm346_vm2, %v9134_v4  ;;  %v2023_v4 = vrot.slane %v8633_v22, 7  ;;  %12053 = vst [vmem:[#allocation82_spill] sm:$0xff] %v9172_v17  ;;  %12054 = vst [vmem:[#allocation83_spill] sm:$0xff] %v9178_v45 }
  0x7f   : > { %7657 = vmatprep.mubr.msk.f32.mxu1 %vm346_vm2, %v9140_v23  ;;  %7715 = vmatpush3.msk.msra.mxu1 %vm383_vm0, %v8955_v50  ;;  %v9175_v50 = vld [vmem:[#allocation3 + $0x118] sm:$0x1f]  ;;  %12055 = vst [vmem:[#allocation84_spill] sm:$0xff] %v9187_v19  ;;  %v2027_v23 = vrot.slane %v8664_v36, 7 }
  0x80   : > { %7508 = vmatmul.mubr.msk.f32.gmra.mxu0 %vm346_vm2, %v9146_v60  ;;  %7716 = vmatprep.subr.mxu1 %v2443_v14  ;;  %v1249_v60 = vrot.slane %v8612_v7, 4  ;;  %v9193_v39 = vsel %vm2009_vm5, %v2021_v2, %v2023_v4  ;;  %v1253_v2 = vrot.slane %v8616_v9, 4 }
  0x81   : > { %7510 = vmatprep.mubr.msk.f32.mxu0 %vm346_vm2, %v9150_v35  ;;  %7717 = vmatpush3.msra.mxu1 %v2443_v14  ;;  %v2025_v14 = vrot.slane %v8656_v32, 7  ;;  %12056 = vst [vmem:[#allocation85_spill] sm:$0xff] %v9193_v39 }
  0x82   : > { %7658 = vmatmul.mubr.msk.f32.gmra.mxu1 %vm346_vm2, %v9158_v28  ;;  %7718 = vmatprep.subr.mxu1 %v2442_v38 }
  0x83   : > { %7660 = vmatprep.mubr.msk.f32.mxu1 %vm346_vm2, %v9166_v16  ;;  %7719 = vmatpush3.msra.mxu1 %v2442_v38  ;;  %v9203_v16 = vsel %vm740_vm4, %v774_v1, %v12057_v56  ;;  %v1251_v38 = vrot.slane %v8614_v8, 4  ;;  %v9213_v35 = vsel %vm2009_vm5, %v2023_v4, %v2025_v14  ;;  %v9219_v1 = vsel %vm2009_vm5, %v2025_v14, %v2027_v23 }
  0x84   : > { %7511 = vmatmul.mubr.msk.f32.gmra.mxu0 %vm346_vm2, %v9172_v17  ;;  %7780 = vmatprep.subr.msk.mxu1 %vm383_vm0, %v9175_v50  ;;  %12058 = vst [vmem:[#allocation86_spill] sm:$0xff] %v9203_v16  ;;  %v1250_v17 = vsel %vm1247_vm6, %v1248_v26, %v1249_v60  ;;  %12059 = vst [vmem:[#allocation87_spill] sm:$0xff] %v9213_v35  ;;  %v2031_v26 = vrot.slane %v8691_v48, 7 }
  0x85   : > { %7513 = vmatprep.mubr.msk.f32.mxu0 %vm346_vm2, %v9178_v45  ;;  %v2029_v45 = vrot.slane %v8683_v43, 7  ;;  %12060 = vst [vmem:[#allocation88_spill] sm:$0xff] %v9219_v1  ;;  %v9224_v56 = vsel %vm1247_vm6, %v1249_v60, %v1251_v38  ;;  %v9228_v4 = vsel %vm1247_vm6, %v1251_v38, %v1253_v2  ;;  %v2033_v60 = vrot.slane %v8714_v57, 7 }
  0x86   : > { %7661 = vmatmul.mubr.msk.f32.gmra.mxu1 %vm346_vm2, %v9187_v19  ;;  %12061 = vst [vmem:[#allocation89_spill] sm:$0xff] %v9228_v4  ;;  %v1257_v19 = vrot.slane %v8623_v13, 4  ;;  %v2035_v38 = vrot.slane %v8720_v61, 7 }
  0x87   : > { %7663 = vmatprep.mubr.msk.f32.mxu1 %vm346_vm2, %v9193_v39  ;;  %v1255_v39 = vrot.slane %v8621_v12, 4  ;;  %v9236_v14 = vsel %vm2009_vm5, %v2027_v23, %v2029_v45  ;;  %v1259_v23 = vrot.slane %v8631_v21, 4 }
  0x88   : > { %7514 = vmatmul.mubr.msk.f32.gmra.mxu0 %vm346_vm2, %v9203_v16  ;;  %v1753_v16 = vld [vmem:[#allocation3 + $0x98] sm:$0xff]  ;;  %12062 = vst [vmem:[#allocation90_spill] sm:$0xff] %v9236_v14 }
  0x89   : > { %7555 = vmatprep.mubr.msk.f32.mxu0 %vm346_vm2, %v1250_v17  ;;  %v9242_v17 = vsel %vm2009_vm5, %v2029_v45, %v2031_v26  ;;  %v9254_v28 = vsel %vm1247_vm6, %v1255_v39, %v1257_v19  ;;  %v1261_v45 = vrot.slane %v8633_v22, 4 }
  0x8a   : > { %7664 = vmatmul.mubr.msk.f32.gmra.mxu1 %vm346_vm2, %v9213_v35  ;;  %12063 = vst [vmem:[#allocation91_spill] sm:$0xff] %v9242_v17  ;;  %v1752_v35 = vld [vmem:[#allocation3 + $0x90] sm:$0xff]  ;;  %12065 = vst [vmem:[#allocation93_spill] sm:$0xff] %v9254_v28 }
  0x8b   : > { %7666 = vmatprep.mubr.msk.f32.mxu1 %vm346_vm2, %v9219_v1  ;;  %v9250_v1 = vsel %vm1247_vm6, %v1253_v2, %v1255_v39  ;;  %v9264_v2 = vsel %vm2009_vm5, %v2031_v26, %v2033_v60  ;;  %v9270_v39 = vsel %vm2009_vm5, %v2033_v60, %v2035_v38  ;;  %v1263_v26 = vrot.slane %v8656_v32, 4 }
  0x8c   : > { %7556 = vmatmul.mubr.msk.f32.vlgmr.msra.gmra.mxu0 %vm346_vm2, %v9224_v56  ;;  %12064 = vst [vmem:[#allocation92_spill] sm:$0xff] %v9250_v1  ;;  %12066 = vst [vmem:[#allocation94_spill] sm:$0xff] %v9264_v2  ;;  %v2041_v60 = vrot.slane %v8685_v44, 7 }
  0x8d   : > { %7616 = vmatpush3.msk.msra.mxu0 %vm383_vm0, %v9031_v53  ;;  %7558 = vmatprep.mubr.msk.f32.mxu0 %vm346_vm2, %v9228_v4  ;;  %v9259_v53 = vld [vmem:[#allocation3 + $0xd0] sm:$0x1f]  ;;  %v2037_v4 = vrot.slane %v8658_v33, 7  ;;  %12067 = vst [vmem:[#allocation95_spill] sm:$0xff] %v9270_v39 }
  0x8e   : > { %7617 = vmatprep.subr.mxu0 %v1753_v16  ;;  %7667 = vmatmul.mubr.msk.f32.gmra.mxu1 %vm346_vm2, %v9236_v14  ;;  %v2039_v14 = vrot.slane %v8675_v40, 7 }
  0x8f   : > { %7618 = vmatpush3.msra.mxu0 %v1753_v16  ;;  %7669 = vmatprep.mubr.msk.f32.mxu1 %vm346_vm2, %v9242_v17  ;;  %v9276_v16 = vsel %vm1247_vm6, %v1257_v19, %v1259_v23  ;;  %v9280_v17 = vsel %vm1247_vm6, %v1259_v23, %v1261_v45  ;;  %v9290_v19 = vsel %vm2009_vm5, %v2035_v38, %v2037_v4  ;;  %v2043_v23 = vrot.slane %v8704_v52, 7 }
  0x90   : > { %7559 = vmatmul.mubr.msk.f32.gmra.mxu0 %vm346_vm2, %v9250_v1  ;;  %7619 = vmatprep.subr.mxu0 %v1752_v35  ;;  %12068 = vst [vmem:[#allocation96_spill] sm:$0xff] %v9276_v16  ;;  %12069 = vst [vmem:[#allocation97_spill] sm:$0xff] %v9280_v17  ;;  %v1265_v1 = vrot.slane %v8664_v36, 4 }
  0x91   : > { %7561 = vmatprep.mubr.msk.f32.mxu0 %vm346_vm2, %v9254_v28  ;;  %7620 = vmatpush3.msra.mxu0 %v1752_v35  ;;  %12070 = vst [vmem:[#allocation98_spill] sm:$0xff] %v9290_v19  ;;  %v9296_v35 = vsel %vm2009_vm5, %v2037_v4, %v2039_v14  ;;  %v9302_v28 = vsel %vm1247_vm6, %v1261_v45, %v1263_v26 }
  0x92   : > { %7681 = vmatprep.subr.msk.mxu0 %vm383_vm0, %v9259_v53  ;;  %7670 = vmatmul.mubr.msk.f32.gmra.mxu1 %vm346_vm2, %v9264_v2  ;;  %12071 = vst [vmem:[#allocation99_spill] sm:$0xff] %v9296_v35  ;;  %12072 = vst [vmem:[#allocation100_spill] sm:$0xff] %v9302_v28  ;;  %v9306_v38 = vsel %vm1247_vm6, %v1263_v26, %v1265_v1  ;;  %v1269_v2 = vrot.slane %v8691_v48, 4  ;;  %v9314_v4 = vsel %vm2009_vm5, %v2039_v14, %v2041_v60 }
  0x93   : > { %7672 = vmatprep.mubr.msk.f32.mxu1 %vm346_vm2, %v9270_v39  ;;  %v1267_v39 = vrot.slane %v8683_v43, 4  ;;  %12073 = vst [vmem:[#allocation101_spill] sm:$0xff] %v9306_v38  ;;  %v9320_v45 = vsel %vm2009_vm5, %v2041_v60, %v2043_v23  ;;  %v1273_v14 = vrot.slane %v8720_v61, 4 }
  0x94   : > { %7562 = vmatmul.mubr.msk.f32.gmra.mxu0 %vm346_vm2, %v9276_v16  ;;  %12074 = vst [vmem:[#allocation102_spill] sm:$0xff] %v9320_v45 }
  0x95   : > { %7564 = vmatprep.mubr.msk.f32.mxu0 %vm346_vm2, %v9280_v17  ;;  %v11906_v17 = vrot.slane %v8801_v47, 7  ;;  %v9325_v26 = vsel %vm1247_vm6, %v1265_v1, %v1267_v39 }
  0x96   : > { %7673 = vmatmul.mubr.msk.f32.gmra.mxu1 %vm346_vm2, %v9290_v19  ;;  %12075 = vst [vmem:[#allocation103_spill] sm:$0xff] %v9325_v26  ;;  %v1271_v19 = vrot.slane %v8714_v57, 4 }
  0x97   : > { %7675 = vmatprep.mubr.msk.f32.mxu1 %vm346_vm2, %v9296_v35  ;;  %v9329_v35 = vsel %vm1247_vm6, %v1267_v39, %v1269_v2  ;;  %v9339_v60 = vsel %vm2009_vm5, %v2043_v23, %v11906_v17  ;;  %v1275_v39 = vrot.slane %v8658_v33, 4  ;;  %v2812_v23 = vld [vmem:[#allocation3 + $0x110] sm:$0xff] }
  0x98   : > { %7565 = vmatmul.mubr.msk.f32.gmra.mxu0 %vm346_vm2, %v9302_v28  ;;  %12076 = vst [vmem:[#allocation104_spill] sm:$0xff] %v9329_v35  ;;  %v9346_v1 = vsel %vm1247_vm6, %v1269_v2, %v1271_v19 }
  0x99   : > { %7567 = vmatprep.mubr.msk.f32.mxu0 %vm346_vm2, %v9306_v38  ;;  %v9350_v38 = vsel %vm1247_vm6, %v1271_v19, %v1273_v14  ;;  %v9362_v2 = vsel %vm1247_vm6, %v1273_v14, %v1275_v39  ;;  %v1279_v19 = vrot.slane %v8685_v44, 4 }
  0x9a   : > { %7676 = vmatmul.mubr.msk.f32.gmra.mxu1 %vm346_vm2, %v9314_v4  ;;  %12077 = vst [vmem:[#allocation105_spill] sm:$0xff] %v9350_v38 }
  0x9b   : > { %7678 = vmatprep.mubr.msk.f32.mxu1 %vm346_vm2, %v9320_v45  ;;  %v1277_v45 = vrot.slane %v8675_v40, 4 }
  0x9c   : > { %7568 = vmatmul.mubr.msk.f32.gmra.mxu0 %vm346_vm2, %v9325_v26 }
  0x9d   : > { %7570 = vmatprep.mubr.msk.f32.mxu0 %vm346_vm2, %v9329_v35  ;;  %v9366_v17 = vsel %vm1247_vm6, %v1275_v39, %v1277_v45  ;;  %v1281_v35 = vrot.slane %v8704_v52, 4  ;;  %v9380_v14 = vsel %vm1247_vm6, %v1277_v45, %v1279_v19  ;;  %v11913_v39 = vrot.slane %v8801_v47, 4 }
  0x9e   : > { %7679 = vmatmul.mubr.msk.f32.gmra.mxu1 %vm346_vm2, %v9339_v60  ;;  %12078 = vst [vmem:[#allocation106_spill] sm:$0xff] %v9366_v17  ;;  %12079 = vst [vmem:[#allocation107_spill] sm:$0xff] %v9380_v14  ;;  %v1759_v45 = vrot.slane %v8614_v8, 6 }
  0x9f   : > { %7720 = vmatprep.mubr.msk.f32.mxu1 %vm346_vm2, %v8637_v24  ;;  %v2811_v24 = vld [vmem:[#allocation3 + $0x108] sm:$0xff] }
  0xa0   : > { %7571 = vmatmul.mubr.msk.f32.gmra.mxu0 %vm346_vm2, %v9346_v1 }
  0xa1   : > { %7573 = vmatprep.mubr.msk.f32.mxu0 %vm346_vm2, %v9350_v38  ;;  %v9383_v38 = vld [vmem:[#allocation3 + $0x148] sm:$0x1f] }
  0xa2   : > { %7721 = vmatmul.mubr.msk.f32.vlgmr.msra.gmra.mxu1 %vm346_vm2, %v8640_v25  ;;  %v1757_v25 = vrot.slane %v8612_v7, 6 }
  0xa3   : > { %7723 = vmatprep.mubr.msk.f32.mxu1 %vm346_vm2, %v8653_v30  ;;  %7781 = vmatpush3.msk.msra.mxu1 %vm383_vm0, %v9175_v50  ;;  %v9386_v30 = vsel %vm1247_vm6, %v1279_v19, %v1281_v35  ;;  %v1756_v50 = vrot.slane %v8610_v6, 6  ;;  %v9403_v6 = vsel %vm1247_vm6, %v1281_v35, %v11913_v39  ;;  %v1765_v39 = vrot.slane %v8623_v13, 6 }
  0xa4   : > { %7574 = vmatmul.mubr.msk.f32.gmra.mxu0 %vm346_vm2, %v9362_v2  ;;  %7782 = vmatprep.subr.mxu1 %v2812_v23  ;;  %12080 = vst [vmem:[#allocation108_spill] sm:$0xff] %v9386_v30  ;;  %12081 = vst [vmem:[#allocation109_spill] sm:$0xff] %v9403_v6  ;;  %v9416_v35 = vsel %vm1755_vm7, %v1757_v25, %v1759_v45 }
  0xa5   : > { %7576 = vmatprep.mubr.msk.f32.mxu0 %vm346_vm2, %v9366_v17  ;;  %7783 = vmatpush3.msra.mxu1 %v2812_v23  ;;  %v1758_v19 = vsel %vm1755_vm7, %v1756_v50, %v1757_v25  ;;  %v1761_v23 = vrot.slane %v8616_v9, 6 }
  0xa6   : > { %7724 = vmatmul.mubr.msk.f32.gmra.mxu1 %vm346_vm2, %v8661_v34  ;;  %7784 = vmatprep.subr.mxu1 %v2811_v24 }
  0xa7   : > { %7726 = vmatprep.mubr.msk.f32.mxu1 %vm346_vm2, %v8680_v41  ;;  %7785 = vmatpush3.msra.mxu1 %v2811_v24  ;;  %v1763_v24 = vrot.slane %v8621_v12, 6  ;;  %v9420_v50 = vsel %vm1755_vm7, %v1759_v45, %v1761_v23  ;;  %v1767_v45 = vrot.slane %v8631_v21, 6 }
  0xa8   : > { %7577 = vmatmul.mubr.msk.f32.gmra.mxu0 %vm346_vm2, %v9380_v14  ;;  %7846 = vmatprep.subr.msk.mxu1 %vm383_vm0, %v9383_v38  ;;  %12082 = vst [vmem:[#allocation110_spill] sm:$0xff] %v9420_v50 }
  0xa9   : > { %7579 = vmatprep.mubr.msk.f32.mxu0 %vm346_vm2, %v9386_v30  ;;  %v2261_v30 = vld [vmem:[#allocation3 + $0xc8] sm:$0xff]  ;;  %v9434_v25 = vsel %vm1755_vm7, %v1761_v23, %v1763_v24  ;;  %v9452_v23 = vsel %vm1755_vm7, %v1765_v39, %v1767_v45 }
  0xaa   : > { %7727 = vmatmul.mubr.msk.f32.gmra.mxu1 %vm346_vm2, %v8688_v46 }
  0xab   : > { %7729 = vmatprep.mubr.msk.f32.mxu1 %vm346_vm2, %v8711_v55 }
  0xac   : > { %7580 = vmatmul.mubr.msk.f32.gmra.mxu0 %vm346_vm2, %v9403_v6 }
  0xad   : > { %7621 = vmatprep.mubr.msk.f32.mxu0 %vm346_vm2, %v1758_v19  ;;  %v2260_v19 = vld [vmem:[#allocation3 + $0xc0] sm:$0xff] }
  0xae   : > { %7730 = vmatmul.mubr.msk.f32.gmra.mxu1 %vm346_vm2, %v8717_v59  ;;  %v9438_v59 = vsel %vm1755_vm7, %v1763_v24, %v1765_v39  ;;  %v1771_v24 = vrot.slane %v8656_v32, 6  ;;  %v9466_v39 = vunpack.c.h.bf16 %v8776_v29 }
  0xaf   : > { %7732 = vmatprep.mubr.msk.f32.mxu1 %vm346_vm2, %v8738_v3  ;;  %12083 = vst [vmem:[#allocation111_spill] sm:$0xff] %v9438_v59  ;;  %v1769_v3 = vrot.slane %v8633_v22, 6 }
  0xb0   : > { %7622 = vmatmul.mubr.msk.f32.vlgmr.msra.gmra.mxu0 %vm346_vm2, %v9416_v35  ;;  %v11927_v29 = vrot.slane %v9466_v39, 1 }
  0xb1   : > { %7682 = vmatpush3.msk.msra.mxu0 %vm383_vm0, %v9259_v53  ;;  %7624 = vmatprep.mubr.msk.f32.mxu0 %vm346_vm2, %v9420_v50  ;;  %v9443_v53 = vld [vmem:[#allocation3 + $0x100] sm:$0x1f]  ;;  %v1773_v50 = vrot.slane %v8664_v36, 6 }
  0xb2   : > { %7683 = vmatprep.subr.mxu0 %v2261_v30  ;;  %7733 = vmatmul.mubr.msk.f32.gmra.mxu1 %vm346_vm2, %v8745_v11 }
  0xb3   : > { %7684 = vmatpush3.msra.mxu0 %v2261_v30  ;;  %7735 = vmatprep.mubr.msk.f32.mxu1 %vm346_vm2, %v8766_v20  ;;  %v9456_v30 = vsel %vm1755_vm7, %v1767_v45, %v1769_v3  ;;  %v9473_v45 = vsel %vm1755_vm7, %v1769_v3, %v1771_v24 }
  0xb4   : > { %7625 = vmatmul.mubr.msk.f32.gmra.mxu0 %vm346_vm2, %v9434_v25  ;;  %7685 = vmatprep.subr.mxu0 %v2260_v19  ;;  %12084 = vst [vmem:[#allocation112_spill] sm:$0xff] %v9456_v30  ;;  %12085 = vst [vmem:[#allocation113_spill] sm:$0xff] %v9473_v45 }
  0xb5   : > { %7627 = vmatprep.mubr.msk.f32.mxu0 %vm346_vm2, %v9438_v59  ;;  %7686 = vmatpush3.msra.mxu0 %v2260_v19  ;;  %v1775_v19 = vrot.slane %v8683_v43, 6  ;;  %v9477_v59 = vsel %vm1755_vm7, %v1771_v24, %v1773_v50  ;;  %v1779_v24 = vrot.slane %v8714_v57, 6 }
  0xb6   : > { %7747 = vmatprep.subr.msk.mxu0 %vm383_vm0, %v9443_v53  ;;  %7736 = vmatmul.mubr.msk.f32.gmra.mxu1 %vm346_vm2, %v8772_v27  ;;  %12086 = vst [vmem:[#allocation114_spill] sm:$0xff] %v9477_v59  ;;  %v1777_v27 = vrot.slane %v8691_v48, 6 }
  0xb7   : > { %7738 = vmatprep.mubr.msk.f32.mxu1 %vm346_vm2, %v8797_v42  ;;  %v9490_v3 = vsel %vm1755_vm7, %v1773_v50, %v1775_v19 }
  0xb8   : > { %7628 = vmatmul.mubr.msk.f32.gmra.mxu0 %vm346_vm2, %v9452_v23  ;;  %12087 = vst [vmem:[#allocation115_spill] sm:$0xff] %v9490_v3 }
  0xb9   : > { %7630 = vmatprep.mubr.msk.f32.mxu0 %vm346_vm2, %v9456_v30  ;;  %v9494_v30 = vsel %vm1755_vm7, %v1775_v19, %v1777_v27  ;;  %v9513_v19 = vsel %vm1755_vm7, %v1777_v27, %v1779_v24  ;;  %v1787_v27 = vrot.slane %v8685_v44, 6 }
  0xba   : > { %7739 = vmatmul.mubr.msk.f32.gmra.mxu1 %vm346_vm2, %v8804_v49  ;;  %12088 = vst [vmem:[#allocation116_spill] sm:$0xff] %v9494_v30  ;;  %v1781_v49 = vrot.slane %v8720_v61, 6  ;;  %12091 = vst [vmem:[#allocation118_spill] sm:$0xff] %v9513_v19 }
  0xbb   : > { %7741 = vmatprep.mubr.msk.f32.mxu1 %vm346_vm2, %v8824_v58  ;;  %v1785_v58 = vrot.slane %v8675_v40, 6 }
  0xbc   : > { %7631 = vmatmul.mubr.msk.f32.gmra.mxu0 %vm346_vm2, %v9473_v45  ;;  %v12138_v45 = vld [vmem:[#allocation74_spill] sm:$0xff] }
  0xbd   : > { %7633 = vmatprep.mubr.msk.f32.mxu0 %vm346_vm2, %v9477_v59  ;;  %v12089_v59 = vrot.slane %v8801_v47, 1 }
  0xbe   : > { %7742 = vmatmul.mubr.msk.f32.gmra.mxu1 %vm346_vm2, %v8828_v62  ;;  %v1783_v62 = vrot.slane %v8658_v33, 6 }
  0xbf   : > { %7744 = vmatprep.mubr.msk.f32.mxu1 %vm346_vm2, %v8849_v10  ;;  %v9506_v50 = vsel %vm308_vm1, %v12089_v59, %v11927_v29  ;;  %v9517_v10 = vsel %vm1755_vm7, %v1779_v24, %v1781_v49  ;;  %v3180_v24 = vld [vmem:[#allocation3 + $0x140] sm:$0xff] }
  0xc0   : > { %12090 = vst [vmem:[#allocation117_spill] sm:$0xff] %v9506_v50  ;;  %7634 = vmatmul.mubr.msk.f32.gmra.mxu0 %vm346_vm2, %v9490_v3  ;;  %12092 = vst [vmem:[#allocation119_spill] sm:$0xff] %v9517_v10  ;;  %v9529_v59 = vsel %vm1755_vm7, %v1781_v49, %v1783_v62  ;;  %v9533_v29 = vsel %vm1755_vm7, %v1783_v62, %v1785_v58  ;;  %v9547_v49 = vsel %vm1755_vm7, %v1785_v58, %v1787_v27 }
  0xc1   : > { %7636 = vmatprep.mubr.msk.f32.mxu0 %vm346_vm2, %v9494_v30  ;;  %12093 = vst [vmem:[#allocation120_spill] sm:$0xff] %v9529_v59  ;;  %12094 = vst [vmem:[#allocation121_spill] sm:$0xff] %v9533_v29  ;;  %v1789_v30 = vrot.slane %v8704_v52, 6  ;;  %v11931_v62 = vrot.slane %v8801_v47, 6 }
  0xc2   : > { %7745 = vmatmul.mubr.msk.f32.gmra.mxu1 %vm346_vm2, %v9506_v50  ;;  %12095 = vst [vmem:[#allocation122_spill] sm:$0xff] %v9547_v49 }
  0xc3   : > { %7786 = vmatprep.mubr.msk.f32.mxu1 %vm346_vm2, %v8727_v63  ;;  %v3179_v63 = vld [vmem:[#allocation3 + $0x138] sm:$0xff]  ;;  %v9565_v58 = vsel %vm1755_vm7, %v1789_v30, %v11931_v62  ;;  %v12103_v62 = vld [vmem:[#allocation44_spill] sm:$0xff] }
  0xc4   : > { %7637 = vmatmul.mubr.msk.f32.gmra.mxu0 %vm346_vm2, %v9513_v19  ;;  %12097 = vst [vmem:[#allocation124_spill] sm:$0xff] %v9565_v58  ;;  %v12134_v19 = vld [vmem:[#allocation73_spill] sm:$0xff] }
  0xc5   : > { %7639 = vmatprep.mubr.msk.f32.mxu0 %vm346_vm2, %v9517_v10  ;;  %v3549_v10 = vld [vmem:[#allocation3 + $0x178] sm:$0x1f] }
  0xc6   : > { %7787 = vmatmul.mubr.msk.f32.vlgmr.msra.gmra.mxu1 %vm346_vm2, %v8742_v5 }
  0xc7   : > { %7789 = vmatprep.mubr.msk.f32.mxu1 %vm346_vm2, %v8753_v15  ;;  %7847 = vmatpush3.msk.msra.mxu1 %vm383_vm0, %v9383_v38  ;;  %v9551_v15 = vsel %vm1755_vm7, %v1787_v27, %v1789_v30  ;;  %v2628_v38 = vld [vmem:[#allocation3 + $0xf8] sm:$0xff]  ;;  %v2627_v30 = vld [vmem:[#allocation3 + $0xf0] sm:$0xff] }
  0xc8   : > { %7640 = vmatmul.mubr.msk.f32.gmra.mxu0 %vm346_vm2, %v9529_v59  ;;  %7848 = vmatprep.subr.mxu1 %v3180_v24  ;;  %12096 = vst [vmem:[#allocation123_spill] sm:$0xff] %v9551_v15  ;;  %v12098_v27 = vld [vmem:[#allocation38_spill] sm:$0xff] }
  0xc9   : > { %7642 = vmatprep.mubr.msk.f32.mxu0 %vm346_vm2, %v9533_v29  ;;  %7849 = vmatpush3.msra.mxu1 %v3180_v24  ;;  %v12099_v24 = vld [vmem:[#allocation40_spill] sm:$0xff] }
  0xca   : > { %7790 = vmatmul.mubr.msk.f32.gmra.mxu1 %vm346_vm2, %v8760_v18  ;;  %7850 = vmatprep.subr.mxu1 %v3179_v63  ;;  %v12130_v29 = vld [vmem:[#allocation68_spill] sm:$0xff] }
  0xcb   : > { %7792 = vmatprep.mubr.msk.f32.mxu1 %vm346_vm2, %v8783_v31  ;;  %7851 = vmatpush3.msra.mxu1 %v3179_v63  ;;  %v12101_v63 = vld [vmem:[#allocation42_spill] sm:$0xff] }
  0xcc   : > { %7643 = vmatmul.mubr.msk.f32.gmra.mxu0 %vm346_vm2, %v9547_v49  ;;  %7912 = vmatprep.subr.msk.mxu1 %vm383_vm0, %v3549_v10  ;;  %v12128_v31 = vld [vmem:[#allocation66_spill] sm:$0xff] }
  0xcd   : > { %7645 = vmatprep.mubr.msk.f32.mxu0 %vm346_vm2, %v9551_v15 }
  0xce   : > { %7793 = vmatmul.mubr.msk.f32.gmra.mxu1 %vm346_vm2, %v8789_v37 }
  0xcf   : > { %7795 = vmatprep.mubr.msk.f32.mxu1 %vm346_vm2, %v8812_v51 }
  0xd0   : > { %7646 = vmatmul.mubr.msk.f32.gmra.mxu0 %vm346_vm2, %v9565_v58  ;;  %v12126_v58 = vld [vmem:[#allocation64_spill] sm:$0xff] }
  0xd1   : > { %7687 = vmatprep.mubr.msk.f32.mxu0 %vm346_vm2, %v8612_v7  ;;  %v9587_v7 = vld [vmem:[#allocation3 + $0x130] sm:$0x1f] }
  0xd2   : > { %7796 = vmatmul.mubr.msk.f32.gmra.mxu1 %vm346_vm2, %v8818_v54  ;;  %v12123_v54 = vld [vmem:[#allocation63_spill] sm:$0xff] }
  0xd3   : > { %7798 = vmatprep.mubr.msk.f32.mxu1 %vm346_vm2, %v8835_v0  ;;  %v9704_v0 = vld [vmem:[#allocation3 + $0x160] sm:$0x1f] }
  0xd4   : > { %7688 = vmatmul.mubr.msk.f32.vlgmr.msra.gmra.mxu0 %vm346_vm2, %v8614_v8 }
  0xd5   : > { %7748 = vmatpush3.msk.msra.mxu0 %vm383_vm0, %v9443_v53  ;;  %7690 = vmatprep.mubr.msk.f32.mxu0 %vm346_vm2, %v8616_v9  ;;  %v12100_v53 = vld [vmem:[#allocation41_spill] sm:$0xff]  ;;  %v2995_v9 = vld [vmem:[#allocation3 + $0x120] sm:$0xff] }
  0xd6   : > { %7749 = vmatprep.subr.mxu0 %v2628_v38  ;;  %7799 = vmatmul.mubr.msk.f32.gmra.mxu1 %vm346_vm2, %v12098_v27 }
  0xd7   : > { %7750 = vmatpush3.msra.mxu0 %v2628_v38  ;;  %7801 = vmatprep.mubr.msk.f32.mxu1 %vm346_vm2, %v12099_v24  ;;  %v12102_v38 = vld [vmem:[#allocation43_spill] sm:$0xff]  ;;  %v12118_v24 = vld [vmem:[#allocation56_spill] sm:$0xff] }
  0xd8   : > { %7691 = vmatmul.mubr.msk.f32.gmra.mxu0 %vm346_vm2, %v8621_v12  ;;  %7751 = vmatprep.subr.mxu0 %v2627_v30 }
  0xd9   : > { %7693 = vmatprep.mubr.msk.f32.mxu0 %vm346_vm2, %v8623_v13  ;;  %7752 = vmatpush3.msra.mxu0 %v2627_v30  ;;  %v11935_v30 = vrot.slane %v9466_v39, 3  ;;  %v12116_v13 = vld [vmem:[#allocation54_spill] sm:$0xff] }
  0xda   : > { %7813 = vmatprep.subr.msk.mxu0 %vm383_vm0, %v9587_v7  ;;  %7802 = vmatmul.mubr.msk.f32.gmra.mxu1 %vm346_vm2, %v12100_v53  ;;  %v12117_v53 = vld [vmem:[#allocation57_spill] sm:$0xff] }
  0xdb   : > { %7804 = vmatprep.mubr.msk.f32.mxu1 %vm346_vm2, %v12101_v63  ;;  %v12104_v63 = vld [vmem:[#allocation45_spill] sm:$0xff] }
  0xdc   : > { %7694 = vmatmul.mubr.msk.f32.gmra.mxu0 %vm346_vm2, %v8631_v21  ;;  %v12105_v21 = vld [vmem:[#allocation46_spill] sm:$0xff] }
  0xdd   : > { %7696 = vmatprep.mubr.msk.f32.mxu0 %vm346_vm2, %v8633_v22  ;;  %v12106_v22 = vrot.slane %v8801_v47, 3 }
  0xde   : > { %7805 = vmatmul.mubr.msk.f32.gmra.mxu1 %vm346_vm2, %v12102_v38 }
  0xdf   : > { %7807 = vmatprep.mubr.msk.f32.mxu1 %vm346_vm2, %v12103_v62  ;;  %v9623_v62 = vsel %vm383_vm0, %v12106_v22, %v11935_v30  ;;  %v3548_v22 = vld [vmem:[#allocation3 + $0x170] sm:$0xff] }
  0xe0   : > { %7697 = vmatmul.mubr.msk.f32.gmra.mxu0 %vm346_vm2, %v8656_v32  ;;  %12107 = vst [vmem:[#allocation125_spill] sm:$0xff] %v9623_v62  ;;  %v12115_v32 = vld [vmem:[#allocation55_spill] sm:$0xff] }
  0xe1   : > { %7699 = vmatprep.mubr.msk.f32.mxu0 %vm346_vm2, %v8664_v36  ;;  %v12108_v36 = vld [vmem:[#allocation47_spill] sm:$0xff] }
  0xe2   : > { %7808 = vmatmul.mubr.msk.f32.gmra.mxu1 %vm346_vm2, %v12104_v63  ;;  %v12111_v63 = vld [vmem:[#allocation50_spill] sm:$0xff] }
  0xe3   : > { %7810 = vmatprep.mubr.msk.f32.mxu1 %vm346_vm2, %v12105_v21 }
  0xe4   : > { %7700 = vmatmul.mubr.msk.f32.gmra.mxu0 %vm346_vm2, %v8683_v43  ;;  %v12109_v43 = vld [vmem:[#allocation48_spill] sm:$0xff] }
  0xe5   : > { %7702 = vmatprep.mubr.msk.f32.mxu0 %vm346_vm2, %v8691_v48  ;;  %v12110_v48 = vld [vmem:[#allocation49_spill] sm:$0xff] }
  0xe6   : > { %7811 = vmatmul.mubr.msk.f32.gmra.mxu1 %vm346_vm2, %v9623_v62 }
  0xe7   : > { %7852 = vmatprep.mubr.msk.f32.mxu1 %vm346_vm2, %v12108_v36  ;;  %v3547_v36 = vld [vmem:[#allocation3 + $0x168] sm:$0xff] }
  0xe8   : > { %v9633_v21 = vpop.f32.mrf.mxu0  ;;  %7703 = vmatmul.mubr.msk.f32.gmra.mxu0 %vm346_vm2, %v8714_v57 }
  0xe9   : > { %7705 = vmatprep.mubr.msk.f32.mxu0 %vm346_vm2, %v8720_v61  ;;  %v9652_v61 = vld [vmem:[#allocation3 + $0x1a8] sm:$0x1f] }
  0xea   : > { %v9639_v30 = vpop.f32.mrf.mxu0  ;;  %7853 = vmatmul.mubr.msk.f32.vlgmr.msra.gmra.mxu1 %vm346_vm2, %v12109_v43  ;;  %v7479_v43 = vpop.f32.mrf.mxu1 }
  0xeb   : > { %7855 = vmatprep.mubr.msk.f32.mxu1 %vm346_vm2, %v12110_v48  ;;  %7913 = vmatpush3.msk.msra.mxu1 %vm383_vm0, %v3549_v10  ;;  %v12112_v48 = vld [vmem:[#allocation51_spill] sm:$0xff] }
  0xec   : > { %v9646_v62 = vpop.f32.mrf.mxu0  ;;  %7706 = vmatmul.mubr.msk.f32.gmra.mxu0 %vm346_vm2, %v8658_v33  ;;  %7914 = vmatprep.subr.mxu1 %v3548_v22  ;;  %v12113_v33 = vld [vmem:[#allocation52_spill] sm:$0xff] }
  0xed   : > { %7708 = vmatprep.mubr.msk.f32.mxu0 %vm346_vm2, %v8675_v40  ;;  %7915 = vmatpush3.msra.mxu1 %v3548_v22  ;;  %v717_v40 = vpop.f32.mrf.mxu1 }
  0xee   : > { %v9654_v57 = vpop.f32.mrf.mxu0  ;;  %7856 = vmatmul.mubr.msk.f32.gmra.mxu1 %vm346_vm2, %v12111_v63  ;;  %7916 = vmatprep.subr.mxu1 %v3547_v36 }
  0xef   : > { %7858 = vmatprep.mubr.msk.f32.mxu1 %vm346_vm2, %v12112_v48  ;;  %7917 = vmatpush3.msra.mxu1 %v3547_v36  ;;  %v7482_v63 = vpop.f32.mrf.mxu1  ;;  %v12114_v48 = vld [vmem:[#allocation53_spill] sm:$0xff] }
  0xf0   : > { %v9660_v10 = vpop.f32.mrf.mxu0  ;;  %7709 = vmatmul.mubr.msk.f32.gmra.mxu0 %vm346_vm2, %v8685_v44  ;;  %7978 = vmatprep.subr.msk.mxu1 %vm383_vm0, %v9652_v61 }
  0xf1   : > { %7711 = vmatprep.mubr.msk.f32.mxu0 %vm346_vm2, %v8704_v52  ;;  %v727_v44 = vpop.f32.mrf.mxu1 }
  0xf2   : > { %v9668_v22 = vpop.f32.mrf.mxu0  ;;  %7859 = vmatmul.mubr.msk.f32.gmra.mxu1 %vm346_vm2, %v12113_v33  ;;  %v2996_v33 = vld [vmem:[#allocation3 + $0x128] sm:$0xff] }
  0xf3   : > { %7861 = vmatprep.mubr.msk.f32.mxu1 %vm346_vm2, %v12114_v48  ;;  %v9682_v52 = vpop.f32.mrf.mxu1 }
  0xf4   : > { %v9674_v36 = vpop.f32.mrf.mxu0  ;;  %7712 = vmatmul.mubr.msk.f32.gmra.mxu0 %vm346_vm2, %v8801_v47 }
  0xf5   : > { %7753 = vmatprep.mubr.msk.f32.mxu0 %vm346_vm2, %v12115_v32  ;;  %v9692_v12 = vpop.f32.mrf.mxu1  ;;  %v12119_v32 = vld [vmem:[#allocation59_spill] sm:$0xff] }
  0xf6   : > { %v9680_v38 = vpop.f32.mrf.mxu0  ;;  %7862 = vmatmul.mubr.msk.f32.gmra.mxu1 %vm346_vm2, %v12116_v13 }
  0xf7   : > { %7864 = vmatprep.mubr.msk.f32.mxu1 %vm346_vm2, %v12117_v53  ;;  %v12120_v53 = vld [vmem:[#allocation58_spill] sm:$0xff] }
  0xf8   : > { %v9688_v48 = vpop.f32.mrf.mxu0  ;;  %7754 = vmatmul.mubr.msk.f32.vlgmr.msra.gmra.mxu0 %vm346_vm2, %v12118_v24  ;;  %v9700_v13 = vpop.f32.mrf.mxu1  ;;  %v12121_v24 = vld [vmem:[#allocation61_spill] sm:$0xff] }
  0xf9   : > { %7814 = vmatpush3.msk.msra.mxu0 %vm383_vm0, %v9587_v7  ;;  %7756 = vmatprep.mubr.msk.f32.mxu0 %vm346_vm2, %v12119_v32  ;;  %v12122_v7 = vld [vmem:[#allocation60_spill] sm:$0xff] }
  0xfa   : > { %v9698_v27 = vpop.f32.mrf.mxu0  ;;  %7815 = vmatprep.subr.mxu0 %v2996_v33  ;;  %7865 = vmatmul.mubr.msk.f32.gmra.mxu1 %vm346_vm2, %v12120_v53  ;;  %v9712_v32 = vpop.f32.mrf.mxu1  ;;  %v12125_v53 = vld [vmem:[#allocation65_spill] sm:$0xff] }
  0xfb   : > { %7816 = vmatpush3.msra.mxu0 %v2996_v33  ;;  %7867 = vmatprep.mubr.msk.f32.mxu1 %vm346_vm2, %v12121_v24  ;;  %v12124_v24 = vld [vmem:[#allocation62_spill] sm:$0xff] }
  0xfc   : > { %v9708_v8 = vpop.f32.mrf.mxu0  ;;  %7757 = vmatmul.mubr.msk.f32.gmra.mxu0 %vm346_vm2, %v12122_v7  ;;  %7817 = vmatprep.subr.mxu0 %v2995_v9  ;;  %v9720_v33 = vpop.f32.mrf.mxu1 }
  0xfd   : > { %7759 = vmatprep.mubr.msk.f32.mxu0 %vm346_vm2, %v12123_v54  ;;  %7818 = vmatpush3.msra.mxu0 %v2995_v9  ;;  %v12127_v9 = vld [vmem:[#allocation67_spill] sm:$0xff] }
  0xfe   : > { %v9716_v51 = vpop.f32.mrf.mxu0  ;;  %7879 = vmatprep.subr.msk.mxu0 %vm383_vm0, %v9704_v0  ;;  %7868 = vmatmul.mubr.msk.f32.gmra.mxu1 %vm346_vm2, %v12124_v24  ;;  %v9730_v54 = vpop.f32.mrf.mxu1  ;;  %v12129_v24 = vld [vmem:[#allocation69_spill] sm:$0xff] }
  0xff   : > { %7870 = vmatprep.mubr.msk.f32.mxu1 %vm346_vm2, %v12125_v53  ;;  %v3182_v53 = vrot.slane %v9466_v39, 5 }
 0x100   : > { %v9726_v7 = vpop.f32.mrf.mxu0  ;;  %7760 = vmatmul.mubr.msk.f32.gmra.mxu0 %vm346_vm2, %v12126_v58  ;;  %v9736_v37 = vpop.f32.mrf.mxu1 }
 0x101   : > { %7762 = vmatprep.mubr.msk.f32.mxu0 %vm346_vm2, %v12127_v9  ;;  %v12131_v9 = vld [vmem:[#allocation71_spill] sm:$0xff] }
 0x102   : > { %v9734_v15 = vpop.f32.mrf.mxu0  ;;  %7871 = vmatmul.mubr.msk.f32.gmra.mxu1 %vm346_vm2, %v12128_v31  ;;  %v9745_v58 = vpop.f32.mrf.mxu1  ;;  %v12132_v31 = vld [vmem:[#allocation70_spill] sm:$0xff] }
 0x103   : > { %7873 = vmatprep.mubr.msk.f32.mxu1 %vm346_vm2, %v12129_v24 }
 0x104   : > { %v7446_v49 = vpop.f32.mrf.mxu0  ;;  %7763 = vmatmul.mubr.msk.f32.gmra.mxu0 %vm346_vm2, %v12130_v29  ;;  %v9751_v5 = vpop.f32.mrf.mxu1  ;;  %v12135_v29 = vrot.slane %v8801_v47, 5 }
 0x105   : > { %v9747_v18 = vadd.f32 %v7479_v43, %v7446_v49  ;;  %7765 = vmatprep.mubr.msk.f32.mxu0 %vm346_vm2, %v12131_v9  ;;  %v12136_v43 = vld [vmem:[#allocation72_spill] sm:$0xff] }
 0x106   : > { %v523_v59 = vpop.f32.mrf.mxu0  ;;  %7874 = vmatmul.mubr.msk.f32.gmra.mxu1 %vm346_vm2, %v12132_v31  ;;  %v3183_v50 = vsel %vm1501_vm3, %v12135_v29, %v3182_v53  ;;  %v9764_v9 = vpop.f32.mrf.mxu1  ;;  %v12140_v31 = vld [vmem:[#allocation76_spill] sm:$0xff]  ;;  %v12141_v53 = vld [vmem:[#allocation75_spill] sm:$0xff]  ;;  %vm5859_vm3 = vcmask 982016  }
 0x107   : > { %v9755_v24 = vadd.f32 %v717_v40, %v523_v59  ;;  %7876 = vmatprep.mubr.msk.f32.mxu1 %vm346_vm2, %v12134_v19 }
 0x108   : > { %v7449_v49 = vpop.f32.mrf.mxu0  ;;  %7766 = vmatmul.mubr.msk.f32.gmra.mxu0 %vm346_vm2, %v12136_v43  ;;  %v9770_v59 = vpop.f32.mrf.mxu1 }
 0x109   : > { %12133 = vst [vmem:[#allocation47_spill] sm:$0xff] %v9755_v24  ;;  %v9766_v3 = vadd.f32 %v7482_v63, %v7449_v49  ;;  %7768 = vmatprep.mubr.msk.f32.mxu0 %vm346_vm2, %v12138_v45  ;;  %v12142_v49 = vld [vmem:[#allocation78_spill] sm:$0xff]  ;;  %v3914_v45 = vld [vmem:[#allocation3 + $0x1a0] sm:$0xff]  ;;  %v12148_v24 = vld [vmem:[#allocation81_spill] sm:$0xff] }
 0x10a   : > { %v533_v40 = vpop.f32.mrf.mxu0  ;;  %7877 = vmatmul.mubr.msk.f32.gmra.mxu1 %vm346_vm2, %v3183_v50  ;;  %v9779_v43 = vpop.f32.mrf.mxu1 }
 0x10b   : > { %12137 = vst [vmem:[#allocation48_spill] sm:$0xff] %v9766_v3  ;;  %v9773_v19 = vadd.f32 %v727_v44, %v533_v40  ;;  %7918 = vmatprep.mubr.msk.f32.mxu1 %vm346_vm2, %v12140_v31  ;;  %v12143_v44 = vld [vmem:[#allocation77_spill] sm:$0xff]  ;;  %v12144_v31 = vld [vmem:[#allocation80_spill] sm:$0xff] }
 0x10c   : > { %v7458_v29 = vpop.f32.mrf.mxu0  ;;  %7769 = vmatmul.mubr.msk.f32.gmra.mxu0 %vm346_vm2, %v12141_v53  ;;  %v9786_v50 = vpop.f32.mrf.mxu1  ;;  %v12145_v53 = vld [vmem:[#allocation79_spill] sm:$0xff] }
 0x10d   : > { %12139 = vst [vmem:[#allocation49_spill] sm:$0xff] %v9773_v19  ;;  %v9782_v63 = vadd.f32 %v7458_v29, %v9633_v21  ;;  %7771 = vmatprep.mubr.msk.f32.mxu0 %vm346_vm2, %v12142_v49  ;;  %v3913_v21 = vld [vmem:[#allocation3 + $0x198] sm:$0xff] }
 0x10e   : > { %v647_v3 = vpop.f32.mrf.mxu0  ;;  %7919 = vmatmul.mubr.msk.f32.vlgmr.msra.gmra.mxu1 %vm346_vm2, %v12143_v44  ;;  %v9799_v49 = vpop.f32.mrf.mxu1  ;;  %v12146_v44 = vld [vmem:[#allocation82_spill] sm:$0xff] }
 0x10f   : > { %v9791_v40 = vadd.f32 %v647_v3, %v9639_v30  ;;  %7921 = vmatprep.mubr.msk.f32.mxu1 %vm346_vm2, %v12144_v31  ;;  %7979 = vmatpush3.msk.msra.mxu1 %vm383_vm0, %v9652_v61  ;;  %v9807_v30 = vld [vmem:[#allocation3 + $0x1d8] sm:$0x1f] }
 0x110   : > { %v7461_v29 = vpop.f32.mrf.mxu0  ;;  %7772 = vmatmul.mubr.msk.f32.gmra.mxu0 %vm346_vm2, %v12145_v53  ;;  %7980 = vmatprep.subr.mxu1 %v3914_v45 }
 0x111   : > { %v9802_v19 = vadd.f32 %v7461_v29, %v9646_v62  ;;  %7774 = vmatprep.mubr.msk.f32.mxu0 %vm346_vm2, %v12146_v44  ;;  %7981 = vmatpush3.msra.mxu1 %v3914_v45  ;;  %v12149_v62 = vld [vmem:[#allocation84_spill] sm:$0xff]  ;;  %v12150_v44 = vld [vmem:[#allocation83_spill] sm:$0xff] }
 0x112   : > { %v657_v61 = vpop.f32.mrf.mxu0  ;;  %v9809_v31 = vpop.f32.mrf.mxu1  ;;  %7922 = vmatmul.mubr.msk.f32.gmra.mxu1 %vm346_vm2, %v12148_v24  ;;  %7982 = vmatprep.subr.mxu1 %v3913_v21  ;;  %v12152_v24 = vld [vmem:[#allocation86_spill] sm:$0xff] }
 0x113   : > { %12147 = vst [vmem:[#allocation50_spill] sm:$0xff] %v9809_v31  ;;  %v9814_v53 = vadd.f32 %v657_v61, %v9654_v57  ;;  %7924 = vmatprep.mubr.msk.f32.mxu1 %vm346_vm2, %v12149_v62  ;;  %7983 = vmatpush3.msra.mxu1 %v3913_v21  ;;  %v12153_v57 = vrot.slane %v9466_v39, 2  ;;  %v12154_v61 = vrot.slane %v8801_v47, 2 }
 0x114   : > { %v7464_v29 = vpop.f32.mrf.mxu0  ;;  %7775 = vmatmul.mubr.msk.f32.gmra.mxu0 %vm346_vm2, %v12150_v44  ;;  %v9820_v45 = vpop.f32.mrf.mxu1  ;;  %8044 = vmatprep.subr.msk.mxu1 %vm383_vm0, %v9807_v30 }
 0x115   : > { %12151 = vst [vmem:[#allocation51_spill] sm:$0xff] %v9820_v45  ;;  %v9825_v3 = vadd.f32 %v7464_v29, %v9660_v10  ;;  %7777 = vmatprep.mubr.msk.f32.mxu0 %vm346_vm2, %v12152_v24  ;;  %v9834_v21 = vsel %vm740_vm4, %v12154_v61, %v12153_v57  ;;  %v12157_v45 = vld [vmem:[#allocation85_spill] sm:$0xff]  ;;  %v12158_v10 = vld [vmem:[#allocation87_spill] sm:$0xff] }
 0x116   : > { %12155 = vst [vmem:[#allocation52_spill] sm:$0xff] %v9834_v21  ;;  %v667_v62 = vpop.f32.mrf.mxu0  ;;  %v9836_v44 = vpop.f32.mrf.mxu1  ;;  %7925 = vmatmul.mubr.msk.f32.gmra.mxu1 %vm346_vm2, %v12157_v45 }
 0x117   : > { %12156 = vst [vmem:[#allocation53_spill] sm:$0xff] %v9836_v44  ;;  %v9841_v31 = vadd.f32 %v667_v62, %v9668_v22  ;;  %7927 = vmatprep.mubr.msk.f32.mxu1 %vm346_vm2, %v12158_v10  ;;  %v12160_v22 = vld [vmem:[#allocation88_spill] sm:$0xff]  ;;  %v3364_v10 = vld [vmem:[#allocation3 + $0x158] sm:$0xff] }
 0x118   : > { %v7467_v29 = vpop.f32.mrf.mxu0  ;;  %7778 = vmatmul.mubr.msk.f32.gmra.mxu0 %vm346_vm2, %v9834_v21  ;;  %v9847_v24 = vpop.f32.mrf.mxu1  ;;  %v12161_v44 = vld [vmem:[#allocation90_spill] sm:$0xff] }
 0x119   : > { %12159 = vst [vmem:[#allocation55_spill] sm:$0xff] %v9847_v24  ;;  %v9850_v57 = vadd.f32 %v7467_v29, %v9674_v36  ;;  %7819 = vmatprep.mubr.msk.f32.mxu0 %vm346_vm2, %v9224_v56  ;;  %v12162_v24 = vld [vmem:[#allocation89_spill] sm:$0xff]  ;;  %v12164_v29 = vld [vmem:[#allocation92_spill] sm:$0xff] }
 0x11a   : > { %v677_v61 = vpop.f32.mrf.mxu0  ;;  %v9854_v45 = vpop.f32.mrf.mxu1  ;;  %7928 = vmatmul.mubr.msk.f32.gmra.mxu1 %vm346_vm2, %v12160_v22 }
 0x11b   : > { %v9859_v62 = vadd.f32 %v677_v61, %v9680_v38  ;;  %7930 = vmatprep.mubr.msk.f32.mxu1 %vm346_vm2, %v12161_v44  ;;  %v3363_v38 = vld [vmem:[#allocation3 + $0x150] sm:$0xff]  ;;  %v12166_v44 = vld [vmem:[#allocation91_spill] sm:$0xff] }
 0x11c   : > { %v7470_v21 = vpop.f32.mrf.mxu0  ;;  %7820 = vmatmul.mubr.msk.f32.vlgmr.msra.gmra.mxu0 %vm346_vm2, %v12162_v24  ;;  %v9865_v36 = vpop.f32.mrf.mxu1 }
 0x11d   : > { %12163 = vst [vmem:[#allocation54_spill] sm:$0xff] %v9865_v36  ;;  %v9868_v56 = vadd.f32 %v7470_v21, %v9688_v48  ;;  %7880 = vmatpush3.msk.msra.mxu0 %vm383_vm0, %v9704_v0  ;;  %7822 = vmatprep.mubr.msk.f32.mxu0 %vm346_vm2, %v12164_v29  ;;  %v9881_v48 = vld [vmem:[#allocation3 + $0x190] sm:$0x1f]  ;;  %v12167_v21 = vld [vmem:[#allocation94_spill] sm:$0xff] }
 0x11e   : > { %v687_v61 = vpop.f32.mrf.mxu0  ;;  %7881 = vmatprep.subr.mxu0 %v3364_v10  ;;  %v9874_v22 = vpop.f32.mrf.mxu1  ;;  %7931 = vmatmul.mubr.msk.f32.gmra.mxu1 %vm346_vm2, %v12166_v44  ;;  %v12168_v36 = vld [vmem:[#allocation93_spill] sm:$0xff] }
 0x11f   : > { %12165 = vst [vmem:[#allocation57_spill] sm:$0xff] %v9874_v22  ;;  %v9879_v24 = vadd.f32 %v687_v61, %v9698_v27  ;;  %7882 = vmatpush3.msra.mxu0 %v3364_v10  ;;  %7933 = vmatprep.mubr.msk.f32.mxu1 %vm346_vm2, %v12167_v21  ;;  %v12169_v61 = vld [vmem:[#allocation95_spill] sm:$0xff]  ;;  %v12170_v21 = vld [vmem:[#allocation98_spill] sm:$0xff] }
 0x120   : > { %v7473_v0 = vpop.f32.mrf.mxu0  ;;  %7823 = vmatmul.mubr.msk.f32.gmra.mxu0 %vm346_vm2, %v12168_v36  ;;  %7883 = vmatprep.subr.mxu0 %v3363_v38  ;;  %v9887_v29 = vpop.f32.mrf.mxu1 }
 0x121   : > { %v9890_v22 = vadd.f32 %v7473_v0, %v9708_v8  ;;  %7825 = vmatprep.mubr.msk.f32.mxu0 %vm346_vm2, %v9276_v16  ;;  %7884 = vmatpush3.msra.mxu0 %v3363_v38  ;;  %v12171_v0 = vld [vmem:[#allocation97_spill] sm:$0xff] }
 0x122   : > { %v697_v27 = vpop.f32.mrf.mxu0  ;;  %7945 = vmatprep.subr.msk.mxu0 %vm383_vm0, %v9881_v48  ;;  %v9896_v10 = vpop.f32.mrf.mxu1  ;;  %7934 = vmatmul.mubr.msk.f32.gmra.mxu1 %vm346_vm2, %v12169_v61 }
 0x123   : > { %v9901_v44 = vadd.f32 %v697_v27, %v9716_v51  ;;  %7936 = vmatprep.mubr.msk.f32.mxu1 %vm346_vm2, %v12170_v21  ;;  %v12173_v51 = vld [vmem:[#allocation99_spill] sm:$0xff]  ;;  %v3550_v21 = vrot.slane %v9466_v39, 7 }
 0x124   : > { %v7476_v8 = vpop.f32.mrf.mxu0  ;;  %7826 = vmatmul.mubr.msk.f32.gmra.mxu0 %vm346_vm2, %v12171_v0  ;;  %v9907_v38 = vpop.f32.mrf.mxu1 }
 0x125   : > { %v9910_v16 = vadd.f32 %v7476_v8, %v9726_v7  ;;  %7828 = vmatprep.mubr.msk.f32.mxu0 %vm346_vm2, %v9302_v28  ;;  %v12174_v7 = vld [vmem:[#allocation101_spill] sm:$0xff] }
 0x126   : > { %v707_v36 = vpop.f32.mrf.mxu0  ;;  %v9914_v61 = vpop.f32.mrf.mxu1  ;;  %7937 = vmatmul.mubr.msk.f32.gmra.mxu1 %vm346_vm2, %v12173_v51 }
 0x127   : > { %12172 = vst [vmem:[#allocation58_spill] sm:$0xff] %v9914_v61  ;;  %v9919_v27 = vadd.f32 %v707_v36, %v9734_v15  ;;  %7939 = vmatprep.mubr.msk.f32.mxu1 %vm346_vm2, %v9314_v4  ;;  %v12176_v15 = vld [vmem:[#allocation102_spill] sm:$0xff] }
 0x128   : > { %v7491_v0 = vpop.f32.mrf.mxu0  ;;  %7829 = vmatmul.mubr.msk.f32.gmra.mxu0 %vm346_vm2, %v12174_v7  ;;  %v9926_v8 = vpop.f32.mrf.mxu1  ;;  %v12177_v7 = vrot.slane %v8801_v47, 7 }
 0x129   : > { %v973_v28 = vadd.f32 %v7491_v0, %v9782_v63  ;;  %7831 = vmatprep.mubr.msk.f32.mxu0 %vm346_vm2, %v9325_v26  ;;  %v12178_v26 = vld [vmem:[#allocation104_spill] sm:$0xff] }
 0x12a   : > { %v883_v51 = vpop.f32.mrf.mxu0  ;;  %v9931_v61 = vpop.f32.mrf.mxu1  ;;  %7940 = vmatmul.mubr.msk.f32.gmra.mxu1 %vm346_vm2, %v12176_v15  ;;  %v3551_v63 = vsel %vm2009_vm5, %v12177_v7, %v3550_v21  ;;  %v12179_v7 = vld [vmem:[#allocation12_spill] sm:$0xff] }
 0x12b   : > { %12175 = vst [vmem:[#allocation61_spill] sm:$0xff] %v9931_v61  ;;  %v972_v4 = vadd.f32 %v883_v51, %v9791_v40  ;;  %v9937_v36 = vadd.f32 %v9682_v52, %v973_v28  ;;  %7942 = vmatprep.mubr.msk.f32.mxu1 %vm346_vm2, %v9339_v60  ;;  %v12180_v51 = vld [vmem:[#allocation105_spill] sm:$0xff] }
 0x12c   : > { %v7494_v0 = vpop.f32.mrf.mxu0  ;;  %7832 = vmatmul.mubr.msk.f32.gmra.mxu0 %vm346_vm2, %v12178_v26  ;;  %v9946_v61 = vpop.f32.mrf.mxu1 }
 0x12d   : > { %v975_v15 = vadd.f32 %v7494_v0, %v9802_v19  ;;  %v9950_v40 = vadd.f32 %v9692_v12, %v972_v4  ;;  %7834 = vmatprep.mubr.msk.f32.mxu0 %vm346_vm2, %v9346_v1 }
 0x12e   : > { %v893_v52 = vpop.f32.mrf.mxu0  ;;  %v9954_v28 = vpop.f32.mrf.mxu1  ;;  %7943 = vmatmul.mubr.msk.f32.gmra.mxu1 %vm346_vm2, %v3551_v63 }
 0x12f   : > { %v974_v60 = vadd.f32 %v893_v52, %v9814_v53  ;;  %v9959_v21 = vadd.f32 %v9700_v13, %v975_v15  ;;  %7984 = vmatprep.mubr.msk.f32.mxu1 %vm346_vm2, %v12179_v7  ;;  %v4283_v53 = vld [vmem:[#allocation3 + $0x1d0] sm:$0xff] }
 0x130   : > { %v7497_v19 = vpop.f32.mrf.mxu0  ;;  %7835 = vmatmul.mubr.msk.f32.gmra.mxu0 %vm346_vm2, %v12180_v51  ;;  %v9965_v12 = vpop.f32.mrf.mxu1  ;;  %v12181_v15 = vld [vmem:[#allocation13_spill] sm:$0xff] }
 0x131   : > { %v977_v4 = vadd.f32 %v7497_v19, %v9825_v3  ;;  %v9969_v0 = vadd.f32 %v9712_v32, %v974_v60  ;;  %7837 = vmatprep.mubr.msk.f32.mxu0 %vm346_vm2, %v9362_v2  ;;  %v4282_v32 = vld [vmem:[#allocation3 + $0x1c8] sm:$0xff] }
 0x132   : > { %v903_v13 = vpop.f32.mrf.mxu0  ;;  %v9973_v63 = vpop.f32.mrf.mxu1  ;;  %7985 = vmatmul.mubr.msk.f32.vlgmr.msra.gmra.mxu1 %vm346_vm2, %v12181_v15 }
 0x133   : > { %v976_v52 = vadd.f32 %v903_v13, %v9841_v31  ;;  %v9979_v7 = vadd.f32 %v9720_v33, %v977_v4  ;;  %7987 = vmatprep.mubr.msk.f32.mxu1 %vm346_vm2, %v8661_v34  ;;  %8045 = vmatpush3.msk.msra.mxu1 %vm383_vm0, %v9807_v30  ;;  %v11970_v34 = vrot.slane %v9466_v39, 4  ;;  %v12182_v13 = vld [vmem:[#allocation108_spill] sm:$0xff] }
 0x134   : > { %v7500_v3 = vpop.f32.mrf.mxu0  ;;  %7838 = vmatmul.mubr.msk.f32.gmra.mxu0 %vm346_vm2, %v9366_v17  ;;  %v9987_v60 = vpop.f32.mrf.mxu1  ;;  %8046 = vmatprep.subr.mxu1 %v4283_v53  ;;  %v12225_v17 = vld [vmem:[#allocation61_spill] sm:$0xff] }
 0x135   : > { %v979_v19 = vadd.f32 %v7500_v3, %v9850_v57  ;;  %v9991_v31 = vadd.f32 %v9730_v54, %v976_v52  ;;  %7840 = vmatprep.mubr.msk.f32.mxu0 %vm346_vm2, %v9380_v14  ;;  %8047 = vmatpush3.msra.mxu1 %v4283_v53 }
 0x136   : > { %v913_v33 = vpop.f32.mrf.mxu0  ;;  %v9996_v30 = vpop.f32.mrf.mxu1  ;;  %7988 = vmatmul.mubr.msk.f32.gmra.mxu1 %vm346_vm2, %v8680_v41  ;;  %8048 = vmatprep.subr.mxu1 %v4282_v32 }
 0x137   : > { %v978_v4 = vadd.f32 %v913_v33, %v9859_v62  ;;  %v10002_v57 = vadd.f32 %v9736_v37, %v979_v19  ;;  %7990 = vmatprep.mubr.msk.f32.mxu1 %vm346_vm2, %v8688_v46  ;;  %8049 = vmatpush3.msra.mxu1 %v4282_v32  ;;  %v12183_v37 = vrot.slane %v8801_v47, 4  ;;  %v12185_v32 = vld [vmem:[#allocation23_spill] sm:$0xff] }
 0x138   : > { %v7503_v54 = vpop.f32.mrf.mxu0  ;;  %7841 = vmatmul.mubr.msk.f32.gmra.mxu0 %vm346_vm2, %v12182_v13  ;;  %v10008_v53 = vpop.f32.mrf.mxu1 }
 0x139   : > { %v981_v15 = vadd.f32 %v7503_v54, %v9868_v56  ;;  %v10012_v41 = vadd.f32 %v9745_v58, %v978_v4  ;;  %7843 = vmatprep.mubr.msk.f32.mxu0 %vm346_vm2, %v9403_v6  ;;  %v10021_v46 = vsel %vm1247_vm6, %v12183_v37, %v11970_v34  ;;  %v3732_v37 = vld [vmem:[#allocation3 + $0x188] sm:$0xff]  ;;  %v12208_v6 = vld [vmem:[#allocation54_spill] sm:$0xff] }
 0x13a   : > { %12184 = vst [vmem:[#allocation62_spill] sm:$0xff] %v10021_v46  ;;  %v923_v62 = vpop.f32.mrf.mxu0  ;;  %v10023_v52 = vpop.f32.mrf.mxu1  ;;  %7991 = vmatmul.mubr.msk.f32.gmra.mxu1 %vm346_vm2, %v8711_v55 }
 0x13b   : > { %v980_v56 = vadd.f32 %v923_v62, %v9879_v24  ;;  %v10029_v58 = vadd.f32 %v9751_v5, %v981_v15  ;;  %7993 = vmatprep.mubr.msk.f32.mxu1 %vm346_vm2, %v12185_v32  ;;  %v12186_v24 = vld [vmem:[#allocation25_spill] sm:$0xff]  ;;  %v10073_v32 = vld [vmem:[#allocation3 + $0x1c0] sm:$0x1f] }
 0x13c   : > { %v7506_v3 = vpop.f32.mrf.mxu0  ;;  %7844 = vmatmul.mubr.msk.f32.gmra.mxu0 %vm346_vm2, %v10021_v46  ;;  %v10035_v19 = vpop.f32.mrf.mxu1  ;;  %v12205_v46 = vld [vmem:[#allocation117_spill] sm:$0xff] }
 0x13d   : > { %v983_v33 = vadd.f32 %v7506_v3, %v9890_v22  ;;  %v10039_v4 = vadd.f32 %v9764_v9, %v980_v56  ;;  %7885 = vmatprep.mubr.msk.f32.mxu0 %vm346_vm2, %v9416_v35  ;;  %v12187_v22 = vld [vmem:[#allocation110_spill] sm:$0xff]  ;;  %v12189_v3 = vld [vmem:[#allocation111_spill] sm:$0xff] }
 0x13e   : > { %v933_v55 = vpop.f32.mrf.mxu0  ;;  %v10043_v5 = vpop.f32.mrf.mxu1  ;;  %7994 = vmatmul.mubr.msk.f32.gmra.mxu1 %vm346_vm2, %v12186_v24 }
 0x13f   : > { %v982_v54 = vadd.f32 %v933_v55, %v9901_v44  ;;  %v10049_v15 = vadd.f32 %v9770_v59, %v983_v33  ;;  %7996 = vmatprep.mubr.msk.f32.mxu1 %vm346_vm2, %v8745_v11  ;;  %v3731_v59 = vld [vmem:[#allocation3 + $0x180] sm:$0xff]  ;;  %v260_v55 = vld [vmem:[%s8604_s6 + $0x50] sm:$0xf] }
 0x140   : > { %v7509_v9 = vpop.f32.mrf.mxu0  ;;  %7886 = vmatmul.mubr.msk.f32.vlgmr.msra.gmra.mxu0 %vm346_vm2, %v12187_v22  ;;  %v10055_v35 = vpop.f32.mrf.mxu1  ;;  %v10100_v22 = vunpack.c.l.bf16 %v260_v55  ;;  %v12198_v55 = vld [vmem:[#allocation49_spill] sm:$0xff] }
 0x141   : > { %v985_v62 = vadd.f32 %v7509_v9, %v9910_v16  ;;  %v10059_v56 = vadd.f32 %v9779_v43, %v982_v54  ;;  %7946 = vmatpush3.msk.msra.mxu0 %vm383_vm0, %v9881_v48  ;;  %7888 = vmatprep.mubr.msk.f32.mxu0 %vm346_vm2, %v9434_v25  ;;  %v12188_v48 = vld [vmem:[#allocation29_spill] sm:$0xff]  ;;  %v12190_v54 = vld [vmem:[#allocation47_spill] sm:$0xff]  ;;  %v12191_v9 = vld [vmem:[#allocation50_spill] sm:$0xff] }
 0x142   : > { %v943_v11 = vpop.f32.mrf.mxu0  ;;  %7947 = vmatprep.subr.mxu0 %v3732_v37  ;;  %v10065_v44 = vpop.f32.mrf.mxu1  ;;  %7997 = vmatmul.mubr.msk.f32.gmra.mxu1 %vm346_vm2, %v8766_v20 }
 0x143   : > { %v984_v16 = vadd.f32 %v943_v11, %v9919_v27  ;;  %v10071_v43 = vadd.f32 %v9786_v50, %v985_v62  ;;  %7948 = vmatpush3.msra.mxu0 %v3732_v37  ;;  %7999 = vmatprep.mubr.msk.f32.mxu1 %vm346_vm2, %v12188_v48  ;;  %v12193_v62 = vld [vmem:[#allocation112_spill] sm:$0xff]  ;;  %v12195_v48 = vld [vmem:[#allocation51_spill] sm:$0xff] }
 0x144   : > { %v7512_v25 = vpop.f32.mrf.mxu0  ;;  %7889 = vmatmul.mubr.msk.f32.gmra.mxu0 %vm346_vm2, %v12189_v3  ;;  %7949 = vmatprep.subr.mxu0 %v3731_v59  ;;  %v10079_v33 = vpop.f32.mrf.mxu1  ;;  %v12194_v11 = vld [vmem:[#allocation48_spill] sm:$0xff] }
 0x145   : > { %v987_v20 = vadd.f32 %v7512_v25, %v9747_v18  ;;  %v10084_v27 = vadd.f32 %v9799_v49, %v984_v16  ;;  %7891 = vmatprep.mubr.msk.f32.mxu0 %vm346_vm2, %v9452_v23  ;;  %7950 = vmatpush3.msra.mxu0 %v3731_v59  ;;  %v12192_v49 = vld [vmem:[#allocation32_spill] sm:$0xff]  ;;  %v12196_v25 = vld [vmem:[#allocation113_spill] sm:$0xff] }
 0x146   : > { %v953_v50 = vpop.f32.mrf.mxu0  ;;  %8011 = vmatprep.subr.msk.mxu0 %vm383_vm0, %v10073_v32  ;;  %v10090_v24 = vpop.f32.mrf.mxu1  ;;  %8000 = vmatmul.mubr.msk.f32.gmra.mxu1 %vm346_vm2, %v8797_v42 }
 0x147   : > { %v986_v37 = vadd.f32 %v953_v50, %v12190_v54  ;;  %v10096_v18 = vadd.f32 %v12191_v9, %v987_v20  ;;  %8002 = vmatprep.mubr.msk.f32.mxu1 %vm346_vm2, %v12192_v49  ;;  %v12197_v50 = vld [vmem:[#allocation35_spill] sm:$0xff]  ;;  %v12199_v9 = vld [vmem:[#allocation53_spill] sm:$0xff] }
 0x148   : > { %v7515_v23 = vpop.f32.mrf.mxu0  ;;  %7892 = vmatmul.mubr.msk.f32.gmra.mxu0 %vm346_vm2, %v12193_v62  ;;  %v10104_v59 = vpop.f32.mrf.mxu1  ;;  %v12200_v62 = vld [vmem:[#allocation36_spill] sm:$0xff] }
 0x149   : > { %v989_v16 = vadd.f32 %v7515_v23, %v12194_v11  ;;  %v10108_v42 = vadd.f32 %v12195_v48, %v986_v37  ;;  %7894 = vmatprep.mubr.msk.f32.mxu0 %vm346_vm2, %v12196_v25  ;;  %v3917_v37 = vrot.slane %v10100_v22, 1  ;;  %v12201_v11 = vld [vmem:[#allocation114_spill] sm:$0xff]  ;;  %v12202_v25 = vld [vmem:[#allocation55_spill] sm:$0xff] }
 0x14a   : > { %v963_v3 = vpop.f32.mrf.mxu0  ;;  %v10112_v20 = vpop.f32.mrf.mxu1  ;;  %8003 = vmatmul.mubr.msk.f32.gmra.mxu1 %vm346_vm2, %v12197_v50 }
 0x14b   : > { %v988_v54 = vadd.f32 %v963_v3, %v12198_v55  ;;  %v10118_v49 = vadd.f32 %v12199_v9, %v989_v16  ;;  %8005 = vmatprep.mubr.msk.f32.mxu1 %vm346_vm2, %v12200_v62  ;;  %v12203_v3 = vld [vmem:[#allocation115_spill] sm:$0xff] }
 0x14c   : > { %v7557_v23 = vpop.f32.mrf.mxu0  ;;  %7895 = vmatmul.mubr.msk.f32.gmra.mxu0 %vm346_vm2, %v12201_v11  ;;  %v10125_v48 = vpop.f32.mrf.mxu1  ;;  %v12204_v9 = vld [vmem:[#allocation39_spill] sm:$0xff] }
 0x14d   : > { %v10128_v34 = vadd.f32 %v12202_v25, %v988_v54  ;;  %v1480_v50 = vadd.f32 %v7557_v23, %v9937_v36  ;;  %7897 = vmatprep.mubr.msk.f32.mxu0 %vm346_vm2, %v12203_v3  ;;  %v12206_v54 = vrot.slane %v9466_v39, 1  ;;  %v12207_v25 = vld [vmem:[#allocation116_spill] sm:$0xff] }
 0x14e   : > { %v1390_v16 = vpop.f32.mrf.mxu0  ;;  %v10133_v55 = vpop.f32.mrf.mxu1  ;;  %8006 = vmatmul.mubr.msk.f32.gmra.mxu1 %vm346_vm2, %v12204_v9 }
 0x14f   : > { %v1479_v62 = vadd.f32 %v1390_v16, %v9950_v40  ;;  %v10139_v11 = vadd.f32 %v9854_v45, %v1480_v50  ;;  %8008 = vmatprep.mubr.msk.f32.mxu1 %vm346_vm2, %v12205_v46  ;;  %v3918_v36 = vsel %vm308_vm1, %v12206_v54, %v3917_v37  ;;  %v12209_v45 = vld [vmem:[#allocation118_spill] sm:$0xff]  ;;  %v12210_v16 = vld [vmem:[#allocation57_spill] sm:$0xff]  ;;  %vm5823_vm1 = vcmask 654336  }
 0x150   : > { %v7560_v23 = vpop.f32.mrf.mxu0  ;;  %7898 = vmatmul.mubr.msk.f32.gmra.mxu0 %vm346_vm2, %v12207_v25  ;;  %v10148_v3 = vpop.f32.mrf.mxu1  ;;  %v12211_v25 = vld [vmem:[#allocation26_spill] sm:$0xff] }
 0x151   : > { %v1482_v9 = vadd.f32 %v7560_v23, %v9959_v21  ;;  %v10152_v40 = vadd.f32 %v12208_v6, %v1479_v62  ;;  %7900 = vmatprep.mubr.msk.f32.mxu0 %vm346_vm2, %v12209_v45  ;;  %v12212_v23 = vld [vmem:[#allocation119_spill] sm:$0xff] }
 0x152   : > { %v1400_v50 = vpop.f32.mrf.mxu0  ;;  %v10156_v46 = vpop.f32.mrf.mxu1  ;;  %8009 = vmatmul.mubr.msk.f32.gmra.mxu1 %vm346_vm2, %v3918_v36  ;;  %v12213_v36 = vld [vmem:[#allocation120_spill] sm:$0xff] }
 0x153   : > { %v1481_v37 = vadd.f32 %v1400_v50, %v9969_v0  ;;  %v10161_v54 = vadd.f32 %v12210_v16, %v1482_v9  ;;  %8050 = vmatprep.mubr.msk.f32.mxu1 %vm346_vm2, %v12211_v25  ;;  %v12214_v50 = vld [vmem:[#allocation27_spill] sm:$0xff] }
 0x154   : > { %v7563_v21 = vpop.f32.mrf.mxu0  ;;  %7901 = vmatmul.mubr.msk.f32.gmra.mxu0 %vm346_vm2, %v12212_v23  ;;  %v10167_v6 = vpop.f32.mrf.mxu1  ;;  %v12215_v23 = vld [vmem:[#allocation28_spill] sm:$0xff] }
 0x155   : > { %v1484_v62 = vadd.f32 %v7563_v21, %v9979_v7  ;;  %v10171_v45 = vadd.f32 %v9887_v29, %v1481_v37  ;;  %7903 = vmatprep.mubr.msk.f32.mxu0 %vm346_vm2, %v12213_v36  ;;  %v12216_v29 = vld [vmem:[#allocation121_spill] sm:$0xff] }
 0x156   : > { %v1410_v0 = vpop.f32.mrf.mxu0  ;;  %v10175_v9 = vpop.f32.mrf.mxu1  ;;  %8051 = vmatmul.mubr.msk.f32.vlgmr.msra.gmra.mxu1 %vm346_vm2, %v12214_v50  ;;  %v12217_v50 = vld [vmem:[#allocation122_spill] sm:$0xff] }
 0x157   : > { %v1483_v16 = vadd.f32 %v1410_v0, %v9991_v31  ;;  %v10181_v25 = vadd.f32 %v9896_v10, %v1484_v62  ;;  %8053 = vmatprep.mubr.msk.f32.mxu1 %vm346_vm2, %v12215_v23  ;;  %v3366_v10 = vrot.slane %v9466_v39, 6  ;;  %v12218_v0 = vld [vmem:[#allocation30_spill] sm:$0xff] }
 0x158   : > { %v7566_v7 = vpop.f32.mrf.mxu0  ;;  %7904 = vmatmul.mubr.msk.f32.gmra.mxu0 %vm346_vm2, %v12216_v29  ;;  %v10187_v37 = vpop.f32.mrf.mxu1  ;;  %v12219_v29 = vld [vmem:[#allocation58_spill] sm:$0xff] }
 0x159   : > { %v1486_v21 = vadd.f32 %v7566_v7, %v10002_v57  ;;  %v10191_v36 = vadd.f32 %v9907_v38, %v1483_v16  ;;  %7906 = vmatprep.mubr.msk.f32.mxu0 %vm346_vm2, %v12217_v50  ;;  %v12220_v57 = vld [vmem:[#allocation31_spill] sm:$0xff] }
 0x15a   : > { %v1420_v31 = vpop.f32.mrf.mxu0  ;;  %v10196_v62 = vpop.f32.mrf.mxu1  ;;  %8054 = vmatmul.mubr.msk.f32.gmra.mxu1 %vm346_vm2, %v12218_v0  ;;  %v12221_v16 = vld [vmem:[#allocation123_spill] sm:$0xff]  ;;  %v12222_v0 = vld [vmem:[#allocation124_spill] sm:$0xff] }
 0x15b   : > { %v1485_v23 = vadd.f32 %v1420_v31, %v10012_v41  ;;  %v10202_v13 = vadd.f32 %v12219_v29, %v1486_v21  ;;  %8056 = vmatprep.mubr.msk.f32.mxu1 %vm346_vm2, %v12220_v57  ;;  %v12223_v41 = vrot.slane %v8801_v47, 6  ;;  %v12224_v57 = vld [vmem:[#allocation33_spill] sm:$0xff] }
 0x15c   : > { %v7569_v38 = vpop.f32.mrf.mxu0  ;;  %7907 = vmatmul.mubr.msk.f32.gmra.mxu0 %vm346_vm2, %v12221_v16  ;;  %v10208_v7 = vpop.f32.mrf.mxu1 }
 0x15d   : > { %v1488_v50 = vadd.f32 %v7569_v38, %v10029_v58  ;;  %v10212_v14 = vadd.f32 %v9926_v8, %v1485_v23  ;;  %7909 = vmatprep.mubr.msk.f32.mxu0 %vm346_vm2, %v12222_v0  ;;  %v3367_v21 = vsel %vm1755_vm7, %v12223_v41, %v3366_v10  ;;  %v12226_v8 = vld [vmem:[#allocation34_spill] sm:$0xff] }
 0x15e   : > { %v1430_v31 = vpop.f32.mrf.mxu0  ;;  %v10219_v29 = vpop.f32.mrf.mxu1  ;;  %8057 = vmatmul.mubr.msk.f32.gmra.mxu1 %vm346_vm2, %v12224_v57  ;;  %v12227_v41 = vld [vmem:[#allocation6_spill] sm:$0xff] }
 0x15f   : > { %v1487_v16 = vadd.f32 %v1430_v31, %v10039_v4  ;;  %v10225_v58 = vadd.f32 %v12225_v17, %v1488_v50  ;;  %8059 = vmatprep.mubr.msk.f32.mxu1 %vm346_vm2, %v12226_v8  ;;  %v12228_v17 = vld [vmem:[#allocation37_spill] sm:$0xff]  ;;  %v4099_v57 = vld [vmem:[#allocation3 + $0x1b8] sm:$0xff] }
 0x160   : > { %v7572_v23 = vpop.f32.mrf.mxu0  ;;  %7910 = vmatmul.mubr.msk.f32.gmra.mxu0 %vm346_vm2, %v3367_v21  ;;  %v10230_v38 = vpop.f32.mrf.mxu1  ;;  %v12229_v8 = vld [vmem:[#allocation38_spill] sm:$0xff] }
 0x161   : > { %v1490_v10 = vadd.f32 %v7572_v23, %v10049_v15  ;;  %v10234_v0 = vadd.f32 %v9946_v61, %v1487_v16  ;;  %7951 = vmatprep.mubr.msk.f32.mxu0 %vm346_vm2, %v12227_v41  ;;  %v12230_v15 = vld [vmem:[#allocation7_spill] sm:$0xff] }
 0x162   : > { %v1440_v4 = vpop.f32.mrf.mxu0  ;;  %v10238_v31 = vpop.f32.mrf.mxu1  ;;  %8060 = vmatmul.mubr.msk.f32.gmra.mxu1 %vm346_vm2, %v12228_v17  ;;  %v12232_v17 = vld [vmem:[#allocation40_spill] sm:$0xff] }
 0x163   : > { %v1489_v50 = vadd.f32 %v1440_v4, %v10059_v56  ;;  %v10244_v21 = vadd.f32 %v9954_v28, %v1490_v10  ;;  %8062 = vmatprep.mubr.msk.f32.mxu1 %vm346_vm2, %v12229_v8  ;;  %v12231_v28 = vld [vmem:[#allocation8_spill] sm:$0xff]  ;;  %v4098_v56 = vld [vmem:[#allocation3 + $0x1b0] sm:$0xff] }
 0x164   : > { %v7575_v61 = vpop.f32.mrf.mxu0  ;;  %7952 = vmatmul.mubr.msk.f32.vlgmr.msra.gmra.mxu0 %vm346_vm2, %v12230_v15  ;;  %v10250_v16 = vpop.f32.mrf.mxu1 }
 0x165   : > { %v1492_v23 = vadd.f32 %v7575_v61, %v10071_v43  ;;  %v10254_v41 = vadd.f32 %v9965_v12, %v1489_v50  ;;  %8012 = vmatpush3.msk.msra.mxu0 %vm383_vm0, %v10073_v32  ;;  %7954 = vmatprep.mubr.msk.f32.mxu0 %vm346_vm2, %v12231_v28  ;;  %v10268_v12 = vld [vmem:[#allocation3 + $0x1f0] sm:$0x1f] }
 0x166   : > { %v1450_v10 = vpop.f32.mrf.mxu0  ;;  %8013 = vmatprep.subr.mxu0 %v4099_v57  ;;  %v10260_v4 = vpop.f32.mrf.mxu1  ;;  %8063 = vmatmul.mubr.msk.f32.gmra.mxu1 %vm346_vm2, %v12232_v17  ;;  %v12233_v32 = vld [vmem:[#allocation41_spill] sm:$0xff] }
 0x167   : > { %v1491_v8 = vadd.f32 %v1450_v10, %v10084_v27  ;;  %v10266_v43 = vadd.f32 %v9973_v63, %v1492_v23  ;;  %8014 = vmatpush3.msra.mxu0 %v4099_v57  ;;  %8065 = vmatprep.mubr.msk.f32.mxu1 %vm346_vm2, %v12233_v32  ;;  %v12234_v61 = vld [vmem:[#allocation9_spill] sm:$0xff]  ;;  %v12235_v63 = vld [vmem:[#allocation10_spill] sm:$0xff]  ;;  %v12238_v32 = vld [vmem:[#allocation11_spill] sm:$0xff] }
 0x168   : > { %v7578_v50 = vpop.f32.mrf.mxu0  ;;  %7955 = vmatmul.mubr.msk.f32.gmra.mxu0 %vm346_vm2, %v12234_v61  ;;  %8015 = vmatprep.subr.mxu0 %v4098_v56  ;;  %v10274_v15 = vpop.f32.mrf.mxu1  ;;  %v12236_v10 = vld [vmem:[#allocation42_spill] sm:$0xff] }
 0x169   : > { %v1494_v28 = vadd.f32 %v7578_v50, %v10096_v18  ;;  %v10278_v27 = vadd.f32 %v9987_v60, %v1491_v8  ;;  %7957 = vmatprep.mubr.msk.f32.mxu0 %vm346_vm2, %v12235_v63  ;;  %8016 = vmatpush3.msra.mxu0 %v4098_v56  ;;  %v12237_v60 = vld [vmem:[#allocation43_spill] sm:$0xff]  ;;  %v12239_v63 = vld [vmem:[#allocation14_spill] sm:$0xff] }
 0x16a   : > { %v1460_v57 = vpop.f32.mrf.mxu0  ;;  %8077 = vmatprep.subr.msk.mxu0 %vm383_vm0, %v10268_v12  ;;  %v10284_v23 = vpop.f32.mrf.mxu1  ;;  %8066 = vmatmul.mubr.msk.f32.gmra.mxu1 %vm346_vm2, %v12236_v10 }
 0x16b   : > { %v1493_v17 = vadd.f32 %v1460_v57, %v10108_v42  ;;  %v10290_v18 = vadd.f32 %v9996_v30, %v1494_v28  ;;  %8068 = vmatprep.mubr.msk.f32.mxu1 %vm346_vm2, %v12237_v60  ;;  %v12240_v28 = vld [vmem:[#allocation44_spill] sm:$0xff]  ;;  %v12241_v60 = vld [vmem:[#allocation45_spill] sm:$0xff] }
 0x16c   : > { %v7581_v8 = vpop.f32.mrf.mxu0  ;;  %7958 = vmatmul.mubr.msk.f32.gmra.mxu0 %vm346_vm2, %v12238_v32  ;;  %v10296_v56 = vpop.f32.mrf.mxu1 }
 0x16d   : > { %v1496_v50 = vadd.f32 %v7581_v8, %v10118_v49  ;;  %v10300_v61 = vadd.f32 %v10008_v53, %v1493_v17  ;;  %7960 = vmatprep.mubr.msk.f32.mxu0 %vm346_vm2, %v12239_v63  ;;  %v4285_v53 = vrot.slane %v10100_v22, 3  ;;  %v12242_v17 = vld [vmem:[#allocation16_spill] sm:$0xff] }
 0x16e   : > { %v1470_v42 = vpop.f32.mrf.mxu0  ;;  %v10304_v30 = vpop.f32.mrf.mxu1  ;;  %8069 = vmatmul.mubr.msk.f32.gmra.mxu1 %vm346_vm2, %v12240_v28 }
 0x16f   : > { %v1495_v57 = vadd.f32 %v1470_v42, %v10128_v34  ;;  %v10310_v10 = vadd.f32 %v10023_v52, %v1496_v50  ;;  %8071 = vmatprep.mubr.msk.f32.mxu1 %vm346_vm2, %v12241_v60  ;;  %v12243_v34 = vld [vmem:[#allocation18_spill] sm:$0xff] }
 0x170   : > { %v7623_v49 = vpop.f32.mrf.mxu0  ;;  %7961 = vmatmul.mubr.msk.f32.gmra.mxu0 %vm346_vm2, %v12242_v17  ;;  %v10317_v8 = vpop.f32.mrf.mxu1  ;;  %v12244_v42 = vld [vmem:[#allocation46_spill] sm:$0xff]  ;;  %v12245_v17 = vld [vmem:[#allocation125_spill] sm:$0xff] }
 0x171   : > { %v10320_v32 = vadd.f32 %v10035_v19, %v1495_v57  ;;  %v1988_v63 = vadd.f32 %v7623_v49, %v10139_v11  ;;  %7963 = vmatprep.mubr.msk.f32.mxu0 %vm346_vm2, %v12243_v34  ;;  %v12246_v19 = vrot.slane %v9466_v39, 3  ;;  %v12247_v49 = vld [vmem:[#allocation20_spill] sm:$0xff] }
 0x172   : > { %v1898_v52 = vpop.f32.mrf.mxu0  ;;  %v10325_v50 = vpop.f32.mrf.mxu1  ;;  %8072 = vmatmul.mubr.msk.f32.gmra.mxu1 %vm346_vm2, %v12244_v42 }
 0x173   : > { %v1987_v28 = vadd.f32 %v1898_v52, %v10152_v40  ;;  %v10331_v60 = vadd.f32 %v10043_v5, %v1988_v63  ;;  %8074 = vmatprep.mubr.msk.f32.mxu1 %vm346_vm2, %v12245_v17  ;;  %v4286_v11 = vsel %vm383_vm0, %v12246_v19, %v4285_v53  ;;  %v12248_v5 = vld [vmem:[#allocation22_spill] sm:$0xff] }
 0x174   : > { %v7626_v57 = vpop.f32.mrf.mxu0  ;;  %7964 = vmatmul.mubr.msk.f32.gmra.mxu0 %vm346_vm2, %v12247_v49  ;;  %v10340_v34 = vpop.f32.mrf.mxu1  ;;  %v12249_v49 = vld [vmem:[#allocation24_spill] sm:$0xff] }
 0x175   : > { %v1990_v42 = vadd.f32 %v7626_v57, %v10161_v54  ;;  %v10344_v40 = vadd.f32 %v10055_v35, %v1987_v28  ;;  %7966 = vmatprep.mubr.msk.f32.mxu0 %vm346_vm2, %v12248_v5  ;;  %v12250_v57 = vld [vmem:[#allocation15_spill] sm:$0xff] }
 0x176   : > { %v1908_v63 = vpop.f32.mrf.mxu0  ;;  %v10348_v52 = vpop.f32.mrf.mxu1  ;;  %8075 = vmatmul.mubr.msk.f32.gmra.mxu1 %vm346_vm2, %v4286_v11 }
 0x177   : > { %v1989_v53 = vadd.f32 %v1908_v63, %v10171_v45  ;;  %v10353_v17 = vadd.f32 %v10065_v44, %v1990_v42  ;;  %v12251_v63 = vld [vmem:[#allocation17_spill] sm:$0xff] }
 0x178   : > { %v7629_v19 = vpop.f32.mrf.mxu0  ;;  %7967 = vmatmul.mubr.msk.f32.gmra.mxu0 %vm346_vm2, %v12249_v49  ;;  %v10357_v54 = vpop.f32.mrf.mxu1 }
 0x179   : > { %v1992_v35 = vadd.f32 %v7629_v19, %v10181_v25  ;;  %v10361_v28 = vadd.f32 %v10079_v33, %v1989_v53  ;;  %7969 = vmatprep.mubr.msk.f32.mxu0 %vm346_vm2, %v12250_v57  ;;  %v12252_v53 = vld [vmem:[#allocation19_spill] sm:$0xff] }
 0x17a   : > { %v1918_v11 = vpop.f32.mrf.mxu0  ;;  %v10365_v5 = vpop.f32.mrf.mxu1 }
 0x17b   : > { %v1991_v44 = vadd.f32 %v1918_v11, %v10191_v36  ;;  %v10369_v45 = vadd.f32 %v10090_v24, %v1992_v35  ;;  %v12253_v11 = vld [vmem:[#allocation21_spill] sm:$0xff] }
 0x17c   : > { %v7632_v42 = vpop.f32.mrf.mxu0  ;;  %7970 = vmatmul.mubr.msk.f32.gmra.mxu0 %vm346_vm2, %v12251_v63  ;;  %v10373_v49 = vpop.f32.mrf.mxu1 }
 0x17d   : > { %v1994_v33 = vadd.f32 %v7632_v42, %v10202_v13  ;;  %v10377_v25 = vadd.f32 %v10104_v59, %v1991_v44  ;;  %7972 = vmatprep.mubr.msk.f32.mxu0 %vm346_vm2, %v12252_v53 }
 0x17e   : > { %v1928_v19 = vpop.f32.mrf.mxu0  ;;  %v10381_v57 = vpop.f32.mrf.mxu1 }
 0x17f   : > { %v1993_v24 = vadd.f32 %v1928_v19, %v10212_v14  ;;  %v10385_v36 = vadd.f32 %v10112_v20, %v1994_v33 }
 0x180   : > { %v7635_v35 = vpop.f32.mrf.mxu0  ;;  %7973 = vmatmul.mubr.msk.f32.gmra.mxu0 %vm346_vm2, %v12253_v11  ;;  %v10389_v63 = vpop.f32.mrf.mxu1 }
 0x181   : > { %v1996_v13 = vadd.f32 %v7635_v35, %v10225_v58  ;;  %v10393_v59 = vadd.f32 %v10125_v48, %v1993_v24  ;;  %7975 = vmatprep.mubr.msk.f32.mxu0 %vm346_vm2, %v8801_v47  ;;  %v12254_v47 = vld [vmem:[#allocation56_spill] sm:$0xff] }
 0x182   : > { %v1938_v44 = vpop.f32.mrf.mxu0  ;;  %v10397_v42 = vpop.f32.mrf.mxu1  ;;  %v4467_v35 = vld [vmem:[#allocation3 + $0x1e8] sm:$0xff] }
 0x183   : > { %v1995_v14 = vadd.f32 %v1938_v44, %v10234_v0  ;;  %v10401_v20 = vadd.f32 %v10133_v55, %v1996_v13  ;;  %v12255_v13 = vld [vmem:[#allocation59_spill] sm:$0xff] }
 0x184   : > { %v7638_v33 = vpop.f32.mrf.mxu0  ;;  %7976 = vmatmul.mubr.msk.f32.gmra.mxu0 %vm346_vm2, %v9466_v39  ;;  %v10405_v53 = vpop.f32.mrf.mxu1 }
 0x185   : > { %v1998_v48 = vadd.f32 %v7638_v33, %v10244_v21  ;;  %v10409_v58 = vadd.f32 %v10148_v3, %v1995_v14  ;;  %8017 = vmatprep.mubr.msk.f32.mxu0 %vm346_vm2, %v12254_v47  ;;  %v12256_v14 = vld [vmem:[#allocation60_spill] sm:$0xff] }
 0x186   : > { %v1948_v19 = vpop.f32.mrf.mxu0  ;;  %v10413_v24 = vpop.f32.mrf.mxu1 }
 0x187   : > { %v1997_v55 = vadd.f32 %v1948_v19, %v10254_v41  ;;  %v10417_v0 = vadd.f32 %v10156_v46, %v1998_v48  ;;  %v4466_v46 = vld [vmem:[#allocation3 + $0x1e0] sm:$0xff] }
 0x188   : > { %v7641_v11 = vpop.f32.mrf.mxu0  ;;  %8018 = vmatmul.mubr.msk.f32.vlgmr.msra.gmra.mxu0 %vm346_vm2, %v12255_v13  ;;  %v10421_v21 = vpop.f32.mrf.mxu1 }
 0x189   : > { %v2000_v3 = vadd.f32 %v7641_v11, %v10266_v43  ;;  %v10425_v44 = vadd.f32 %v10167_v6, %v1997_v55  ;;  %8078 = vmatpush3.msk.msra.mxu0 %vm383_vm0, %v10268_v12  ;;  %8020 = vmatprep.mubr.msk.f32.mxu0 %vm346_vm2, %v12256_v14  ;;  %v12257_v6 = vld [vmem:[#allocation63_spill] sm:$0xff]  ;;  %v12258_v11 = vld [vmem:[#allocation64_spill] sm:$0xff]  ;;  %vm5984_vm0 = vcmask 752640  }
 0x18a   : > { %v1958_v41 = vpop.f32.mrf.mxu0  ;;  %8079 = vmatprep.subr.mxu0 %v4467_v35  ;;  %v10431_v33 = vpop.f32.mrf.mxu1  ;;  %v12259_v14 = vld [vmem:[#allocation67_spill] sm:$0xff] }
 0x18b   : > { %v1999_v48 = vadd.f32 %v1958_v41, %v10278_v27  ;;  %v10435_v47 = vadd.f32 %v10175_v9, %v2000_v3  ;;  %8080 = vmatpush3.msra.mxu0 %v4467_v35  ;;  %v12261_v41 = vld [vmem:[#allocation68_spill] sm:$0xff] }
 0x18c   : > { %v7644_v43 = vpop.f32.mrf.mxu0  ;;  %8021 = vmatmul.mubr.msk.f32.gmra.mxu0 %vm346_vm2, %v12257_v6  ;;  %8081 = vmatprep.subr.mxu0 %v4466_v46  ;;  %v10439_v12 = vpop.f32.mrf.mxu1  ;;  %v12262_v6 = vld [vmem:[#allocation71_spill] sm:$0xff] }
 0x18d   : > { %v2002_v19 = vadd.f32 %v7644_v43, %v10290_v18  ;;  %v10443_v55 = vadd.f32 %v10187_v37, %v1999_v48  ;;  %8023 = vmatprep.mubr.msk.f32.mxu0 %vm346_vm2, %v12258_v11  ;;  %8082 = vmatpush3.msra.mxu0 %v4466_v46  ;;  %v12264_v11 = vld [vmem:[#allocation72_spill] sm:$0xff] }
 0x18e   : > { %v1968_v27 = vpop.f32.mrf.mxu0  ;;  %v10447_v9 = vpop.f32.mrf.mxu1 }
 0x18f   : > { %v10450_v35 = vadd.f32 %v1968_v27, %v10300_v61  ;;  %v10453_v13 = vadd.f32 %v10196_v62, %v2002_v19 }
 0x190   : > { %v7647_v3 = vpop.f32.mrf.mxu0  ;;  %8024 = vmatmul.mubr.msk.f32.gmra.mxu0 %vm346_vm2, %v12259_v14  ;;  %v10457_v18 = vpop.f32.mrf.mxu1 }
 0x191   : > { %12260 = vst [vmem:[#allocation65_spill] sm:$0xff] %v10457_v18  ;;  %v2004_v37 = vadd.f32 %v7647_v3, %v10310_v10  ;;  %8026 = vmatprep.mubr.msk.f32.mxu0 %vm346_vm2, %v12261_v41 }
 0x192   : > { %v1978_v46 = vpop.f32.mrf.mxu0  ;;  %v10462_v48 = vpop.f32.mrf.mxu1 }
 0x193   : > { %v10465_v61 = vadd.f32 %v1978_v46, %v10320_v32  ;;  %v10468_v62 = vadd.f32 %v10219_v29, %v2004_v37  ;;  %v12265_v37 = vld [vmem:[#allocation74_spill] sm:$0xff]  ;;  %v12267_v46 = vld [vmem:[#allocation75_spill] sm:$0xff] }
 0x194   : > { %v7689_v43 = vpop.f32.mrf.mxu0  ;;  %8027 = vmatmul.mubr.msk.f32.gmra.mxu0 %vm346_vm2, %v12262_v6  ;;  %v10472_v19 = vpop.f32.mrf.mxu1 }
 0x195   : > { %12263 = vst [vmem:[#allocation66_spill] sm:$0xff] %v10472_v19  ;;  %v2424_v10 = vadd.f32 %v7689_v43, %v10331_v60  ;;  %8029 = vmatprep.mubr.msk.f32.mxu0 %vm346_vm2, %v12264_v11  ;;  %v12268_v11 = vld [vmem:[#allocation78_spill] sm:$0xff] }
 0x196   : > { %v2334_v27 = vpop.f32.mrf.mxu0  ;;  %v10477_v3 = vpop.f32.mrf.mxu1 }
 0x197   : > { %v10480_v32 = vadd.f32 %v2334_v27, %v10344_v40  ;;  %v10483_v29 = vadd.f32 %v10238_v31, %v2424_v10 }
 0x198   : > { %v7692_v14 = vpop.f32.mrf.mxu0  ;;  %8030 = vmatmul.mubr.msk.f32.gmra.mxu0 %vm346_vm2, %v12265_v37  ;;  %v10487_v41 = vpop.f32.mrf.mxu1 }
 0x199   : > { %12266 = vst [vmem:[#allocation69_spill] sm:$0xff] %v10487_v41  ;;  %v2426_v60 = vadd.f32 %v7692_v14, %v10353_v17  ;;  %8032 = vmatprep.mubr.msk.f32.mxu0 %vm346_vm2, %v12267_v46  ;;  %v12270_v14 = vld [vmem:[#allocation79_spill] sm:$0xff] }
 0x19a   : > { %v2344_v43 = vpop.f32.mrf.mxu0  ;;  %v10492_v6 = vpop.f32.mrf.mxu1 }
 0x19b   : > { %v10495_v40 = vadd.f32 %v2344_v43, %v10361_v28  ;;  %v10498_v31 = vadd.f32 %v10260_v4, %v2426_v60  ;;  %v12271_v43 = vld [vmem:[#allocation82_spill] sm:$0xff] }
 0x19c   : > { %v7695_v10 = vpop.f32.mrf.mxu0  ;;  %8033 = vmatmul.mubr.msk.f32.gmra.mxu0 %vm346_vm2, %v12268_v11  ;;  %v10502_v27 = vpop.f32.mrf.mxu1 }
 0x19d   : > { %12269 = vst [vmem:[#allocation70_spill] sm:$0xff] %v10502_v27  ;;  %v2428_v17 = vadd.f32 %v7695_v10, %v10369_v45  ;;  %8035 = vmatprep.mubr.msk.f32.mxu0 %vm346_vm2, %v12270_v14  ;;  %v12272_v10 = vld [vmem:[#allocation83_spill] sm:$0xff]  ;;  %v4101_v14 = vrot.slane %v10100_v22, 2 }
 0x19e   : > { %v2354_v37 = vpop.f32.mrf.mxu0  ;;  %v10507_v46 = vpop.f32.mrf.mxu1 }
 0x19f   : > { %v10510_v28 = vadd.f32 %v2354_v37, %v10377_v25  ;;  %v10513_v4 = vadd.f32 %v10284_v23, %v2428_v17  ;;  %v12273_v37 = vld [vmem:[#allocation86_spill] sm:$0xff] }
 0x1a0   : > { %v7698_v60 = vpop.f32.mrf.mxu0  ;;  %8036 = vmatmul.mubr.msk.f32.gmra.mxu0 %vm346_vm2, %v12271_v43  ;;  %v10517_v11 = vpop.f32.mrf.mxu1 }
 0x1a1   : > { %v2430_v45 = vadd.f32 %v7698_v60, %v10385_v36  ;;  %8038 = vmatprep.mubr.msk.f32.mxu0 %vm346_vm2, %v12272_v10  ;;  %v12274_v60 = vld [vmem:[#allocation52_spill] sm:$0xff]  ;;  %v12275_v10 = vrot.slane %v9466_v39, 2 }
 0x1a2   : > { %v2364_v27 = vpop.f32.mrf.mxu0  ;;  %v10523_v41 = vpop.f32.mrf.mxu1 }
 0x1a3   : > { %v10526_v25 = vadd.f32 %v2364_v27, %v10393_v59  ;;  %v10529_v23 = vadd.f32 %v10304_v30, %v2430_v45  ;;  %v4102_v19 = vsel %vm740_vm4, %v12275_v10, %v4101_v14  ;;  %vm6376_vm4 = vcmask 23552  }
 0x1a4   : > { %v7701_v17 = vpop.f32.mrf.mxu0  ;;  %8039 = vmatmul.mubr.msk.f32.gmra.mxu0 %vm346_vm2, %v12273_v37  ;;  %v10533_v43 = vpop.f32.mrf.mxu1 }
 0x1a5   : > { %v2432_v36 = vadd.f32 %v7701_v17, %v10401_v20  ;;  %8041 = vmatprep.mubr.msk.f32.mxu0 %vm346_vm2, %v12274_v60  ;;  %v12276_v60 = vld [vmem:[#allocation89_spill] sm:$0xff] }
 0x1a6   : > { %v2374_v59 = vpop.f32.mrf.mxu0  ;;  %v10541_v27 = vpop.f32.mrf.mxu1 }
 0x1a7   : > { %v10544_v30 = vadd.f32 %v2374_v59, %v10409_v58  ;;  %v10547_v45 = vadd.f32 %v10325_v50, %v2432_v36  ;;  %v12277_v36 = vld [vmem:[#allocation92_spill] sm:$0xff]  ;;  %v12278_v59 = vld [vmem:[#allocation93_spill] sm:$0xff] }
 0x1a8   : > { %v7704_v37 = vpop.f32.mrf.mxu0  ;;  %8042 = vmatmul.mubr.msk.f32.gmra.mxu0 %vm346_vm2, %v4102_v19  ;;  %v10550_v20 = vpop.f32.mrf.mxu1 }
 0x1a9   : > { %v2434_v17 = vadd.f32 %v7704_v37, %v10417_v0  ;;  %8083 = vmatprep.mubr.msk.f32.mxu0 %vm346_vm2, %v12276_v60 }
 0x1aa   : > { %v2384_v14 = vpop.f32.mrf.mxu0  ;;  %v10555_v10 = vpop.f32.mrf.mxu1 }
 0x1ab   : > { %v10558_v18 = vadd.f32 %v2384_v14, %v10425_v44  ;;  %v10561_v58 = vadd.f32 %v10348_v52, %v2434_v17  ;;  %v12280_v14 = vld [vmem:[#allocation96_spill] sm:$0xff] }
 0x1ac   : > { %v7707_v50 = vpop.f32.mrf.mxu0  ;;  %8084 = vmatmul.mubr.msk.f32.vlgmr.msra.gmra.mxu0 %vm346_vm2, %v12277_v36  ;;  %v10565_v19 = vpop.f32.mrf.mxu1 }
 0x1ad   : > { %v2436_v0 = vadd.f32 %v7707_v50, %v10435_v47  ;;  %8086 = vmatprep.mubr.msk.f32.mxu0 %vm346_vm2, %v12278_v59  ;;  %v2255_v47 = vadd.f32 %v10208_v7, %v10450_v35  ;;  %v12282_v59 = vld [vmem:[#allocation97_spill] sm:$0xff]  ;;  %v2257_v7 = vadd.f32 %v10230_v38, %v10465_v61  ;;  %v2608_v38 = vadd.f32 %v10250_v16, %v10480_v32 }
 0x1ae   : > { %v2394_v37 = vpop.f32.mrf.mxu0  ;;  %v10570_v60 = vpop.f32.mrf.mxu1  ;;  %v2610_v16 = vadd.f32 %v10274_v15, %v10495_v40  ;;  %v2612_v15 = vadd.f32 %v10296_v56, %v10510_v28  ;;  %v2614_v56 = vadd.f32 %v10317_v8, %v10526_v25  ;;  %v2616_v25 = vadd.f32 %v10340_v34, %v10544_v30 }
 0x1af   : > { %12279 = vst [vmem:[#allocation73_spill] sm:$0xff] %v10570_v60  ;;  %v10573_v44 = vadd.f32 %v2394_v37, %v10443_v55  ;;  %v10576_v52 = vadd.f32 %v10365_v5, %v2436_v0  ;;  %v2618_v30 = vadd.f32 %v10357_v54, %v10558_v18 }
 0x1b0   : > { %v7710_v17 = vpop.f32.mrf.mxu0  ;;  %8087 = vmatmul.mubr.msk.f32.gmra.mxu0 %vm346_vm2, %v12280_v14  ;;  %v10580_v36 = vpop.f32.mrf.mxu1  ;;  %v12283_v14 = vld [vmem:[#allocation100_spill] sm:$0xff] }
 0x1b1   : > { %12281 = vst [vmem:[#allocation76_spill] sm:$0xff] %v10580_v36  ;;  %v2438_v50 = vadd.f32 %v7710_v17, %v10453_v13  ;;  %8089 = vmatprep.mubr.msk.f32.mxu0 %vm346_vm2, %v12282_v59  ;;  %v12284_v13 = vld [vmem:[#allocation101_spill] sm:$0xff]  ;;  %v12285_v59 = vld [vmem:[#allocation103_spill] sm:$0xff] }
 0x1b2   : > { %v2404_v60 = vpop.f32.mrf.mxu0  ;;  %v10587_v55 = vpop.f32.mrf.mxu1 }
 0x1b3   : > { %v10589_v37 = vadd.f32 %v2404_v60, %v2255_v47  ;;  %v10592_v5 = vadd.f32 %v10381_v57, %v2438_v50 }
 0x1b4   : > { %v7713_v0 = vpop.f32.mrf.mxu0  ;;  %8090 = vmatmul.mubr.msk.f32.gmra.mxu0 %vm346_vm2, %v12283_v14  ;;  %v10596_v36 = vpop.f32.mrf.mxu1 }
 0x1b5   : > { %v2440_v35 = vadd.f32 %v7713_v0, %v10468_v62  ;;  %8092 = vmatprep.mubr.msk.f32.mxu0 %vm346_vm2, %v12284_v13 }
 0x1b6   : > { %v2414_v17 = vpop.f32.mrf.mxu0  ;;  %v10603_v60 = vpop.f32.mrf.mxu1 }
 0x1b7   : > { %v10605_v47 = vadd.f32 %v2414_v17, %v2257_v7  ;;  %v10608_v57 = vadd.f32 %v10397_v42, %v2440_v35 }
 0x1b8   : > { %v7755_v50 = vpop.f32.mrf.mxu0  ;;  %8093 = vmatmul.mubr.msk.f32.gmra.mxu0 %vm346_vm2, %v12285_v59  ;;  %v10612_v14 = vpop.f32.mrf.mxu1 }
 0x1b9   : > { %v2793_v61 = vadd.f32 %v7755_v50, %v10483_v29  ;;  %8095 = vmatprep.mubr.msk.f32.mxu0 %vm346_vm2, %v12178_v26 }
 0x1ba   : > { %v2703_v62 = vpop.f32.mrf.mxu0  ;;  %v10619_v0 = vpop.f32.mrf.mxu1 }
 0x1bb   : > { %v10621_v7 = vadd.f32 %v2703_v62, %v2608_v38  ;;  %v10624_v42 = vadd.f32 %v10413_v24, %v2793_v61 }
 0x1bc   : > { %v7758_v35 = vpop.f32.mrf.mxu0  ;;  %8096 = vmatmul.mubr.msk.f32.gmra.mxu0 %vm346_vm2, %v9346_v1  ;;  %v10628_v13 = vpop.f32.mrf.mxu1 }
 0x1bd   : > { %v2795_v32 = vadd.f32 %v7758_v35, %v10498_v31  ;;  %8098 = vmatprep.mubr.msk.f32.mxu0 %vm346_vm2, %v12180_v51  ;;  %v12286_v51 = vld [vmem:[#allocation106_spill] sm:$0xff]  ;;  %v4469_v35 = vrot.slane %v10100_v22, 4 }
 0x1be   : > { %v2713_v26 = vpop.f32.mrf.mxu0  ;;  %v10635_v29 = vpop.f32.mrf.mxu1  ;;  %v12290_v22 = vld [vmem:[#allocation62_spill] sm:$0xff] }
 0x1bf   : > { %v10637_v17 = vadd.f32 %v2713_v26, %v2610_v16  ;;  %v10640_v24 = vadd.f32 %v10431_v33, %v2795_v32 }
 0x1c0   : > { %v7761_v50 = vpop.f32.mrf.mxu0  ;;  %8099 = vmatmul.mubr.msk.f32.gmra.mxu0 %vm346_vm2, %v9362_v2  ;;  %v10644_v1 = vpop.f32.mrf.mxu1  ;;  %v12287_v2 = vld [vmem:[#allocation107_spill] sm:$0xff] }
 0x1c1   : > { %v2797_v40 = vadd.f32 %v7761_v50, %v10513_v4  ;;  %8101 = vmatprep.mubr.msk.f32.mxu0 %vm346_vm2, %v12286_v51  ;;  %v12288_v4 = vld [vmem:[#allocation108_spill] sm:$0xff] }
 0x1c2   : > { %v2723_v31 = vpop.f32.mrf.mxu0  ;;  %v10651_v59 = vpop.f32.mrf.mxu1 }
 0x1c3   : > { %v10653_v38 = vadd.f32 %v2723_v31, %v2612_v15  ;;  %v10656_v33 = vadd.f32 %v10447_v9, %v2797_v40  ;;  %v12289_v15 = vld [vmem:[#allocation109_spill] sm:$0xff]  ;;  %v12291_v40 = vrot.slane %v9466_v39, 4 }
 0x1c4   : > { %v7764_v61 = vpop.f32.mrf.mxu0  ;;  %8102 = vmatmul.mubr.msk.f32.gmra.mxu0 %vm346_vm2, %v12287_v2  ;;  %v10660_v62 = vpop.f32.mrf.mxu1 }
 0x1c5   : > { %v2799_v28 = vadd.f32 %v7764_v61, %v10529_v23  ;;  %8104 = vmatprep.mubr.msk.f32.mxu0 %vm346_vm2, %v12288_v4  ;;  %v4470_v51 = vsel %vm1247_vm6, %v12291_v40, %v4469_v35 }
 0x1c6   : > { %v2733_v16 = vpop.f32.mrf.mxu0  ;;  %v10668_v32 = vpop.f32.mrf.mxu1 }
 0x1c7   : > { %v10670_v9 = vadd.f32 %v2733_v16, %v2614_v56  ;;  %v10673_v26 = vadd.f32 %v10462_v48, %v2799_v28 }
 0x1c8   : > { %v7767_v50 = vpop.f32.mrf.mxu0  ;;  %8105 = vmatmul.mubr.msk.f32.gmra.mxu0 %vm346_vm2, %v12289_v15  ;;  %v10677_v8 = vpop.f32.mrf.mxu1 }
 0x1c9   : > { %v2801_v23 = vadd.f32 %v7767_v50, %v10547_v45  ;;  %8107 = vmatprep.mubr.msk.f32.mxu0 %vm346_vm2, %v12290_v22  ;;  %v2620_v50 = vadd.f32 %v10373_v49, %v10573_v44 }
 0x1ca   : > { %v2743_v48 = vpop.f32.mrf.mxu0  ;;  %v10687_v31 = vpop.f32.mrf.mxu1 }
 0x1cb   : > { %v10689_v61 = vadd.f32 %v2743_v48, %v2616_v25  ;;  %v10692_v2 = vadd.f32 %v10477_v3, %v2801_v23 }
 0x1cc   : > { %v7770_v56 = vpop.f32.mrf.mxu0  ;;  %8108 = vmatmul.mubr.msk.f32.gmra.mxu0 %vm346_vm2, %v4470_v51  ;;  %v10695_v34 = vpop.f32.mrf.mxu1  ;;  %vm5841_vm2 = vcmask 818176  }
 0x1cd   : > { %v2803_v39 = vadd.f32 %v7770_v56, %v10561_v58 }
 0x1ce   : > { %v2753_v45 = vpop.f32.mrf.mxu0  ;;  %v10700_v28 = vpop.f32.mrf.mxu1 }
 0x1cf   : > { %v10702_v4 = vadd.f32 %v2753_v45, %v2618_v30  ;;  %v10705_v35 = vadd.f32 %v10492_v6, %v2803_v39  ;;  %v2622_v6 = vadd.f32 %v10389_v63, %v10589_v37  ;;  %v2624_v30 = vadd.f32 %v10405_v53, %v10605_v47 }
 0x1d0   : > { %v7773_v3 = vpop.f32.mrf.mxu0  ;;  %v10707_v16 = vpop.f32.mrf.mxu1 }
 0x1d1   : > { %v2805_v15 = vadd.f32 %v7773_v3, %v10576_v52 }
 0x1d2   : > { %v2763_v25 = vpop.f32.mrf.mxu0  ;;  %v10712_v54 = vpop.f32.mrf.mxu1 }
 0x1d3   : > { %v2804_v18 = vadd.f32 %v2763_v25, %v2620_v50  ;;  %v10715_v58 = vadd.f32 %v10507_v46, %v2805_v15  ;;  %v2976_v50 = vadd.f32 %v10421_v21, %v10621_v7 }
 0x1d4   : > { %v7776_v23 = vpop.f32.mrf.mxu0  ;;  %v10717_v22 = vpop.f32.mrf.mxu1 }
 0x1d5   : > { %v2807_v40 = vadd.f32 %v7776_v23, %v10592_v5  ;;  %v10723_v51 = vadd.f32 %v10517_v11, %v2804_v18  ;;  %v2978_v23 = vadd.f32 %v10439_v12, %v10637_v17  ;;  %v12294_v17 = vld [vmem:[#allocation76_spill] sm:$0xff] }
 0x1d6   : > { %v2773_v49 = vpop.f32.mrf.mxu0  ;;  %v10725_v44 = vpop.f32.mrf.mxu1 }
 0x1d7   : > { %v2806_v52 = vadd.f32 %v2773_v49, %v2622_v6  ;;  %v10728_v48 = vadd.f32 %v10523_v41, %v2807_v40  ;;  %v12292_v40 = vld [vmem:[#allocation73_spill] sm:$0xff] }
 0x1d8   : > { %v7779_v46 = vpop.f32.mrf.mxu0  ;;  %v10730_v56 = vpop.f32.mrf.mxu1 }
 0x1d9   : > { %v2809_v63 = vadd.f32 %v7779_v46, %v10608_v57  ;;  %v10736_v37 = vadd.f32 %v10533_v43, %v2806_v52  ;;  %v12293_v46 = vld [vmem:[#allocation65_spill] sm:$0xff] }
 0x1da   : > { %v2783_v11 = vpop.f32.mrf.mxu0  ;;  %v10738_v5 = vpop.f32.mrf.mxu1 }
 0x1db   : > { %v2808_v39 = vadd.f32 %v2783_v11, %v2624_v30  ;;  %v10741_v45 = vadd.f32 %v10541_v27, %v2809_v63  ;;  %v2980_v30 = vadd.f32 %v12293_v46, %v10653_v38 }
 0x1dc   : > { %v7821_v41 = vpop.f32.mrf.mxu0  ;;  %v10743_v3 = vpop.f32.mrf.mxu1 }
 0x1dd   : > { %v10748_v53 = vadd.f32 %v10550_v20, %v2808_v39  ;;  %v3161_v47 = vadd.f32 %v7821_v41, %v10624_v42 }
 0x1de   : > { %v3071_v43 = vpop.f32.mrf.mxu0  ;;  %v10751_v57 = vpop.f32.mrf.mxu1 }
 0x1df   : > { %v3160_v15 = vadd.f32 %v3071_v43, %v2976_v50  ;;  %v10754_v25 = vadd.f32 %v10555_v10, %v3161_v47  ;;  %v12295_v50 = vld [vmem:[#allocation66_spill] sm:$0xff] }
 0x1e0   : > { %v7824_v27 = vpop.f32.mrf.mxu0  ;;  %v10756_v18 = vpop.f32.mrf.mxu1  ;;  %v2982_v47 = vadd.f32 %v12295_v50, %v10670_v9 }
 0x1e1   : > { %v3163_v21 = vadd.f32 %v7824_v27, %v10640_v24  ;;  %v10762_v20 = vadd.f32 %v10565_v19, %v3160_v15 }
 0x1e2   : > { %v3081_v7 = vpop.f32.mrf.mxu0  ;;  %v10764_v42 = vpop.f32.mrf.mxu1 }
 0x1e3   : > { %v3162_v6 = vadd.f32 %v3081_v7, %v2978_v23  ;;  %v10767_v49 = vadd.f32 %v12292_v40, %v3163_v21  ;;  %v12296_v7 = vld [vmem:[#allocation69_spill] sm:$0xff] }
 0x1e4   : > { %v7827_v10 = vpop.f32.mrf.mxu0  ;;  %v10769_v52 = vpop.f32.mrf.mxu1 }
 0x1e5   : > { %v3165_v12 = vadd.f32 %v7827_v10, %v10656_v33  ;;  %v3346_v24 = vadd.f32 %v12294_v17, %v3162_v6  ;;  %v2984_v6 = vadd.f32 %v12296_v7, %v10689_v61 }
 0x1e6   : > { %v3091_v63 = vpop.f32.mrf.mxu0  ;;  %v10775_v19 = vpop.f32.mrf.mxu1 }
 0x1e7   : > { %v3164_v11 = vadd.f32 %v3091_v63, %v2980_v30  ;;  %v3349_v39 = vadd.f32 %v10587_v55, %v3165_v12  ;;  %v12297_v30 = vld [vmem:[#allocation70_spill] sm:$0xff] }
 0x1e8   : > { %v7830_v41 = vpop.f32.mrf.mxu0  ;;  %v10782_v38 = vpop.f32.mrf.mxu1  ;;  %v2986_v12 = vadd.f32 %v12297_v30, %v10702_v4 }
 0x1e9   : > { %v3167_v43 = vadd.f32 %v7830_v41, %v10673_v26  ;;  %v3348_v15 = vadd.f32 %v10596_v36, %v3164_v11 }
 0x1ea   : > { %v3101_v27 = vpop.f32.mrf.mxu0  ;;  %v10789_v9 = vpop.f32.mrf.mxu1 }
 0x1eb   : > { %v3166_v33 = vadd.f32 %v3101_v27, %v2982_v47  ;;  %v3351_v23 = vadd.f32 %v10603_v60, %v3167_v43 }
 0x1ec   : > { %v7833_v21 = vpop.f32.mrf.mxu0  ;;  %v10796_v61 = vpop.f32.mrf.mxu1 }
 0x1ed   : > { %v3169_v55 = vadd.f32 %v7833_v21, %v10692_v2  ;;  %v3350_v40 = vadd.f32 %v10612_v14, %v3166_v33 }
 0x1ee   : > { %v3111_v10 = vpop.f32.mrf.mxu0  ;;  %v10801_v47 = vpop.f32.mrf.mxu1 }
 0x1ef   : > { %v3168_v26 = vadd.f32 %v3111_v10, %v2984_v6  ;;  %v3353_v36 = vadd.f32 %v10619_v0, %v3169_v55 }
 0x1f0   : > { %v7836_v46 = vpop.f32.mrf.mxu0  ;;  %v10807_v21 = vpop.f32.mrf.mxu1 }
 0x1f1   : > { %v3171_v60 = vadd.f32 %v7836_v46, %v10705_v35  ;;  %v3352_v17 = vadd.f32 %v10628_v13, %v3168_v26 }
 0x1f2   : > { %v3121_v63 = vpop.f32.mrf.mxu0  ;;  %v10813_v55 = vpop.f32.mrf.mxu1 }
 0x1f3   : > { %v3170_v2 = vadd.f32 %v3121_v63, %v2986_v12  ;;  %v3355_v14 = vadd.f32 %v10635_v29, %v3171_v60 }
 0x1f4   : > { %v7839_v11 = vpop.f32.mrf.mxu0  ;;  %v10819_v46 = vpop.f32.mrf.mxu1 }
 0x1f5   : > { %v3173_v41 = vadd.f32 %v7839_v11, %v10715_v58  ;;  %v3354_v50 = vadd.f32 %v10644_v1, %v3170_v2 }
 0x1f6   : > { %v3131_v0 = vpop.f32.mrf.mxu0  ;;  %v10825_v60 = vpop.f32.mrf.mxu1 }
 0x1f7   : > { %v3172_v4 = vadd.f32 %v3131_v0, %v10723_v51  ;;  %v3357_v35 = vadd.f32 %v10651_v59, %v3173_v41 }
 0x1f8   : > { %v7842_v43 = vpop.f32.mrf.mxu0  ;;  %v10829_v41 = vpop.f32.mrf.mxu1 }
 0x1f9   : > { %v3175_v13 = vadd.f32 %v7842_v43, %v10728_v48  ;;  %v3356_v27 = vadd.f32 %v10660_v62, %v3172_v4 }
 0x1fa   : > { %v3141_v33 = vpop.f32.mrf.mxu0  ;;  %v10833_v43 = vpop.f32.mrf.mxu1 }
 0x1fb   : > { %v3174_v29 = vadd.f32 %v3141_v33, %v10736_v37  ;;  %v3359_v58 = vadd.f32 %v10668_v32, %v3175_v13 }
 0x1fc   : > { %v7845_v1 = vpop.f32.mrf.mxu0 }
 0x1fd   : > { %v3177_v7 = vadd.f32 %v7845_v1, %v10741_v45  ;;  %v3358_v6 = vadd.f32 %v10677_v8, %v3174_v29  ;;  %v10837_v29 = vpop.f32.mrf.mxu1 }
 0x1fe   : > { %v3151_v51 = vpop.f32.mrf.mxu0 }
 0x1ff   : > { %v3176_v59 = vadd.f32 %v3151_v51, %v10748_v53  ;;  %v3361_v48 = vadd.f32 %v10687_v31, %v3177_v7  ;;  %v10841_v51 = vpop.f32.mrf.mxu1 }
 0x200   : > { %v7887_v62 = vpop.f32.mrf.mxu0 }
 0x201   : > { %v3360_v10 = vadd.f32 %v10695_v34, %v3176_v59  ;;  %v3529_v26 = vadd.f32 %v7887_v62, %v10754_v25 }
 0x202   : > { %v3439_v37 = vpop.f32.mrf.mxu0 }
 0x203   : > { %v3528_v32 = vadd.f32 %v3439_v37, %v10762_v20  ;;  %v3713_v45 = vadd.f32 %v10700_v28, %v3529_v26  ;;  %v10845_v26 = vpop.f32.mrf.mxu1 }
 0x204   : > { %v7890_v8 = vpop.f32.mrf.mxu0 }
 0x205   : > { %v3531_v30 = vadd.f32 %v7890_v8, %v10767_v49  ;;  %v3712_v12 = vadd.f32 %v10707_v16, %v3528_v32  ;;  %v10849_v8 = vpop.f32.mrf.mxu1 }
 0x206   : > { %v3449_v53 = vpop.f32.mrf.mxu0 }
 0x207   : > { %v3530_v31 = vadd.f32 %v3449_v53, %v3346_v24  ;;  %v3715_v34 = vadd.f32 %v10712_v54, %v3531_v30 }
 0x208   : > { %v7893_v63 = vpop.f32.mrf.mxu0 }
 0x209   : > { %v3533_v25 = vadd.f32 %v7893_v63, %v3349_v39  ;;  %v3714_v2 = vadd.f32 %v10717_v22, %v3530_v31  ;;  %v10853_v31 = vpop.f32.mrf.mxu1 }
 0x20a   : > { %v3459_v11 = vpop.f32.mrf.mxu0 }
 0x20b   : > { %v3532_v20 = vadd.f32 %v3459_v11, %v3348_v15  ;;  %v3717_v28 = vadd.f32 %v10725_v44, %v3533_v25  ;;  %v10859_v11 = vpop.f32.mrf.mxu1 }
 0x20c   : > { %v7896_v0 = vpop.f32.mrf.mxu0 }
 0x20d   : > { %v3535_v49 = vadd.f32 %v7896_v0, %v3351_v23  ;;  %v3716_v16 = vadd.f32 %v10730_v56, %v3532_v20  ;;  %v10865_v20 = vpop.f32.mrf.mxu1 }
 0x20e   : > { %v3469_v4 = vpop.f32.mrf.mxu0 }
 0x20f   : > { %v3534_v24 = vadd.f32 %v3469_v4, %v3350_v40  ;;  %v3719_v54 = vadd.f32 %v10738_v5, %v3535_v49 }
 0x210   : > { %v7899_v13 = vpop.f32.mrf.mxu0 }
 0x211   : > { %v3537_v39 = vadd.f32 %v7899_v13, %v3353_v36  ;;  %v3718_v22 = vadd.f32 %v10743_v3, %v3534_v24 }
 0x212   : > { %v3479_v33 = vpop.f32.mrf.mxu0 }
 0x213   : > { %v3536_v15 = vadd.f32 %v3479_v33, %v3352_v17  ;;  %v3721_v44 = vadd.f32 %v10751_v57, %v3537_v39 }
 0x214   : > { %v7902_v1 = vpop.f32.mrf.mxu0 }
 0x215   : > { %v3539_v23 = vadd.f32 %v7902_v1, %v3355_v14  ;;  %v3720_v56 = vadd.f32 %v10756_v18, %v3536_v15 }
 0x216   : > { %v3489_v7 = vpop.f32.mrf.mxu0 }
 0x217   : > { %v3538_v40 = vadd.f32 %v3489_v7, %v3354_v50  ;;  %v3723_v5 = vadd.f32 %v10764_v42, %v3539_v23 }
 0x218   : > { %v7905_v59 = vpop.f32.mrf.mxu0 }
 0x219   : > { %v3541_v36 = vadd.f32 %v7905_v59, %v3357_v35  ;;  %v3722_v3 = vadd.f32 %v10769_v52, %v3538_v40 }
 0x21a   : > { %v3499_v62 = vpop.f32.mrf.mxu0 }
 0x21b   : > { %v3540_v17 = vadd.f32 %v3499_v62, %v3356_v27  ;;  %v3725_v57 = vadd.f32 %v10775_v19, %v3541_v36 }
 0x21c   : > { %v7908_v37 = vpop.f32.mrf.mxu0 }
 0x21d   : > { %v3543_v14 = vadd.f32 %v7908_v37, %v3359_v58  ;;  %v3724_v18 = vadd.f32 %v10782_v38, %v3540_v17 }
 0x21e   : > { %v3509_v32 = vpop.f32.mrf.mxu0 }
 0x21f   : > { %v3542_v50 = vadd.f32 %v3509_v32, %v3358_v6  ;;  %v3727_v42 = vadd.f32 %v10789_v9, %v3543_v14 }
 0x220   : > { %v7911_v30 = vpop.f32.mrf.mxu0 }
 0x221   : > { %v3545_v35 = vadd.f32 %v7911_v30, %v3361_v48  ;;  %v3726_v52 = vadd.f32 %v10796_v61, %v3542_v50 }
 0x222   : > { %v3519_v53 = vpop.f32.mrf.mxu0 }
 0x223   : > { %v3544_v27 = vadd.f32 %v3519_v53, %v3360_v10  ;;  %v3729_v19 = vadd.f32 %v10801_v47, %v3545_v35 }
 0x224   : > { %v7953_v63 = vpop.f32.mrf.mxu0 }
 0x225   : > { %v3728_v58 = vadd.f32 %v10807_v21, %v3544_v27  ;;  %v10857_v38 = vadd.f32 %v7953_v63, %v3713_v45  ;;  %v10871_v21 = vpop.f32.mrf.mxu1 }
 0x226   : > { %v3805_v25 = vpop.f32.mrf.mxu0 }
 0x227   : > { %v10861_v6 = vadd.f32 %v3805_v25, %v3712_v12  ;;  %v10877_v13 = vpop.f32.mrf.mxu1 }
 0x228   : > { %v7956_v9 = vpop.f32.mrf.mxu0 }
 0x229   : > { %v10863_v48 = vadd.f32 %v7956_v9, %v3715_v34  ;;  %v10883_v15 = vpop.f32.mrf.mxu1 }
 0x22a   : > { %v3815_v61 = vpop.f32.mrf.mxu0 }
 0x22b   : > { %v10867_v0 = vadd.f32 %v3815_v61, %v3714_v2  ;;  %v10889_v7 = vpop.f32.mrf.mxu1 }
 0x22c   : > { %v7959_v10 = vpop.f32.mrf.mxu0 }
 0x22d   : > { %v10869_v47 = vadd.f32 %v7959_v10, %v3717_v28  ;;  %v10895_v36 = vpop.f32.mrf.mxu1 }
 0x22e   : > { %v3825_v49 = vpop.f32.mrf.mxu0  ;;  %12298 = vst [vmem:[#allocation77_spill] sm:$0xff] %v10895_v36 }
 0x22f   : > { %v10873_v45 = vadd.f32 %v3825_v49, %v3716_v16  ;;  %v10901_v37 = vpop.f32.mrf.mxu1 }
 0x230   : > { %v7962_v4 = vpop.f32.mrf.mxu0  ;;  %12299 = vst [vmem:[#allocation80_spill] sm:$0xff] %v10901_v37 }
 0x231   : > { %v10875_v24 = vadd.f32 %v7962_v4, %v3719_v54  ;;  %v8052_v50 = vpop.f32.mrf.mxu1 }
 0x232   : > { %v3835_v12 = vpop.f32.mrf.mxu0 }
 0x233   : > { %v10879_v34 = vadd.f32 %v3835_v12, %v3718_v22  ;;  %v4358_v53 = vpop.f32.mrf.mxu1 }
 0x234   : > { %v7965_v39 = vpop.f32.mrf.mxu0 }
 0x235   : > { %v10881_v33 = vadd.f32 %v7965_v39, %v3721_v44  ;;  %v8055_v63 = vpop.f32.mrf.mxu1 }
 0x236   : > { %v3845_v2 = vpop.f32.mrf.mxu0 }
 0x237   : > { %v10885_v28 = vadd.f32 %v3845_v2, %v3720_v56  ;;  %v4368_v25 = vpop.f32.mrf.mxu1 }
 0x238   : > { %v7968_v1 = vpop.f32.mrf.mxu0 }
 0x239   : > { %v10887_v23 = vadd.f32 %v7968_v1, %v3723_v5  ;;  %v8058_v10 = vpop.f32.mrf.mxu1 }
 0x23a   : > { %v3855_v16 = vpop.f32.mrf.mxu0 }
 0x23b   : > { %v10891_v54 = vadd.f32 %v3855_v16, %v3722_v3  ;;  %v4378_v4 = vpop.f32.mrf.mxu1 }
 0x23c   : > { %v7971_v40 = vpop.f32.mrf.mxu0 }
 0x23d   : > { %v10893_v59 = vadd.f32 %v7971_v40, %v3725_v57 }
 0x23e   : > { %v3865_v22 = vpop.f32.mrf.mxu0 }
 0x23f   : > { %v10897_v44 = vadd.f32 %v3865_v22, %v3724_v18  ;;  %v4080_v22 = vadd.f32 %v10813_v55, %v10857_v38  ;;  %v4081_v55 = vadd.f32 %v10829_v41, %v10867_v0 }
 0x240   : > { %v7974_v62 = vpop.f32.mrf.mxu0 }
 0x241   : > { %v10899_v17 = vadd.f32 %v7974_v62, %v3727_v42 }
 0x242   : > { %v3875_v56 = vpop.f32.mrf.mxu0 }
 0x243   : > { %v10903_v5 = vadd.f32 %v3875_v56, %v3726_v52 }
 0x244   : > { %v7977_v14 = vpop.f32.mrf.mxu0 }
 0x245   : > { %v10905_v32 = vadd.f32 %v7977_v14, %v3729_v19  ;;  %v4079_v14 = vadd.f32 %v10819_v46, %v10861_v6  ;;  %v10944_v6 = vld [vmem:[%s11809_s2] ss:$0 sm:$0xff] }
 0x246   : > { %v3885_v3 = vpop.f32.mrf.mxu0 }
 0x247   : > { %12300 = vst [vmem:[#allocation81_spill] sm:$0xff] %v10905_v32  ;;  %v10907_v57 = vadd.f32 %v3885_v3, %v3728_v58  ;;  %v8061_v58 = vpop.f32.mrf.mxu1 }
 0x248   : > { %v8019_v30 = vpop.f32.mrf.mxu0 }
 0x249   : > { %12301 = vst [vmem:[#allocation84_spill] sm:$0xff] %v10907_v57  ;;  %v4388_v1 = vpop.f32.mrf.mxu1  ;;  %v4264_v3 = vadd.f32 %v8019_v30, %v4080_v22  ;;  %v4082_v57 = vadd.f32 %v10825_v60, %v10863_v48 }
 0x24a   : > { %v4174_v35 = vpop.f32.mrf.mxu0 }
 0x24b   : > { %v10923_v62 = vpop.f32.mrf.mxu1  ;;  %v4263_v36 = vadd.f32 %v4174_v35, %v4079_v14  ;;  %v4448_v38 = vadd.f32 %v8052_v50, %v4264_v3  ;;  %v4083_v35 = vadd.f32 %v10837_v29, %v10873_v45  ;;  %v4085_v45 = vadd.f32 %v10845_v26, %v10879_v34 }
 0x24c   : > { %v8022_v18 = vpop.f32.mrf.mxu0 }
 0x24d   : > { %v4266_v32 = vadd.f32 %v8022_v18, %v4082_v57  ;;  %v4447_v60 = vadd.f32 %v4358_v53, %v4263_v36 }
 0x24e   : > { %v4184_v27 = vpop.f32.mrf.mxu0 }
 0x24f   : > { %v4265_v48 = vadd.f32 %v4184_v27, %v4081_v55  ;;  %v4450_v0 = vadd.f32 %v8055_v63, %v4266_v32 }
 0x250   : > { %v8025_v42 = vpop.f32.mrf.mxu0 }
 0x251   : > { %v4449_v36 = vadd.f32 %v4368_v25, %v4265_v48  ;;  %v4088_v25 = vadd.f32 %v10849_v8, %v10881_v33 }
 0x252   : > { %v4194_v9 = vpop.f32.mrf.mxu0 }
 0x253   : > { %v4267_v57 = vadd.f32 %v4194_v9, %v4083_v35 }
 0x254   : > { %v8028_v61 = vpop.f32.mrf.mxu0 }
 0x255   : > { %v4451_v9 = vadd.f32 %v4378_v4, %v4267_v57 }
 0x256   : > { %v4204_v52 = vpop.f32.mrf.mxu0 }
 0x257   : > { %v4269_v55 = vadd.f32 %v4204_v52, %v4085_v45 }
 0x258   : > { %v8031_v49 = vpop.f32.mrf.mxu0 }
 0x259   : > { %v4453_v4 = vadd.f32 %v4388_v1, %v4269_v55 }
 0x25a   : > { %v10909_v19 = vpop.f32.mrf.mxu0 }
 0x25c   : > { %v10911_v12 = vpop.f32.mrf.mxu0 }
 0x25e   : > { %v10913_v39 = vpop.f32.mrf.mxu0 }
 0x260   : > { %v10915_v2 = vpop.f32.mrf.mxu0 }
 0x262   : > { %v10917_v16 = vpop.f32.mrf.mxu0 }
 0x263   : > { %12302 = vst [vmem:[#allocation85_spill] sm:$0xff] %v10917_v16  ;;  %v10933_v16 = vpop.f32.mrf.mxu1 }
 0x264   : > { %v10919_v40 = vpop.f32.mrf.mxu0 }
 0x265   : > { %12303 = vst [vmem:[#allocation87_spill] sm:$0xff] %v10919_v40  ;;  %v10948_v14 = vpop.f32.mrf.mxu1 }
 0x266   : > { %v10925_v56 = vpop.f32.mrf.mxu0 }
 0x267   : > { %12304 = vst [vmem:[#allocation88_spill] sm:$0xff] %v10925_v56  ;;  %v4084_v56 = vadd.f32 %v10833_v43, %v10869_v47  ;;  %v4086_v47 = vadd.f32 %v10841_v51, %v10875_v24 }
 0x268   : > { %v10929_v37 = vpop.f32.mrf.mxu0 }
 0x269   : > { %v4268_v22 = vadd.f32 %v8025_v42, %v4084_v56  ;;  %v4270_v63 = vadd.f32 %v8028_v61, %v4086_v47  ;;  %v4408_v42 = vpop.f32.mrf.mxu1 }
 0x26a   : > { %v10935_v40 = vpop.f32.mrf.mxu0 }
 0x26b   : > { %v4452_v32 = vadd.f32 %v8058_v10, %v4268_v22  ;;  %v4087_v10 = vadd.f32 %v10853_v31, %v10885_v28  ;;  %v8070_v48 = vpop.f32.mrf.mxu1 }
 0x26c   : > { %v8085_v46 = vpop.f32.mrf.mxu0 }
 0x26d   : > { %v4632_v30 = vadd.f32 %v8085_v46, %v4448_v38  ;;  %v4454_v46 = vadd.f32 %v8061_v58, %v4270_v63  ;;  %v4271_v35 = vadd.f32 %v10909_v19, %v4087_v10  ;;  %v4089_v58 = vadd.f32 %v10865_v20, %v10891_v54 }
 0x26e   : > { %v4542_v41 = vpop.f32.mrf.mxu0 }
 0x26f   : > { %v10951_v50 = vadd.f32 %v10944_v6, %v4632_v30  ;;  %v4631_v43 = vadd.f32 %v4542_v41, %v4447_v60  ;;  %v4272_v60 = vadd.f32 %v8031_v49, %v4088_v25  ;;  %v4090_v49 = vadd.f32 %v10859_v11, %v10887_v23 }
 0x270   : > { %v8088_v18 = vpop.f32.mrf.mxu0  ;;  %v4455_v11 = vadd.f32 %v10933_v16, %v4271_v35  ;;  %v4273_v20 = vadd.f32 %v10913_v39, %v4089_v58 }
 0x271   : > { %v6872_v53 = vmul.f32 -1.442695, %v10951_v50  ;;  %v10957_v27 = vadd.f32 %v10944_v6, %v4631_v43  ;;  %v4634_v29 = vadd.f32 %v8088_v18, %v4450_v0  ;;  %v4456_v0 = vadd.f32 %v10923_v62, %v4272_v60  ;;  %v4418_v43 = vpop.f32.mrf.mxu1 }
 0x272   : > { %v4552_v56 = vpop.f32.mrf.mxu0  ;;  %v4092_v18 = vadd.f32 %v10871_v21, %v10893_v59  ;;  %v4094_v21 = vadd.f32 %v10883_v15, %v10899_v17  ;;  %v4093_v59 = vadd.f32 %v10889_v7, %v10903_v5  ;;  %v4457_v17 = vadd.f32 %v4408_v42, %v4273_v20 }
 0x273   : > { %8352 = vpow2.f32 %v6872_v53  ;;  %v6871_v3 = vmul.f32 -1.442695, %v10957_v27  ;;  %v10963_v51 = vadd.f32 %v10944_v6, %v4634_v29  ;;  %v4633_v24 = vadd.f32 %v4552_v56, %v4449_v36  ;;  %v8073_v39 = vpop.f32.mrf.mxu1 }
 0x274   : > { %v8091_v38 = vpop.f32.mrf.mxu0  ;;  %v4274_v36 = vadd.f32 %v10911_v12, %v4090_v49  ;;  %v4091_v29 = vadd.f32 %v10877_v13, %v10897_v44  ;;  %v4276_v12 = vadd.f32 %v10915_v2, %v4092_v18  ;;  %v12306_v13 = vld [vmem:[#allocation77_spill] sm:$0xff] }
 0x275   : > { %8354 = vpow2.f32 %v6871_v3  ;;  %v6874_v26 = vmul.f32 -1.442695, %v10963_v51  ;;  %v10969_v34 = vadd.f32 %v10944_v6, %v4633_v24  ;;  %v4636_v61 = vadd.f32 %v8091_v38, %v4452_v32  ;;  %v12305_v3 = vld [vmem:[#allocation81_spill] sm:$0xff]  ;;  %v12308_v38 = vld [vmem:[#allocation84_spill] sm:$0xff] }
 0x276   : > { %v4562_v30 = vpop.f32.mrf.mxu0  ;;  %v4096_v44 = vadd.f32 %v12306_v13, %v12305_v3  ;;  %v4458_v15 = vadd.f32 %v10948_v14, %v4274_v36  ;;  %v12307_v24 = vld [vmem:[#allocation85_spill] sm:$0xff]  ;;  %v4460_v10 = vadd.f32 %v8070_v48, %v4276_v12 }
 0x277   : > { %8356 = vpow2.f32 %v6874_v26  ;;  %v6873_v8 = vmul.f32 -1.442695, %v10969_v34  ;;  %v10975_v33 = vadd.f32 %v10944_v6, %v4636_v61  ;;  %v4635_v52 = vadd.f32 %v4562_v30, %v4451_v9  ;;  %v12309_v26 = vld [vmem:[#allocation80_spill] sm:$0xff]  ;;  %v4428_v30 = vpop.f32.mrf.mxu1 }
 0x278   : > { %v8094_v22 = vpop.f32.mrf.mxu0  ;;  %v4275_v7 = vadd.f32 %v12307_v24, %v4091_v29  ;;  %v4095_v61 = vadd.f32 %v12309_v26, %v12308_v38  ;;  %v4280_v18 = vadd.f32 %v10929_v37, %v4096_v44 }
 0x279   : > { %8358 = vpow2.f32 %v6873_v8  ;;  %v6876_v41 = vmul.f32 -1.442695, %v10975_v33  ;;  %v10980_v31 = vadd.f32 %v10944_v6, %v4635_v52  ;;  %v4638_v28 = vadd.f32 %v8094_v22, %v4454_v46  ;;  %v12310_v46 = vld [vmem:[#allocation87_spill] sm:$0xff]  ;;  %v8076_v36 = vpop.f32.mrf.mxu1 }
 0x27a   : > { %v4572_v1 = vpop.f32.mrf.mxu0  ;;  %v4278_v60 = vadd.f32 %v12310_v46, %v4094_v21  ;;  %v4459_v22 = vadd.f32 %v4418_v43, %v4275_v7  ;;  %v4279_v21 = vadd.f32 %v10935_v40, %v4095_v61 }
 0x27b   : > { %8360 = vpow2.f32 %v6876_v41  ;;  %v6875_v19 = vmul.f32 -1.442695, %v10980_v31  ;;  %v10989_v47 = vadd.f32 %v10944_v6, %v4638_v28  ;;  %v4637_v57 = vadd.f32 %v4572_v1, %v4453_v4  ;;  %v12311_v41 = vld [vmem:[#allocation88_spill] sm:$0xff] }
 0x27c   : > { %v8097_v23 = vpop.f32.mrf.mxu0  ;;  %v4277_v28 = vadd.f32 %v12311_v41, %v4093_v59 }
 0x27d   : > { %8362 = vpow2.f32 %v6875_v19  ;;  %v6878_v54 = vmul.f32 -1.442695, %v10989_v47  ;;  %v10998_v62 = vadd.f32 %v10944_v6, %v4637_v57  ;;  %v4640_v53 = vadd.f32 %v8097_v23, %v4456_v0 }
 0x27e   : > { %v4582_v16 = vpop.f32.mrf.mxu0  ;;  %v4462_v57 = vadd.f32 %v8073_v39, %v4278_v60  ;;  %v4461_v29 = vadd.f32 %v4428_v30, %v4277_v28 }
 0x27f   : > { %8364 = vpow2.f32 %v6878_v54  ;;  %v6877_v45 = vmul.f32 -1.442695, %v10998_v62  ;;  %v11009_v32 = vadd.f32 %v10944_v6, %v4640_v53  ;;  %v4639_v63 = vadd.f32 %v4582_v16, %v4455_v11 }
 0x280   : > { %v8353_v56 = vpop.eup %8352  ;;  %v8100_v5 = vpop.f32.mrf.mxu0 }
 0x281   : > { %v4802_v2 = vadd.f32 1.0, %v8353_v56  ;;  %8366 = vpow2.f32 %v6877_v45  ;;  %v6880_v25 = vmul.f32 -1.442695, %v11009_v32  ;;  %v11017_v9 = vadd.f32 %v10944_v6, %v4639_v63  ;;  %v4438_v63 = vpop.f32.mrf.mxu1 }
 0x282   : > { %v8355_v55 = vpop.eup %8354  ;;  %v4642_v14 = vadd.f32 %v8100_v5, %v4458_v15  ;;  %v4592_v42 = vpop.f32.mrf.mxu0  ;;  %v4463_v5 = vadd.f32 %v4438_v63, %v4279_v21 }
 0x283   : > { %8368 = vrcp.f32 %v4802_v2  ;;  %v4801_v8 = vadd.f32 1.0, %v8355_v55  ;;  %v6879_v52 = vmul.f32 -1.442695, %v11017_v9  ;;  %v4641_v4 = vadd.f32 %v4592_v42, %v4457_v17 }
 0x284   : > { %v8357_v35 = vpop.eup %8356  ;;  %8370 = vpow2.f32 %v6880_v25  ;;  %v11025_v49 = vadd.f32 %v10944_v6, %v4642_v14  ;;  %v8103_v58 = vpop.f32.mrf.mxu0  ;;  %v4464_v17 = vadd.f32 %v8076_v36, %v4280_v18  ;;  %v8533_v55 = vmov 0.0  }
 0x285   : > { %8372 = vrcp.f32 %v4801_v8  ;;  %v4804_v48 = vadd.f32 1.0, %v8357_v35  ;;  %v11028_v0 = vadd.f32 %v10944_v6, %v4641_v4  ;;  %v4644_v1 = vadd.f32 %v8103_v58, %v4460_v10  ;;  %4964 = vst.msk [vmem:[#allocation2] sm:$0xff] %vm4963_vm8, %v8533_v55  ;;  %6039 = vmatprep.subr.mxu1 %v8533_v55 }
 0x286   : > { %v8359_v19 = vpop.eup %8358  ;;  %8374 = vpow2.f32 %v6879_v52  ;;  %v6882_v43 = vmul.f32 -1.442695, %v11025_v49  ;;  %v4602_v11 = vpop.f32.mrf.mxu0 }
 0x287   : > { %8376 = vrcp.f32 %v4804_v48  ;;  %v4803_v20 = vadd.f32 1.0, %v8359_v19  ;;  %v6881_v23 = vmul.f32 -1.442695, %v11028_v0  ;;  %v11034_v54 = vadd.f32 %v10944_v6, %v4644_v1 }
 0x288   : > { %v8361_v53 = vpop.eup %8360  ;;  %8378 = vpow2.f32 %v6882_v43  ;;  %v4643_v59 = vadd.f32 %v4602_v11, %v4459_v22  ;;  %v8106_v12 = vpop.f32.mrf.mxu0 }
 0x289   : > { %8380 = vrcp.f32 %v4803_v20  ;;  %v4806_v37 = vadd.f32 1.0, %v8361_v53  ;;  %v6884_v39 = vmul.f32 -1.442695, %v11034_v54  ;;  %v4646_v16 = vadd.f32 %v8106_v12, %v4462_v57 }
 0x28a   : > { %v8363_v45 = vpop.eup %8362  ;;  %8382 = vpow2.f32 %v6881_v23  ;;  %v11039_v56 = vadd.f32 %v10944_v6, %v4643_v59  ;;  %v4612_v3 = vpop.f32.mrf.mxu0 }
 0x28b   : > { %8384 = vrcp.f32 %v4806_v37  ;;  %v4805_v13 = vadd.f32 1.0, %v8363_v45  ;;  %v11042_v40 = vadd.f32 %v10944_v6, %v4646_v16  ;;  %v4645_v44 = vadd.f32 %v4612_v3, %v4461_v29 }
 0x28c   : > { %v8365_v15 = vpop.eup %8364  ;;  %8386 = vpow2.f32 %v6884_v39  ;;  %v6883_v24 = vmul.f32 -1.442695, %v11039_v56  ;;  %v8109_v7 = vpop.f32.mrf.mxu0 }
 0x28d   : > { %8388 = vrcp.f32 %v4805_v13  ;;  %v6886_v2 = vmul.f32 -1.442695, %v11042_v40  ;;  %v11047_v25 = vadd.f32 %v10944_v6, %v4645_v44  ;;  %v4648_v26 = vadd.f32 %v8109_v7, %v4464_v17 }
 0x28e   : > { %v8367_v38 = vpop.eup %8366  ;;  %8390 = vpow2.f32 %v6883_v24  ;;  %v4622_v61 = vpop.f32.mrf.mxu0  ;;  %v4808_v10 = vadd.f32 1.0, %v8365_v15 }
 0x28f   : > { %v4807_v46 = vadd.f32 1.0, %v8367_v38  ;;  %v6885_v60 = vmul.f32 -1.442695, %v11047_v25  ;;  %v4647_v30 = vadd.f32 %v4622_v61, %v4463_v5  ;;  %8392 = vpow2.f32 %v6886_v2  ;;  %v5964_v61 = vld [vmem:[%s11810_s3 + $0x78] sm:$0xff] }
 0x290   : > { %v8369_v14 = vpop.eup %8368  ;;  %v11054_v42 = vadd.f32 %v10944_v6, %v4648_v26  ;;  %6040 = vmatpush1.msra.mxu1 %v5964_v61 }
 0x291   : > { %v8371_v8 = vpop.eup %8370  ;;  %8394 = vrcp.f32 %v4807_v46  ;;  %v11057_v52 = vadd.f32 %v10944_v6, %v4647_v30  ;;  %4875 = vrot.lane.b32.xlu0 %v8369_v14, %s8534_s9  ;;  %6041 = vmatprep.subr.mxu1 %v8533_v55  ;;  %v5962_v46 = vld [vmem:[%s11810_s3 + $0x68] sm:$0xff]  ;;  %v5960_v30 = vld [vmem:[%s11810_s3 + $0x58] sm:$0xff]  ;;  %v5959_v14 = vld [vmem:[%s11810_s3 + $0x50] sm:$0xff] }
 0x292   : > { %v8373_v4 = vpop.eup %8372  ;;  %v4810_v35 = vadd.f32 1.0, %v8371_v8  ;;  %8396 = vpow2.f32 %v6885_v60  ;;  %v6888_v22 = vmul.f32 -1.442695, %v11054_v42  ;;  %v5961_v60 = vld [vmem:[%s11810_s3 + $0x60] sm:$0xff]  ;;  %v5958_v8 = vld [vmem:[%s11810_s3 + $0x48] sm:$0xff] }
 0x293   : > { %v8375_v41 = vpop.eup %8374  ;;  %8398 = vrcp.f32 %v4808_v10  ;;  %v6887_v28 = vmul.f32 -1.442695, %v11057_v52  ;;  %v5963_v10 = vld [vmem:[%s11810_s3 + $0x70] sm:$0xff] }
 0x294   : > { %v8377_v58 = vpop.eup %8376  ;;  %8400 = vrcp.f32 %v4810_v35  ;;  %v4809_v48 = vadd.f32 1.0, %v8375_v41  ;;  %6042 = vmatpush1.msra.mxu1 %v5963_v10  ;;  %v5956_v35 = vld [vmem:[%s11810_s3 + $0x38] sm:$0xff]  ;;  %v5954_v41 = vld [vmem:[%s11810_s3 + $0x28] sm:$0xff] }
 0x295   : > { %v8379_v1 = vpop.eup %8378  ;;  %8402 = vpow2.f32 %v6888_v22  ;;  %4879 = vrot.lane.b32.xlu1 %v8377_v58, %s8534_s9  ;;  %4873 = vrot.lane.b32.xlu0 %v8373_v4, %s8534_s9  ;;  %v5957_v4 = vld [vmem:[%s11810_s3 + $0x40] sm:$0xff]  ;;  %v5955_v22 = vld [vmem:[%s11810_s3 + $0x30] sm:$0xff] }
 0x296   : > { %v8381_v6 = vpop.eup %8380  ;;  %8404 = vrcp.f32 %v4809_v48  ;;  %v4812_v57 = vadd.f32 1.0, %v8379_v1  ;;  %6043 = vmatprep.subr.mxu1 %v8533_v55  ;;  %v5952_v58 = vld [vmem:[%s11810_s3 + $0x18] sm:$0xff]  ;;  %v5951_v48 = vld [vmem:[%s11810_s3 + $0x10] sm:$0xff]  ;;  %v5950_v1 = vld [vmem:[%s11810_s3 + $0x8] sm:$0xff] }
 0x297   : > { %v8383_v19 = vpop.eup %8382  ;;  %8406 = vpow2.f32 %v6887_v28  ;;  %6044 = vmatpush1.msra.mxu1 %v5962_v46  ;;  %v5953_v28 = vld [vmem:[%s11810_s3 + $0x20] sm:$0xff] }
 0x298   : > { %v8385_v18 = vpop.eup %8384  ;;  %v4811_v36 = vadd.f32 1.0, %v8383_v19  ;;  %6045 = vmatprep.subr.mxu1 %v8533_v55  ;;  %v5976_v19 = vld [vmem:[%s11810_s3 + $0xd8] sm:$0xf] }
 0x299   : > { %v8387_v43 = vpop.eup %8386  ;;  %4877 = vrot.lane.b32.xlu1 %v8381_v6, %s8534_s9  ;;  %6046 = vmatpush1.msra.mxu1 %v5961_v60  ;;  %v5949_v6 = vld [vmem:[%s11810_s3] sm:$0xff] }
 0x29a   : > { %v8389_v11 = vpop.eup %8388  ;;  %8408 = vrcp.f32 %v4811_v36  ;;  %v4814_v23 = vadd.f32 1.0, %v8387_v43  ;;  %6047 = vmatprep.subr.mxu1 %v8533_v55  ;;  %v5975_v36 = vld [vmem:[%s11810_s3 + $0xd0] sm:$0xff] }
 0x29b   : > { %v8391_v20 = vpop.eup %8390  ;;  %8410 = vrcp.f32 %v4812_v57  ;;  %4881 = vrot.lane.b32.xlu0 %v8389_v11, %s8534_s9  ;;  %6048 = vmatpush1.msra.mxu1 %v5960_v30 }
 0x29c   : > { %v4813_v53 = vadd.f32 1.0, %v8391_v20  ;;  %v8393_v29 = vpop.eup %8392  ;;  %6049 = vmatprep.subr.mxu1 %v8533_v55 }
 0x29d   : > { %4883 = vrot.lane.b32.xlu1 %v8385_v18, %s8534_s9  ;;  %v4816_v12 = vadd.f32 1.0, %v8393_v29  ;;  %6050 = vmatpush1.msra.mxu1 %v5959_v14 }
 0x29e   : > { %v8395_v21 = vpop.eup %8394  ;;  %8412 = vrcp.f32 %v4813_v53  ;;  %6051 = vmatprep.subr.mxu1 %v8533_v55  ;;  %v5973_v53 = vld [vmem:[%s11810_s3 + $0xc0] sm:$0xff] }
 0x29f   : > { %v8397_v59 = vpop.eup %8396  ;;  %8414 = vrcp.f32 %v4814_v23  ;;  %4885 = vrot.lane.b32.xlu0 %v8395_v21, %s8534_s9  ;;  %6052 = vmatpush1.msra.mxu1 %v5958_v8 }
 0x2a0   : > { %v8399_v37 = vpop.eup %8398  ;;  %v4815_v39 = vadd.f32 1.0, %v8397_v59  ;;  %6053 = vmatprep.subr.mxu1 %v8533_v55 }
 0x2a1   : > { %v8401_v16 = vpop.eup %8400  ;;  %4887 = vrot.lane.b32.xlu1 %v8399_v37, %s8534_s9  ;;  %6054 = vmatpush1.msra.mxu1 %v5957_v4 }
 0x2a2   : > { %v8403_v45 = vpop.eup %8402  ;;  %8416 = vrcp.f32 %v4815_v39  ;;  %6055 = vmatprep.subr.mxu1 %v8533_v55 }
 0x2a3   : > { %v8405_v63 = vpop.eup %8404  ;;  %8418 = vrcp.f32 %v4816_v12  ;;  %v4818_v3 = vadd.f32 1.0, %v8403_v45  ;;  %6056 = vmatpush1.msra.mxu1 %v5956_v35  ;;  %v5971_v12 = vld [vmem:[%s11810_s3 + $0xb0] sm:$0xff] }
 0x2a4   : > { %v8407_v13 = vpop.eup %8406  ;;  %4889 = vrot.lane.b32.xlu0 %v8405_v63, %s8534_s9  ;;  %6057 = vmatprep.subr.mxu1 %v8533_v55 }
 0x2a5   : > { %v4817_v44 = vadd.f32 1.0, %v8407_v13  ;;  %4891 = vrot.lane.b32.xlu1 %v8401_v16, %s8534_s9  ;;  %8420 = vrcp.f32 %v4818_v3  ;;  %6058 = vmatpush1.msra.mxu1 %v5955_v22 }
 0x2a6   : > { %6059 = vmatprep.subr.mxu1 %v8533_v55 }
 0x2a7   : > { %v8409_v15 = vpop.eup %8408  ;;  %8422 = vrcp.f32 %v4817_v44  ;;  %6060 = vmatpush1.msra.mxu1 %v5954_v41 }
 0x2a8   : > { %v8411_v17 = vpop.eup %8410  ;;  %4893 = vrot.lane.b32.xlu0 %v8409_v15, %s8534_s9  ;;  %6061 = vmatprep.subr.mxu1 %v8533_v55 }
 0x2a9   : > { %4895 = vrot.lane.b32.xlu1 %v8411_v17, %s8534_s9  ;;  %6062 = vmatpush1.msra.mxu1 %v5953_v28 }
 0x2aa   : > { %6063 = vmatprep.subr.mxu1 %v8533_v55 }
 0x2ab   : > { %v8413_v24 = vpop.eup %8412  ;;  %6064 = vmatpush1.msra.mxu1 %v5952_v58 }
 0x2ac   : > { %v8415_v7 = vpop.eup %8414  ;;  %4897 = vrot.lane.b32.xlu0 %v8413_v24, %s8534_s9  ;;  %6065 = vmatprep.subr.mxu1 %v8533_v55 }
 0x2ad   : > { %4899 = vrot.lane.b32.xlu1 %v8415_v7, %s8534_s9  ;;  %6066 = vmatpush1.msra.mxu1 %v5951_v48 }
 0x2ae   : > { %6067 = vmatprep.subr.mxu1 %v8533_v55 }
 0x2af   : > { %v8417_v5 = vpop.eup %8416  ;;  %6068 = vmatpush1.msra.mxu1 %v5950_v1 }
 0x2b0   : > { %v8419_v2 = vpop.eup %8418  ;;  %4901 = vrot.lane.b32.xlu0 %v8417_v5, %s8534_s9  ;;  %6069 = vmatprep.subr.mxu1 %v8533_v55 }
 0x2b1   : > { %4903 = vrot.lane.b32.xlu1 %v8419_v2, %s8534_s9  ;;  %6070 = vmatpush1.msra.mxu1 %v5949_v6 }
 0x2b2   : > { %v8421_v38 = vpop.eup %8420  ;;  %6079 = vmatprep.subr.mxu1 %v8533_v55 }
 0x2b3   : > { %6890 = vmatpush2.msk.msra.mxu1 %vm1247_vm6, %v5976_v19 }
 0x2b4   : > { %v8423_v26 = vpop.eup %8422  ;;  %6081 = vmatprep.subr.mxu1 %v8533_v55 }
 0x2b5   : > { %4905 = vrot.lane.b32.xlu0 %v8423_v26, %s8534_s9  ;;  %4907 = vrot.lane.b32.xlu1 %v8421_v38, %s8534_s9  ;;  %s8536_s9 = smov 20   ;;  %v4674_v26 = vlaneseq }
 0x2b6   : > { %6082 = vmatpush2.msra.mxu1 %v5975_v36 }
 0x2b7   : > { %6083 = vmatprep.subr.mxu1 %v8533_v55  ;;  %v4675_v8 = vshrl.u32 %v4674_v26, 7 }
 0x2b9   : > { %v4691_v28 = vadd.s32 128, %v4675_v8 }
 0x2bb   : > { %vm4709_vm9 = vcmp.lt.s32.totalorder %v4691_v28, 132 }
 0x2bc   : > { %v6870_v19 = vsel %vm4709_vm9, 1.0, %v8533_v55 }
 0x303   : > { %v4876_v57 = vpop.permute.xlu0 %4875 }
 0x304   : > { %v4928_v18 = vmul.f32 %v4876_v57, %v10951_v50  ;;  %v5974_v50 = vld [vmem:[%s11810_s3 + $0xc8] sm:$0xff] }
 0x305   : > { %6084 = vmatpush2.msra.mxu1 %v5974_v50 }
 0x306   : > { %4966 = vst.msk [vmem:[#allocation2 + $0x10] sm:$0xff] %vm4963_vm8, %v4928_v18  ;;  %6085 = vmatprep.subr.mxu1 %v8533_v55 }
 0x307   : > { %v4880_v43 = vpop.permute.xlu1 %4879  ;;  %v4874_v11 = vpop.permute.xlu0 %4873  ;;  %6086 = vmatpush2.msra.mxu1 %v5973_v53  ;;  %v5967_v53 = vld [vmem:[%s11810_s3 + $0x90] sm:$0xff] }
 0x308   : > { %v4930_v20 = vmul.f32 %v4880_v43, %v10963_v51  ;;  %v4927_v23 = vmul.f32 %v4874_v11, %v10957_v27  ;;  %v5972_v27 = vld [vmem:[%s11810_s3 + $0xb8] sm:$0xff]  ;;  %6087 = vmatprep.subr.mxu1 %v8533_v55 }
 0x309   : > { %6088 = vmatpush2.msra.mxu1 %v5972_v27  ;;  %v5966_v27 = vld [vmem:[%s11810_s3 + $0x88] sm:$0xff] }
 0x30a   : > { %4968 = vst.msk [vmem:[#allocation2 + $0x20] sm:$0xff] %vm4963_vm8, %v4930_v20  ;;  %4965 = vst.msk [vmem:[#allocation2 + $0x8] sm:$0xff] %vm4963_vm8, %v4927_v23  ;;  %6089 = vmatprep.subr.mxu1 %v8533_v55  ;;  %v5969_v20 = vld [vmem:[%s11810_s3 + $0xa0] sm:$0xff]  ;;  %v5968_v23 = vld [vmem:[%s11810_s3 + $0x98] sm:$0xff] }
 0x30b   : > { %v4878_v29 = vpop.permute.xlu1 %4877  ;;  %6090 = vmatpush2.msra.mxu1 %v5971_v12  ;;  %v5965_v12 = vld [vmem:[%s11810_s3 + $0x80] sm:$0xff] }
 0x30c   : > { %v4929_v21 = vmul.f32 %v4878_v29, %v10969_v34  ;;  %6091 = vmatprep.subr.mxu1 %v8533_v55 }
 0x30d   : > { %v4882_v51 = vpop.permute.xlu0 %4881  ;;  %v5069_v48 = vld [vmem:[#allocation2 + $0x10] sm:$0xff] }
 0x30e   : > { %4967 = vst.msk [vmem:[#allocation2 + $0x18] sm:$0xff] %vm4963_vm8, %v4929_v21  ;;  %v4931_v59 = vmul.f32 %v4882_v51, %v10980_v31 }
 0x30f   : > { %v4884_v37 = vpop.permute.xlu1 %4883 }
 0x310   : > { %4969 = vst.msk [vmem:[#allocation2 + $0x28] sm:$0xff] %vm4963_vm8, %v4931_v59  ;;  %v4932_v34 = vmul.f32 %v4884_v37, %v10975_v33 }
 0x311   : > { %v4886_v39 = vpop.permute.xlu0 %4885  ;;  %v5017_v16 = vld [vmem:[#allocation2 + $0x5] sm:$0xff]  ;;  %v11178_v45 = vld [vmem:[#allocation2 + $0xd] sm:$0xff] }
 0x312   : > { %v5000_v63 = vld [vmem:[#allocation2 + $0x4] sm:$0xff]  ;;  %4970 = vst.msk [vmem:[#allocation2 + $0x30] sm:$0xff] %vm4963_vm8, %v4932_v34  ;;  %v4933_v31 = vmul.f32 %v4886_v39, %v10998_v62  ;;  %v8157_v3 = vpack.i.bf16 %v11178_v45, %v5017_v16  ;;  %v5001_v13 = vld [vmem:[#allocation2 + $0xc] sm:$0xff] }
 0x313   : > { %v4888_v44 = vpop.permute.xlu1 %4887  ;;  %v8152_v15 = vpack.i.bf16 %v5001_v13, %v5000_v63  ;;  %v5102_v7 = vld [vmem:[#allocation2 + $0xa] sm:$0xff] }
 0x314   : > { %4971 = vst.msk [vmem:[#allocation2 + $0x38] sm:$0xff] %vm4963_vm8, %v4933_v31  ;;  %v4934_v33 = vmul.f32 %v4888_v44, %v10989_v47  ;;  %8158 = vrot.lane.b32.xlu1 %v8157_v3, %s8535_s8  ;;  %v5085_v2 = vld [vmem:[#allocation2 + $0x9] sm:$0xff] }
 0x315   : > { %8153 = vrot.lane.b32.xlu0 %v8152_v15, %s8536_s9  ;;  %v5034_v47 = vld [vmem:[#allocation2 + $0x6] sm:$0xff]  ;;  %v5035_v38 = vld [vmem:[#allocation2 + $0xe] sm:$0xff]  ;;  %v5003_v21 = vld [vmem:[#allocation2 + $0x1c] sm:$0xff] }
 0x316   : > { %4972 = vst.msk [vmem:[#allocation2 + $0x40] sm:$0xff] %vm4963_vm8, %v4934_v33  ;;  %v4890_v62 = vpop.permute.xlu0 %4889  ;;  %v8162_v46 = vpack.i.bf16 %v5035_v38, %v5034_v47  ;;  %v5051_v30 = vld [vmem:[#allocation2 + $0x7] sm:$0xff]  ;;  %v5052_v14 = vld [vmem:[#allocation2 + $0xf] sm:$0xff]  ;;  %v5020_v37 = vld [vmem:[#allocation2 + $0x1d] sm:$0xff] }
 0x317   : > { %v4935_v17 = vmul.f32 %v4890_v62, %v11017_v9  ;;  %v4892_v24 = vpop.permute.xlu1 %4891  ;;  %v8167_v22 = vpack.i.bf16 %v5052_v14, %v5051_v30  ;;  %v5068_v41 = vld [vmem:[#allocation2 + $0x8] sm:$0xff]  ;;  %v5103_v18 = vld [vmem:[#allocation2 + $0x12] sm:$0xff]  ;;  %v5054_v3 = vld [vmem:[#allocation2 + $0x1f] sm:$0xff] }
 0x318   : > { %v4936_v5 = vmul.f32 %v4892_v24, %v11009_v32  ;;  %5547 = vrot.lane.b32.xlu1 %v5102_v7, %s8537_s10  ;;  %v11196_v32 = vld [vmem:[#allocation2 + $0xb] sm:$0xff]  ;;  %v8172_v6 = vpack.i.bf16 %v5069_v48, %v5068_v41  ;;  %v11238_v29 = vld [vmem:[#allocation2 + $0x13] sm:$0xff]  ;;  %v5071_v33 = vld [vmem:[#allocation2 + $0x20] sm:$0xff] }
 0x319   : > { %4973 = vst.msk [vmem:[#allocation2 + $0x48] sm:$0xff] %vm4963_vm8, %v4935_v17  ;;  %5479 = vrot.lane.b32.xlu0 %v5085_v2, %s8538_s11  ;;  %v5086_v11 = vld [vmem:[#allocation2 + $0x11] sm:$0xff]  ;;  %v5087_v39 = vld [vmem:[#allocation2 + $0x19] sm:$0xff]  ;;  %v5088_v17 = vld [vmem:[#allocation2 + $0x21] sm:$0xff] }
 0x31a   : > { %4974 = vst.msk [vmem:[#allocation2 + $0x50] sm:$0xff] %vm4963_vm8, %v4936_v5  ;;  %v4894_v61 = vpop.permute.xlu0 %4893  ;;  %v5019_v59 = vld [vmem:[#allocation2 + $0x15] sm:$0xff]  ;;  %v11267_v24 = vld [vmem:[#allocation2 + $0x23] sm:$0xff]  ;;  %v5005_v7 = vld [vmem:[#allocation2 + $0x2c] sm:$0xff] }
 0x31b   : > { %v4937_v9 = vmul.f32 %v4894_v61, %v11028_v0  ;;  %v4896_v10 = vpop.permute.xlu1 %4895  ;;  %v8182_v34 = vpack.i.bf16 %v5020_v37, %v5019_v59  ;;  %v5036_v16 = vld [vmem:[#allocation2 + $0x16] sm:$0xff]  ;;  %v5105_v5 = vld [vmem:[#allocation2 + $0x22] sm:$0xff]  ;;  %v5022_v38 = vld [vmem:[#allocation2 + $0x2d] sm:$0xff] }
 0x31c   : > { %v4938_v60 = vmul.f32 %v4896_v10, %v11025_v49  ;;  %5615 = vrot.lane.b32.xlu1 %v11196_v32, %s8539_s12  ;;  %v5053_v31 = vld [vmem:[#allocation2 + $0x17] sm:$0xff]  ;;  %v5004_v2 = vld [vmem:[#allocation2 + $0x24] sm:$0xff]  ;;  %v5056_v8 = vld [vmem:[#allocation2 + $0x2f] sm:$0xff] }
 0x31d   : > { %4975 = vst.msk [vmem:[#allocation2 + $0x58] sm:$0xff] %vm4963_vm8, %v4937_v9  ;;  %8163 = vrot.lane.b32.xlu0 %v8162_v46, %s8540_s13  ;;  %v8192_v44 = vpack.i.bf16 %v5054_v3, %v5053_v31  ;;  %v5070_v15 = vld [vmem:[#allocation2 + $0x18] sm:$0xff]  ;;  %v8202_v47 = vpack.i.bf16 %v5005_v7, %v5004_v2  ;;  %v5021_v26 = vld [vmem:[#allocation2 + $0x25] sm:$0xff]  ;;  %v5039_v46 = vld [vmem:[#allocation2 + $0x2e] sm:$0xff] }
 0x31e   : > { %4976 = vst.msk [vmem:[#allocation2 + $0x60] sm:$0xff] %vm4963_vm8, %v4938_v60  ;;  %v4898_v0 = vpop.permute.xlu0 %4897  ;;  %v8197_v62 = vpack.i.bf16 %v5071_v33, %v5070_v15  ;;  %v8207_v61 = vpack.i.bf16 %v5022_v38, %v5021_v26  ;;  %v5106_v9 = vld [vmem:[#allocation2 + $0x2a] sm:$0xff]  ;;  %v5107_v41 = vld [vmem:[#allocation2 + $0x32] sm:$0xff]  ;;  %v5007_v48 = vld [vmem:[#allocation2 + $0x3c] sm:$0xff] }
 0x31f   : > { %v4939_v4 = vmul.f32 %v4898_v0, %v11039_v56  ;;  %v4900_v35 = vpop.permute.xlu1 %4899  ;;  %v5089_v10 = vld [vmem:[#allocation2 + $0x29] sm:$0xff]  ;;  %v5090_v28 = vld [vmem:[#allocation2 + $0x31] sm:$0xff] }
 0x320   : > { %v4940_v49 = vmul.f32 %v4900_v35, %v11034_v54  ;;  %5667 = vrot.lane.b32.xlu1 %v5001_v13, %s8541_s14  ;;  %v5104_v13 = vld [vmem:[#allocation2 + $0x1a] sm:$0xff]  ;;  %v5038_v60 = vld [vmem:[#allocation2 + $0x26] sm:$0xff]  ;;  %v5073_v35 = vld [vmem:[#allocation2 + $0x30] sm:$0xff] }
 0x321   : > { %4977 = vst.msk [vmem:[#allocation2 + $0x68] sm:$0xff] %vm4963_vm8, %v4939_v4  ;;  %8168 = vrot.lane.b32.xlu0 %v8167_v22, %s8542_s15  ;;  %v8212_v30 = vpack.i.bf16 %v5039_v46, %v5038_v60  ;;  %v11278_v14 = vld [vmem:[#allocation2 + $0x2b] sm:$0xff] }
 0x322   : > { %4978 = vst.msk [vmem:[#allocation2 + $0x70] sm:$0xff] %vm4963_vm8, %v4940_v49  ;;  %v4902_v58 = vpop.permute.xlu0 %4901  ;;  %v5055_v0 = vld [vmem:[#allocation2 + $0x27] sm:$0xff]  ;;  %v5060_v46 = vld [vmem:[#allocation2 + $0x4f] sm:$0xff] }
 0x323   : > { %v4941_v56 = vmul.f32 %v4902_v58, %v11047_v25  ;;  %v4904_v1 = vpop.permute.xlu1 %4903  ;;  %v8217_v4 = vpack.i.bf16 %v5056_v8, %v5055_v0  ;;  %v5072_v22 = vld [vmem:[#allocation2 + $0x28] sm:$0xff]  ;;  %v5006_v58 = vld [vmem:[#allocation2 + $0x34] sm:$0xff] }
 0x324   : > { %v4942_v54 = vmul.f32 %v4904_v1, %v11042_v40  ;;  %5719 = vrot.lane.b32.xlu1 %v11178_v45, %s8543_s16  ;;  %v5970_v40 = vld [vmem:[%s11810_s3 + $0xa8] sm:$0xff]  ;;  %v5037_v45 = vld [vmem:[#allocation2 + $0x1e] sm:$0xff]  ;;  %v8222_v49 = vpack.i.bf16 %v5073_v35, %v5072_v22  ;;  %v8227_v1 = vpack.i.bf16 %v5007_v48, %v5006_v58 }
 0x325   : > { %4979 = vst.msk [vmem:[#allocation2 + $0x78] sm:$0xff] %vm4963_vm8, %v4941_v56  ;;  %8173 = vrot.lane.b32.xlu0 %v8172_v6, %s8544_s17  ;;  %6092 = vmatpush2.msra.mxu1 %v5970_v40  ;;  %v8187_v63 = vpack.i.bf16 %v5037_v45, %v5036_v16  ;;  %v11290_v56 = vld [vmem:[#allocation2 + $0x33] sm:$0xff]  ;;  %v5025_v16 = vld [vmem:[#allocation2 + $0x45] sm:$0xff] }
 0x326   : > { %4980 = vst.msk [vmem:[#allocation2 + $0x80] sm:$0xff] %vm4963_vm8, %v4942_v54  ;;  %6093 = vmatprep.subr.mxu1 %v8533_v55  ;;  %v5023_v6 = vld [vmem:[#allocation2 + $0x35] sm:$0xff]  ;;  %v5024_v54 = vld [vmem:[#allocation2 + $0x3d] sm:$0xff]  ;;  %v5093_v33 = vld [vmem:[#allocation2 + $0x49] sm:$0xff] }
 0x327   : > { %v4906_v57 = vpop.permute.xlu0 %4905  ;;  %v4908_v25 = vpop.permute.xlu1 %4907  ;;  %6094 = vmatpush2.msra.mxu1 %v5969_v20 }
 0x328   : > { %v4943_v36 = vmul.f32 %v4906_v57, %v11057_v52  ;;  %v4944_v43 = vmul.f32 %v4908_v25, %v11054_v42  ;;  %5549 = vrot.lane.b32.xlu1 %v5103_v18, %s8537_s10  ;;  %v5002_v42 = vld [vmem:[#allocation2 + $0x14] sm:$0xff]  ;;  %6095 = vmatprep.subr.mxu1 %v8533_v55  ;;  %v5041_v25 = vld [vmem:[#allocation2 + $0x3e] sm:$0xff] }
 0x329   : > { %5481 = vrot.lane.b32.xlu0 %v5086_v11, %s8538_s11  ;;  %6096 = vmatpush2.msra.mxu1 %v5968_v23  ;;  %v8177_v51 = vpack.i.bf16 %v5003_v21, %v5002_v42  ;;  %v5091_v57 = vld [vmem:[#allocation2 + $0x39] sm:$0xff] }
 0x32a   : > { %v4961_v50 = vmul.f32 %v6870_v19, %v4943_v36  ;;  %v4962_v52 = vmul.f32 0.0, %v4944_v43  ;;  %6097 = vmatprep.subr.mxu1 %v8533_v55  ;;  %v8232_v19 = vpack.i.bf16 %v5024_v54, %v5023_v6  ;;  %v5040_v18 = vld [vmem:[#allocation2 + $0x36] sm:$0xff]  ;;  %v5058_v36 = vld [vmem:[#allocation2 + $0x3f] sm:$0xff] }
 0x32b   : > { %6098 = vmatpush2.msra.mxu1 %v5967_v53  ;;  %v8237_v40 = vpack.i.bf16 %v5041_v25, %v5040_v18  ;;  %v5108_v43 = vld [vmem:[#allocation2 + $0x3a] sm:$0xff]  ;;  %v5076_v25 = vld [vmem:[#allocation2 + $0x48] sm:$0xff] }
 0x32c   : > { %4981 = vst.msk [vmem:[#allocation2 + $0x88] sm:$0xff] %vm4963_vm8, %v4961_v50  ;;  %4982 = vst.msk [vmem:[#allocation2 + $0x90] sm:$0xff] %vm4963_vm8, %v4962_v52  ;;  %5669 = vrot.lane.b32.xlu1 %v5002_v42, %s8541_s14  ;;  %6099 = vmatprep.subr.mxu1 %v8533_v55  ;;  %v5057_v11 = vld [vmem:[#allocation2 + $0x37] sm:$0xff]  ;;  %v5075_v23 = vld [vmem:[#allocation2 + $0x40] sm:$0xff] }
 0x32d   : > { %5617 = vrot.lane.b32.xlu0 %v11238_v29, %s8539_s12  ;;  %6100 = vmatpush2.msra.mxu1 %v5966_v27  ;;  %v8242_v20 = vpack.i.bf16 %v5058_v36, %v5057_v11  ;;  %v11301_v50 = vld [vmem:[#allocation2 + $0x3b] sm:$0xff]  ;;  %v5009_v27 = vld [vmem:[#allocation2 + $0x4c] sm:$0xff] }
 0x32e   : > { %6101 = vmatprep.subr.mxu1 %v8533_v55  ;;  %v11258_v55 = vld [vmem:[#allocation2 + $0x1b] sm:$0xff] }
 0x32f   : > { %6102 = vmatpush2.msra.mxu1 %v5965_v12  ;;  %v5074_v52 = vld [vmem:[#allocation2 + $0x38] sm:$0xff]  ;;  %v5092_v53 = vld [vmem:[#allocation2 + $0x41] sm:$0xff] }
 0x330   : > { %5721 = vrot.lane.b32.xlu1 %v5019_v59, %s8543_s16  ;;  %v8247_v42 = vpack.i.bf16 %v5075_v23, %v5074_v52  ;;  %v5008_v59 = vld [vmem:[#allocation2 + $0x44] sm:$0xff] }
 0x331   : > { %8178 = vrot.lane.b32.xlu0 %v8177_v51, %s8536_s9  ;;  %v5109_v51 = vld [vmem:[#allocation2 + $0x42] sm:$0xff] }
 0x334   : > { %5483 = vrot.lane.b32.xlu1 %v5087_v39, %s8538_s11  ;;  %v11318_v39 = vld [vmem:[#allocation2 + $0x4d] sm:$0xff] }
 0x335   : > { %8183 = vrot.lane.b32.xlu0 %v8182_v34, %s8535_s8 }
 0x338   : > { %8188 = vrot.lane.b32.xlu1 %v8187_v63, %s8540_s13  ;;  %v8257_v63 = vpack.i.bf16 %v11318_v39, %v5025_v16 }
 0x339   : > { %5551 = vrot.lane.b32.xlu0 %v5104_v13, %s8537_s10 }
 0x33c   : > { %8193 = vrot.lane.b32.xlu1 %v8192_v44, %s8542_s15  ;;  %v5110_v44 = vld [vmem:[#allocation2 + $0x4a] sm:$0xff] }
 0x33d   : > { %5619 = vrot.lane.b32.xlu0 %v11258_v55, %s8539_s12 }
 0x340   : > { %8198 = vrot.lane.b32.xlu1 %v8197_v62, %s8544_s17  ;;  %v5043_v62 = vld [vmem:[#allocation2 + $0x4e] sm:$0xff] }
 0x341   : > { %5671 = vrot.lane.b32.xlu0 %v5003_v21, %s8541_s14  ;;  %v11309_v21 = vld [vmem:[#allocation2 + $0x43] sm:$0xff] }
 0x344   : > { %5485 = vrot.lane.b32.xlu1 %v5088_v17, %s8538_s11 }
 0x345   : > { %5723 = vrot.lane.b32.xlu0 %v5020_v37, %s8543_s16  ;;  %v8252_v37 = vpack.i.bf16 %v5009_v27, %v5008_v59 }
 0x348   : > { %5621 = vrot.lane.b32.xlu1 %v11267_v24, %s8539_s12 }
 0x349   : > { %5553 = vrot.lane.b32.xlu0 %v5105_v5, %s8537_s10 }
 0x34c   : > { %8203 = vrot.lane.b32.xlu1 %v8202_v47, %s8536_s9 }
 0x34d   : > { %5673 = vrot.lane.b32.xlu0 %v5004_v2, %s8541_s14  ;;  %v4983_v2 = vld [vmem:[#allocation2 + $0x3] sm:$0xff] }
 0x350   : > { %8208 = vrot.lane.b32.xlu1 %v8207_v61, %s8535_s8 }
 0x351   : > { %5725 = vrot.lane.b32.xlu0 %v5021_v26, %s8543_s16  ;;  %v11331_v26 = vld [vmem:[#allocation2 + $0x4b] sm:$0xff] }
 0x354   : > { %5555 = vrot.lane.b32.xlu1 %v5106_v9, %s8537_s10 }
 0x355   : > { %5487 = vrot.lane.b32.xlu0 %v5089_v10, %s8538_s11 }
 0x358   : > { %5623 = vrot.lane.b32.xlu1 %v11278_v14, %s8539_s12 }
 0x359   : > { %8213 = vrot.lane.b32.xlu0 %v8212_v30, %s8540_s13 }
 0x35c   : > { %5675 = vrot.lane.b32.xlu1 %v5005_v7, %s8541_s14  ;;  %v5042_v7 = vld [vmem:[#allocation2 + $0x46] sm:$0xff] }
 0x35d   : > { %8218 = vrot.lane.b32.xlu0 %v8217_v4, %s8542_s15  ;;  %v5059_v4 = vld [vmem:[#allocation2 + $0x47] sm:$0xff] }
 0x360   : > { %5727 = vrot.lane.b32.xlu1 %v5022_v38, %s8543_s16  ;;  %v8262_v38 = vpack.i.bf16 %v5043_v62, %v5042_v7  ;;  %v5028_v7 = vld [vmem:[#allocation2 + $0x5d] sm:$0xff] }
 0x361   : > { %8223 = vrot.lane.b32.xlu0 %v8222_v49, %s8544_s17 }
 0x364   : > { %5557 = vrot.lane.b32.xlu1 %v5107_v41, %s8537_s10 }
 0x365   : > { %5489 = vrot.lane.b32.xlu0 %v5090_v28, %s8538_s11  ;;  %v8267_v28 = vpack.i.bf16 %v5060_v46, %v5059_v4 }
 0x368   : > { %5677 = vrot.lane.b32.xlu1 %v5006_v58, %s8541_s14 }
 0x369   : > { %5625 = vrot.lane.b32.xlu0 %v11290_v56, %s8539_s12 }
 0x36c   : > { %5729 = vrot.lane.b32.xlu1 %v5023_v6, %s8543_s16 }
 0x36d   : > { %8228 = vrot.lane.b32.xlu0 %v8227_v1, %s8536_s9  ;;  %v5077_v1 = vld [vmem:[#allocation2 + $0x50] sm:$0xff] }
 0x36e   : > { %v8272_v11 = vpack.i.bf16 %v5077_v1, %v5076_v25 }
 0x370   : > { %5491 = vrot.lane.b32.xlu1 %v5091_v57, %s8538_s11 }
 0x371   : > { %8233 = vrot.lane.b32.xlu0 %v8232_v19, %s8535_s8 }
 0x374   : > { %8238 = vrot.lane.b32.xlu1 %v8237_v40, %s8540_s13 }
 0x375   : > { %5559 = vrot.lane.b32.xlu0 %v5108_v43, %s8537_s10 }
 0x378   : > { %8243 = vrot.lane.b32.xlu1 %v8242_v20, %s8542_s15 }
 0x379   : > { %5627 = vrot.lane.b32.xlu0 %v11301_v50, %s8539_s12 }
 0x37c   : > { %8248 = vrot.lane.b32.xlu1 %v8247_v42, %s8544_s17 }
 0x37d   : > { %5679 = vrot.lane.b32.xlu0 %v5007_v48, %s8541_s14 }
 0x380   : > { %5493 = vrot.lane.b32.xlu1 %v5092_v53, %s8538_s11 }
 0x381   : > { %5731 = vrot.lane.b32.xlu0 %v5024_v54, %s8543_s16 }
 0x384   : > { %5629 = vrot.lane.b32.xlu1 %v11309_v21, %s8539_s12 }
 0x385   : > { %5561 = vrot.lane.b32.xlu0 %v5109_v51, %s8537_s10  ;;  %v5111_v51 = vld [vmem:[#allocation2 + $0x52] sm:$0xff] }
 0x386   : > { %v11314_v12 = vpop.permute.xlu1 %8158 }
 0x387   : > { %v11316_v34 = vpop.permute.xlu0 %8153  ;;  %v8160_v5 = vunpack.i.l.bf16 %v11314_v12  ;;  %v8161_v54 = vunpack.i.h.bf16 %v11314_v12  ;;  %v5094_v12 = vld [vmem:[#allocation2 + $0x51] sm:$0xff] }
 0x388   : > { %8253 = vrot.lane.b32.xlu1 %v8252_v37, %s8536_s9  ;;  %v8155_v15 = vunpack.i.l.bf16 %v11316_v34  ;;  %v8156_v35 = vunpack.i.h.bf16 %v11316_v34 }
 0x389   : > { %5681 = vrot.lane.b32.xlu0 %v5008_v59, %s8541_s14 }
 0x38a   : > { %v5548_v45 = vpop.permute.xlu1 %5547  ;;  %v5770_v61 = vsel %vm4963_vm8, %v4983_v2, %v8155_v15  ;;  %v5771_v18 = vsel %vm4963_vm8, %v11196_v32, %v8156_v35  ;;  %v5112_v35 = vld [vmem:[#allocation2 + $0x5a] sm:$0xff] }
 0x38b   : > { %v5480_v31 = vpop.permute.xlu0 %5479  ;;  %v5788_v22 = vsel %vm5787_vm12, %v5770_v61, %v8160_v5  ;;  %v5789_v52 = vsel %vm5787_vm12, %v5771_v18, %v8161_v54  ;;  %v5045_v61 = vld [vmem:[#allocation2 + $0x5e] sm:$0xff] }
 0x38c   : > { %8258 = vrot.lane.b32.xlu1 %v8257_v63, %s8535_s8  ;;  %v5878_v9 = vsel %vm5877_vm10, %v5480_v31, %v5548_v45  ;;  %v5079_v54 = vld [vmem:[#allocation2 + $0x60] sm:$0xff]  ;;  %v5078_v18 = vld [vmem:[#allocation2 + $0x58] sm:$0xff] }
 0x38d   : > { %5733 = vrot.lane.b32.xlu0 %v5025_v16, %s8543_s16 }
 0x38e   : > { %v5616_v3 = vpop.permute.xlu1 %5615 }
 0x38f   : > { %v11325_v13 = vpop.permute.xlu0 %8163  ;;  %v5896_v60 = vsel %vm5895_vm11, %v5878_v9, %v5616_v3  ;;  %v5011_v3 = vld [vmem:[#allocation2 + $0x5c] sm:$0xff] }
 0x390   : > { %5563 = vrot.lane.b32.xlu1 %v5110_v44, %s8537_s10  ;;  %v8165_v10 = vunpack.i.l.bf16 %v11325_v13  ;;  %v8166_v40 = vunpack.i.h.bf16 %v11325_v13  ;;  %v11371_v13 = vld [vmem:[#allocation2 + $0x53] sm:$0xff] }
 0x391   : > { %5495 = vrot.lane.b32.xlu0 %v5093_v33, %s8538_s11  ;;  %v5044_v9 = vld [vmem:[#allocation2 + $0x56] sm:$0xff] }
 0x392   : > { %v5668_v17 = vpop.permute.xlu1 %5667  ;;  %v5806_v58 = vsel %vm5805_vm15, %v5788_v22, %v8165_v10  ;;  %v5807_v53 = vsel %vm5805_vm15, %v5789_v52, %v8166_v40 }
 0x393   : > { %v8169_v47 = vpop.permute.xlu0 %8168  ;;  %v5914_v8 = vsel %vm5913_vm13, %v5896_v60, %v5668_v17  ;;  %v5027_v17 = vld [vmem:[#allocation2 + $0x55] sm:$0xff]  ;;  %v8287_v60 = vpack.i.bf16 %v5045_v61, %v5044_v9  ;;  %v5030_v61 = vld [vmem:[#allocation2 + $0x6d] sm:$0xff] }
 0x394   : > { %5631 = vrot.lane.b32.xlu1 %v11331_v26, %s8539_s12  ;;  %v8170_v30 = vunpack.i.l.bf16 %v8169_v47  ;;  %v8171_v20 = vunpack.i.h.bf16 %v8169_v47  ;;  %v8282_v2 = vpack.i.bf16 %v5028_v7, %v5027_v17 }
 0x395   : > { %8263 = vrot.lane.b32.xlu0 %v8262_v38, %s8540_s13  ;;  %v5095_v38 = vld [vmem:[#allocation2 + $0x59] sm:$0xff] }
 0x396   : > { %v5720_v0 = vpop.permute.xlu1 %5719  ;;  %v5824_v6 = vsel %vm5823_vm1, %v5806_v58, %v8170_v30  ;;  %v5825_v37 = vsel %vm5823_vm1, %v5807_v53, %v8171_v20 }
 0x397   : > { %v5932_v49 = vsel %vm5931_vm14, %v5914_v8, %v5720_v0  ;;  %v8174_v41 = vpop.permute.xlu0 %8173  ;;  %v5062_v0 = vld [vmem:[#allocation2 + $0x5f] sm:$0xff] }
 0x398   : > { %v8175_v48 = vunpack.i.l.bf16 %v8174_v41  ;;  %5683 = vrot.lane.b32.xlu1 %v5009_v27, %s8541_s14  ;;  %6891 = vmatprep.mubr.msk.f32.mxu1 %vm5984_vm0, %v5932_v49  ;;  %v8176_v23 = vunpack.i.h.bf16 %v8174_v41  ;;  %v5061_v49 = vld [vmem:[#allocation2 + $0x57] sm:$0xff] }
 0x399   : > { %8268 = vrot.lane.b32.xlu0 %v8267_v28, %s8542_s15  ;;  %v8292_v58 = vpack.i.bf16 %v5062_v0, %v5061_v49  ;;  %v5047_v49 = vld [vmem:[#allocation2 + $0x6e] sm:$0xff] }
 0x39a   : > { %v5842_v19 = vsel %vm5841_vm2, %v5824_v6, %v8175_v48  ;;  %v5550_v57 = vpop.permute.xlu1 %5549  ;;  %v5843_v34 = vsel %vm5841_vm2, %v5825_v37, %v8176_v23 }
 0x39b   : > { %v5482_v36 = vpop.permute.xlu0 %5481  ;;  %v5860_v43 = vsel %vm5859_vm3, %v5842_v19, %v5480_v31  ;;  %v5010_v31 = vld [vmem:[#allocation2 + $0x54] sm:$0xff] }
 0x39c   : > { %6104 = vmatmul.mubr.f32.vlgmr.msra.gmra.mxu1 %v5860_v43  ;;  %5735 = vrot.lane.b32.xlu1 %v11318_v39, %s8543_s16  ;;  %v5879_v32 = vsel %vm5877_vm10, %v5482_v36, %v5550_v57  ;;  %v5861_v44 = vsel %vm5859_vm3, %v5843_v34, %v5482_v36  ;;  %v8277_v33 = vpack.i.bf16 %v5011_v3, %v5010_v31  ;;  %v11395_v57 = vld [vmem:[#allocation2 + $0x5b] sm:$0xff] }
 0x39d   : > { %8273 = vrot.lane.b32.xlu0 %v8272_v11, %s8544_s17  ;;  %v8297_v43 = vpack.i.bf16 %v5079_v54, %v5078_v18  ;;  %v5064_v18 = vld [vmem:[#allocation2 + $0x6f] sm:$0xff] }
 0x39e   : > { %v5670_v42 = vpop.permute.xlu1 %5669 }
 0x39f   : > { %v5618_v27 = vpop.permute.xlu0 %5617 }
 0x3a0   : > { %v5897_v59 = vsel %vm5895_vm11, %v5879_v32, %v5618_v27  ;;  %5565 = vrot.lane.b32.xlu1 %v5111_v51, %s8537_s10 }
 0x3a1   : > { %5497 = vrot.lane.b32.xlu0 %v5094_v12, %s8538_s11  ;;  %v5915_v16 = vsel %vm5913_vm13, %v5897_v59, %v5670_v42  ;;  %v5096_v59 = vld [vmem:[#allocation2 + $0x61] sm:$0xff] }
 0x3a2   : > { %v5722_v39 = vpop.permute.xlu1 %5721 }
 0x3a3   : > { %v5933_v45 = vsel %vm5931_vm14, %v5915_v16, %v5722_v39  ;;  %v11368_v63 = vpop.permute.xlu0 %8178 }
 0x3a4   : > { %5685 = vrot.lane.b32.xlu1 %v5010_v31, %s8541_s14  ;;  %6892 = vmatprep.mubr.msk.f32.mxu1 %vm5984_vm0, %v5933_v45  ;;  %v8180_v10 = vunpack.i.l.bf16 %v11368_v63  ;;  %v8181_v53 = vunpack.i.h.bf16 %v11368_v63 }
 0x3a5   : > { %5633 = vrot.lane.b32.xlu0 %v11371_v13, %s8539_s12  ;;  %6109 = vmatmul.mubr.f32.gmra.mxu1 %v5861_v44  ;;  %v5013_v44 = vld [vmem:[#allocation2 + $0x6c] sm:$0xff] }
 0x3a6   : > { %v5484_v15 = vpop.permute.xlu1 %5483  ;;  %v5772_v41 = vsel %vm4963_vm8, %v11238_v29, %v8180_v10  ;;  %v5773_v34 = vsel %vm4963_vm8, %v11258_v55, %v8181_v53  ;;  %v5012_v55 = vld [vmem:[#allocation2 + $0x64] sm:$0xff] }
 0x3a7   : > { %v11377_v62 = vpop.permute.xlu0 %8183 }
 0x3a8   : > { %5737 = vrot.lane.b32.xlu1 %v5027_v17, %s8543_s16  ;;  %v8185_v30 = vunpack.i.l.bf16 %v11377_v62  ;;  %v8186_v27 = vunpack.i.h.bf16 %v11377_v62 }
 0x3a9   : > { %8278 = vrot.lane.b32.xlu0 %v8277_v33, %s8536_s9  ;;  %v5113_v33 = vld [vmem:[#allocation2 + $0x62] sm:$0xff] }
 0x3aa   : > { %v11381_v5 = vpop.permute.xlu1 %8188  ;;  %v5790_v48 = vsel %vm5787_vm12, %v5772_v41, %v8185_v30  ;;  %v5791_v45 = vsel %vm5787_vm12, %v5773_v34, %v8186_v27 }
 0x3ab   : > { %v5552_v47 = vpop.permute.xlu0 %5551  ;;  %v8190_v4 = vunpack.i.l.bf16 %v11381_v5  ;;  %v8191_v12 = vunpack.i.h.bf16 %v11381_v5  ;;  %v8302_v5 = vpack.i.bf16 %v5013_v44, %v5012_v55 }
 0x3ac   : > { %5499 = vrot.lane.b32.xlu1 %v5095_v38, %s8538_s11  ;;  %v5880_v25 = vsel %vm5877_vm10, %v5484_v15, %v5552_v47 }
 0x3ad   : > { %8283 = vrot.lane.b32.xlu0 %v8282_v2, %s8535_s8  ;;  %v5808_v19 = vsel %vm5805_vm15, %v5790_v48, %v8190_v4 }
 0x3ae   : > { %v8194_v46 = vpop.permute.xlu1 %8193 }
 0x3af   : > { %v5620_v8 = vpop.permute.xlu0 %5619  ;;  %v8195_v22 = vunpack.i.l.bf16 %v8194_v46  ;;  %v8196_v37 = vunpack.i.h.bf16 %v8194_v46  ;;  %v5029_v46 = vld [vmem:[#allocation2 + $0x65] sm:$0xff] }
 0x3b0   : > { %8288 = vrot.lane.b32.xlu1 %v8287_v60, %s8540_s13  ;;  %v5898_v40 = vsel %vm5895_vm11, %v5880_v25, %v5620_v8  ;;  %v8307_v30 = vpack.i.bf16 %v5030_v61, %v5029_v46 }
 0x3b1   : > { %5567 = vrot.lane.b32.xlu0 %v5112_v35, %s8537_s10  ;;  %v5826_v29 = vsel %vm5823_vm1, %v5808_v19, %v8195_v22  ;;  %v5114_v35 = vld [vmem:[#allocation2 + $0x6a] sm:$0xff] }
 0x3b2   : > { %v8199_v28 = vpop.permute.xlu1 %8198  ;;  %v5097_v22 = vld [vmem:[#allocation2 + $0x69] sm:$0xff] }
 0x3b3   : > { %v8200_v1 = vunpack.i.l.bf16 %v8199_v28  ;;  %v5672_v6 = vpop.permute.xlu0 %5671  ;;  %v8201_v39 = vunpack.i.h.bf16 %v8199_v28 }
 0x3b4   : > { %8293 = vrot.lane.b32.xlu1 %v8292_v58, %s8542_s15  ;;  %v5916_v20 = vsel %vm5913_vm13, %v5898_v40, %v5672_v6  ;;  %v5046_v58 = vld [vmem:[#allocation2 + $0x66] sm:$0xff] }
 0x3b5   : > { %5635 = vrot.lane.b32.xlu0 %v11395_v57, %s8539_s12  ;;  %v5844_v11 = vsel %vm5841_vm2, %v5826_v29, %v8200_v1  ;;  %v11443_v6 = vld [vmem:[#allocation2 + $0x6b] sm:$0xff]  ;;  %v8312_v54 = vpack.i.bf16 %v5047_v49, %v5046_v58 }
 0x3b6   : > { %v5486_v36 = vpop.permute.xlu1 %5485  ;;  %v5862_v42 = vsel %vm5859_vm3, %v5844_v11, %v5484_v15  ;;  %v5809_v15 = vsel %vm5805_vm15, %v5791_v45, %v8191_v12 }
 0x3b7   : > { %v5724_v23 = vpop.permute.xlu0 %5723  ;;  %v5827_v62 = vsel %vm5823_vm1, %v5809_v15, %v8196_v37 }
 0x3b8   : > { %v5934_v52 = vsel %vm5931_vm14, %v5916_v20, %v5724_v23  ;;  %8298 = vrot.lane.b32.xlu1 %v8297_v43, %s8544_s17  ;;  %v5845_v2 = vsel %vm5841_vm2, %v5827_v62, %v8201_v39  ;;  %v5063_v20 = vld [vmem:[#allocation2 + $0x67] sm:$0xff] }
 0x3b9   : > { %5687 = vrot.lane.b32.xlu0 %v5011_v3, %s8541_s14  ;;  %6893 = vmatprep.mubr.msk.f32.mxu1 %vm5984_vm0, %v5934_v52  ;;  %v11420_v3 = vld [vmem:[#allocation2 + $0x63] sm:$0xff]  ;;  %v5863_v10 = vsel %vm5859_vm3, %v5845_v2, %v5486_v36  ;;  %v8317_v53 = vpack.i.bf16 %v5064_v18, %v5063_v20  ;;  %v5115_v2 = vld [vmem:[#allocation2 + $0x72] sm:$0xff] }
 0x3ba   : > { %6114 = vmatmul.mubr.f32.gmra.mxu1 %v5862_v42  ;;  %v5622_v32 = vpop.permute.xlu1 %5621  ;;  %v5080_v39 = vld [vmem:[#allocation2 + $0x68] sm:$0xff] }
 0x3bb   : > { %v5554_v51 = vpop.permute.xlu0 %5553 }
 0x3bc   : > { %5501 = vrot.lane.b32.xlu1 %v5096_v59, %s8538_s11  ;;  %v5881_v63 = vsel %vm5877_vm10, %v5486_v36, %v5554_v51  ;;  %v5081_v51 = vld [vmem:[#allocation2 + $0x70] sm:$0xff] }
 0x3bd   : > { %5739 = vrot.lane.b32.xlu0 %v5028_v7, %s8543_s16  ;;  %v5899_v17 = vsel %vm5895_vm11, %v5881_v63, %v5622_v32 }
 0x3be   : > { %v11416_v16 = vpop.permute.xlu1 %8203 }
 0x3bf   : > { %v5674_v31 = vpop.permute.xlu0 %5673  ;;  %v8205_v41 = vunpack.i.l.bf16 %v11416_v16 }
 0x3c0   : > { %5637 = vrot.lane.b32.xlu1 %v11420_v3, %s8539_s12  ;;  %v5917_v47 = vsel %vm5913_vm13, %v5899_v17, %v5674_v31 }
 0x3c1   : > { %5569 = vrot.lane.b32.xlu0 %v5113_v33, %s8537_s10  ;;  %v5774_v36 = vsel %vm4963_vm8, %v11267_v24, %v8205_v41  ;;  %v8206_v24 = vunpack.i.h.bf16 %v11416_v16  ;;  %v5031_v41 = vld [vmem:[#allocation2 + $0x75] sm:$0xff] }
 0x3c2   : > { %v11428_v7 = vpop.permute.xlu1 %8208 }
 0x3c3   : > { %v5726_v38 = vpop.permute.xlu0 %5725  ;;  %v8210_v48 = vunpack.i.l.bf16 %v11428_v7  ;;  %v8211_v12 = vunpack.i.h.bf16 %v11428_v7  ;;  %v5775_v16 = vsel %vm4963_vm8, %v11278_v14, %v8206_v24 }
 0x3c4   : > { %v5935_v9 = vsel %vm5931_vm14, %v5917_v47, %v5726_v38  ;;  %8303 = vrot.lane.b32.xlu1 %v8302_v5, %s8536_s9  ;;  %v5098_v38 = vld [vmem:[#allocation2 + $0x71] sm:$0xff] }
 0x3c5   : > { %5689 = vrot.lane.b32.xlu0 %v5012_v55, %s8541_s14  ;;  %6894 = vmatprep.mubr.msk.f32.mxu1 %vm5984_vm0, %v5935_v9  ;;  %v5792_v23 = vsel %vm5787_vm12, %v5774_v36, %v8210_v48  ;;  %v5793_v55 = vsel %vm5787_vm12, %v5775_v16, %v8211_v12  ;;  %v5083_v12 = vld [vmem:[#allocation2 + $0x80] sm:$0xff] }
 0x3c6   : > { %6119 = vmatmul.mubr.f32.gmra.mxu1 %v5863_v10  ;;  %v5556_v60 = vpop.permute.xlu1 %5555 }
 0x3c7   : > { %v5488_v8 = vpop.permute.xlu0 %5487 }
 0x3c8   : > { %8308 = vrot.lane.b32.xlu1 %v8307_v30, %s8535_s8  ;;  %v5882_v19 = vsel %vm5877_vm10, %v5488_v8, %v5556_v60  ;;  %v5014_v30 = vld [vmem:[#allocation2 + $0x74] sm:$0xff] }
 0x3c9   : > { %5741 = vrot.lane.b32.xlu0 %v5029_v46, %s8543_s16 }
 0x3ca   : > { %v5624_v0 = vpop.permute.xlu1 %5623 }
 0x3cb   : > { %v8214_v4 = vpop.permute.xlu0 %8213  ;;  %v5900_v29 = vsel %vm5895_vm11, %v5882_v19, %v5624_v0  ;;  %v11481_v0 = vld [vmem:[#allocation2 + $0x73] sm:$0xff]  ;;  %v5049_v19 = vld [vmem:[#allocation2 + $0x7e] sm:$0xff] }
 0x3cc   : > { %5571 = vrot.lane.b32.xlu1 %v5114_v35, %s8537_s10  ;;  %v8215_v25 = vunpack.i.l.bf16 %v8214_v4  ;;  %v8216_v45 = vunpack.i.h.bf16 %v8214_v4 }
 0x3cd   : > { %5503 = vrot.lane.b32.xlu0 %v5097_v22, %s8538_s11 }
 0x3ce   : > { %v5676_v28 = vpop.permute.xlu1 %5675  ;;  %v5810_v32 = vsel %vm5805_vm15, %v5792_v23, %v8215_v25  ;;  %v5811_v17 = vsel %vm5805_vm15, %v5793_v55, %v8216_v45  ;;  %v5048_v25 = vld [vmem:[#allocation2 + $0x76] sm:$0xff] }
 0x3cf   : > { %v8219_v1 = vpop.permute.xlu0 %8218  ;;  %v5918_v43 = vsel %vm5913_vm13, %v5900_v29, %v5676_v28  ;;  %v5032_v28 = vld [vmem:[#allocation2 + $0x7d] sm:$0xff] }
 0x3d0   : > { %5639 = vrot.lane.b32.xlu1 %v11443_v6, %s8539_s12  ;;  %v8220_v40 = vunpack.i.l.bf16 %v8219_v1  ;;  %v8221_v15 = vunpack.i.h.bf16 %v8219_v1  ;;  %v8332_v48 = vpack.i.bf16 %v5032_v28, %v5031_v41  ;;  %v5116_v23 = vld [vmem:[#allocation2 + $0x7a] sm:$0xff] }
 0x3d1   : > { %8313 = vrot.lane.b32.xlu0 %v8312_v54, %s8540_s13  ;;  %v5099_v54 = vld [vmem:[#allocation2 + $0x79] sm:$0xff] }
 0x3d2   : > { %v5728_v11 = vpop.permute.xlu1 %5727  ;;  %v5828_v59 = vsel %vm5823_vm1, %v5810_v32, %v8220_v40  ;;  %v8337_v40 = vpack.i.bf16 %v5049_v19, %v5048_v25 }
 0x3d3   : > { %v5936_v52 = vsel %vm5931_vm14, %v5918_v43, %v5728_v11  ;;  %v8224_v42 = vpop.permute.xlu0 %8223  ;;  %v5066_v11 = vld [vmem:[#allocation2 + $0x7f] sm:$0xff] }
 0x3d4   : > { %v8225_v27 = vunpack.i.l.bf16 %v8224_v42  ;;  %5691 = vrot.lane.b32.xlu1 %v5013_v44, %s8541_s14  ;;  %6895 = vmatprep.mubr.msk.f32.mxu1 %vm5984_vm0, %v5936_v52  ;;  %v8322_v44 = vpack.i.bf16 %v5081_v51, %v5080_v39  ;;  %v8226_v33 = vunpack.i.h.bf16 %v8224_v42  ;;  %v5065_v42 = vld [vmem:[#allocation2 + $0x77] sm:$0xff] }
 0x3d5   : > { %8318 = vrot.lane.b32.xlu0 %v8317_v53, %s8542_s15 }
 0x3d6   : > { %v5558_v37 = vpop.permute.xlu1 %5557  ;;  %v5846_v34 = vsel %vm5841_vm2, %v5828_v59, %v8225_v27  ;;  %v8342_v27 = vpack.i.bf16 %v5066_v11, %v5065_v42  ;;  %v5119_v42 = vld [vmem:[#allocation2 + $0x8b] sm:$0xff] }
 0x3d7   : > { %v5490_v63 = vpop.permute.xlu0 %5489  ;;  %v5864_v31 = vsel %vm5859_vm3, %v5846_v34, %v5488_v8  ;;  %v5015_v8 = vld [vmem:[#allocation2 + $0x7c] sm:$0xff] }
 0x3d8   : > { %6124 = vmatmul.mubr.f32.gmra.mxu1 %v5864_v31  ;;  %5743 = vrot.lane.b32.xlu1 %v5030_v61, %s8543_s16  ;;  %v5883_v7 = vsel %vm5877_vm10, %v5490_v63, %v5558_v37  ;;  %v5829_v61 = vsel %vm5823_vm1, %v5811_v17, %v8221_v15  ;;  %v8327_v22 = vpack.i.bf16 %v5015_v8, %v5014_v30  ;;  %v11505_v34 = vld [vmem:[#allocation2 + $0x7b] sm:$0xff] }
 0x3d9   : > { %8323 = vrot.lane.b32.xlu0 %v8322_v44, %s8544_s17  ;;  %v5847_v14 = vsel %vm5841_vm2, %v5829_v61, %v8226_v33 }
 0x3da   : > { %v5678_v62 = vpop.permute.xlu1 %5677  ;;  %v5865_v4 = vsel %vm5859_vm3, %v5847_v14, %v5490_v63 }
 0x3db   : > { %v5626_v5 = vpop.permute.xlu0 %5625 }
 0x3dc   : > { %v5901_v47 = vsel %vm5895_vm11, %v5883_v7, %v5626_v5  ;;  %5573 = vrot.lane.b32.xlu1 %v5115_v2, %s8537_s10 }
 0x3dd   : > { %5505 = vrot.lane.b32.xlu0 %v5098_v38, %s8538_s11  ;;  %v5919_v10 = vsel %vm5913_vm13, %v5901_v47, %v5678_v62  ;;  %v5100_v47 = vld [vmem:[#allocation2 + $0x81] sm:$0xff] }
 0x3de   : > { %v5730_v9 = vpop.permute.xlu1 %5729 }
 0x3df   : > { %v5937_v46 = vsel %vm5931_vm14, %v5919_v10, %v5730_v9  ;;  %v11478_v60 = vpop.permute.xlu0 %8228 }
 0x3e0   : > { %5693 = vrot.lane.b32.xlu1 %v5014_v30, %s8541_s14  ;;  %6896 = vmatprep.mubr.msk.f32.mxu1 %vm5984_vm0, %v5937_v46  ;;  %v8230_v18 = vunpack.i.l.bf16 %v11478_v60  ;;  %v8231_v17 = vunpack.i.h.bf16 %v11478_v60 }
 0x3e1   : > { %5641 = vrot.lane.b32.xlu0 %v11481_v0, %s8539_s12  ;;  %6129 = vmatmul.mubr.f32.gmra.mxu1 %v5865_v4 }
 0x3e2   : > { %v5492_v35 = vpop.permute.xlu1 %5491  ;;  %v5776_v53 = vsel %vm4963_vm8, %v11290_v56, %v8230_v18  ;;  %v5082_v56 = vld [vmem:[#allocation2 + $0x78] sm:$0xff]  ;;  %v5777_v14 = vsel %vm4963_vm8, %v11301_v50, %v8231_v17  ;;  %v5033_v18 = vld [vmem:[#allocation2 + $0x85] sm:$0xff] }
 0x3e3   : > { %v11487_v49 = vpop.permute.xlu0 %8233  ;;  %v8347_v44 = vpack.i.bf16 %v5083_v12, %v5082_v56 }
 0x3e4   : > { %5745 = vrot.lane.b32.xlu1 %v5031_v41, %s8543_s16  ;;  %v8235_v36 = vunpack.i.l.bf16 %v11487_v49  ;;  %v8236_v5 = vunpack.i.h.bf16 %v11487_v49 }
 0x3e5   : > { %8328 = vrot.lane.b32.xlu0 %v8327_v22, %s8536_s9 }
 0x3e6   : > { %v11491_v58 = vpop.permute.xlu1 %8238  ;;  %v5794_v51 = vsel %vm5787_vm12, %v5776_v53, %v8235_v36  ;;  %v5795_v46 = vsel %vm5787_vm12, %v5777_v14, %v8236_v5  ;;  %v5118_v36 = vld [vmem:[#allocation2 + $0x8a] sm:$0xff] }
 0x3e7   : > { %v5560_v1 = vpop.permute.xlu0 %5559  ;;  %v8240_v20 = vunpack.i.l.bf16 %v11491_v58  ;;  %v8241_v38 = vunpack.i.h.bf16 %v11491_v58 }
 0x3e8   : > { %5507 = vrot.lane.b32.xlu1 %v5099_v54, %s8538_s11  ;;  %v5884_v39 = vsel %vm5877_vm10, %v5492_v35, %v5560_v1 }
 0x3e9   : > { %8333 = vrot.lane.b32.xlu0 %v8332_v48, %s8535_s8  ;;  %v5812_v37 = vsel %vm5805_vm15, %v5794_v51, %v8240_v20  ;;  %v5813_v4 = vsel %vm5805_vm15, %v5795_v46, %v8241_v38  ;;  %v5016_v48 = vld [vmem:[#allocation2 + $0x84] sm:$0xff] }
 0x3ea   : > { %v8244_v29 = vpop.permute.xlu1 %8243  ;;  %v5084_v38 = vld [vmem:[#allocation2 + $0x88] sm:$0xff] }
 0x3eb   : > { %v5628_v43 = vpop.permute.xlu0 %5627  ;;  %v8245_v52 = vunpack.i.l.bf16 %v8244_v29  ;;  %v8246_v61 = vunpack.i.h.bf16 %v8244_v29 }
 0x3ec   : > { %8338 = vrot.lane.b32.xlu1 %v8337_v40, %s8540_s13  ;;  %v5902_v63 = vsel %vm5895_vm11, %v5884_v39, %v5628_v43  ;;  %v5101_v43 = vld [vmem:[#allocation2 + $0x89] sm:$0xff] }
 0x3ed   : > { %5575 = vrot.lane.b32.xlu0 %v5116_v23, %s8537_s10  ;;  %v5830_v45 = vsel %vm5823_vm1, %v5812_v37, %v8245_v52  ;;  %v5831_v22 = vsel %vm5823_vm1, %v5813_v4, %v8246_v61 }
 0x3ee   : > { %v8249_v32 = vpop.permute.xlu1 %8248 }
 0x3ef   : > { %v8250_v24 = vunpack.i.l.bf16 %v8249_v32  ;;  %v5680_v59 = vpop.permute.xlu0 %5679  ;;  %v8251_v9 = vunpack.i.h.bf16 %v8249_v32 }
 0x3f0   : > { %8343 = vrot.lane.b32.xlu1 %v8342_v27, %s8542_s15  ;;  %v5920_v16 = vsel %vm5913_vm13, %v5902_v63, %v5680_v59  ;;  %v5050_v27 = vld [vmem:[#allocation2 + $0x86] sm:$0xff] }
 0x3f1   : > { %5643 = vrot.lane.b32.xlu0 %v11505_v34, %s8539_s12  ;;  %v5848_v15 = vsel %vm5841_vm2, %v5830_v45, %v8250_v24  ;;  %v5849_v50 = vsel %vm5841_vm2, %v5831_v22, %v8251_v9  ;;  %v5120_v63 = vld [vmem:[#allocation2 + $0x8c] sm:$0xff] }
 0x3f2   : > { %v5494_v31 = vpop.permute.xlu1 %5493  ;;  %v5866_v62 = vsel %vm5859_vm3, %v5848_v15, %v5492_v35  ;;  %v5117_v35 = vld [vmem:[#allocation2 + $0x82] sm:$0xff] }
 0x3f3   : > { %v5732_v33 = vpop.permute.xlu0 %5731  ;;  %v5867_v54 = vsel %vm5859_vm3, %v5849_v50, %v5494_v31  ;;  %v5067_v15 = vld [vmem:[#allocation2 + $0x87] sm:$0xff] }
 0x3f4   : > { %v5938_v55 = vsel %vm5931_vm14, %v5920_v16, %v5732_v33  ;;  %8348 = vrot.lane.b32.xlu1 %v8347_v44, %s8544_s17 }
 0x3f5   : > { %5695 = vrot.lane.b32.xlu0 %v5015_v8, %s8541_s14  ;;  %6897 = vmatprep.mubr.msk.f32.mxu1 %vm5984_vm0, %v5938_v55  ;;  %v11530_v8 = vld [vmem:[#allocation2 + $0x83] sm:$0xff] }
 0x3f6   : > { %6134 = vmatmul.mubr.f32.gmra.mxu1 %v5866_v62  ;;  %v5630_v7 = vpop.permute.xlu1 %5629 }
 0x3f7   : > { %v5562_v2 = vpop.permute.xlu0 %5561 }
 0x3f8   : > { %5509 = vrot.lane.b32.xlu1 %v5100_v47, %s8538_s11  ;;  %v5885_v60 = vsel %vm5877_vm10, %v5494_v31, %v5562_v2  ;;  %v5121_v2 = vld [vmem:[#allocation2 + $0x8d] sm:$0xff] }
 0x3f9   : > { %5747 = vrot.lane.b32.xlu0 %v5032_v28, %s8543_s16  ;;  %v5903_v49 = vsel %vm5895_vm11, %v5885_v60, %v5630_v7 }
 0x3fa   : > { %v11526_v10 = vpop.permute.xlu1 %8253 }
 0x3fb   : > { %v5682_v30 = vpop.permute.xlu0 %5681  ;;  %v8255_v11 = vunpack.i.l.bf16 %v11526_v10  ;;  %v8256_v16 = vunpack.i.h.bf16 %v11526_v10 }
 0x3fc   : > { %5645 = vrot.lane.b32.xlu1 %v11530_v8, %s8539_s12  ;;  %v5921_v28 = vsel %vm5913_vm13, %v5903_v49, %v5682_v30 }
 0x3fd   : > { %5577 = vrot.lane.b32.xlu0 %v5117_v35, %s8537_s10  ;;  %v5778_v59 = vsel %vm4963_vm8, %v11309_v21, %v8255_v11  ;;  %v5779_v61 = vsel %vm4963_vm8, %v11331_v26, %v8256_v16 }
 0x3fe   : > { %v11539_v41 = vpop.permute.xlu1 %8258 }
 0x3ff   : > { %v5734_v58 = vpop.permute.xlu0 %5733  ;;  %v8260_v23 = vunpack.i.l.bf16 %v11539_v41  ;;  %v8261_v33 = vunpack.i.h.bf16 %v11539_v41 }
 0x400   : > { %v5939_v1 = vsel %vm5931_vm14, %v5921_v28, %v5734_v58  ;;  %5171 = vrot.lane.b32.xlu1 %v5016_v48, %s8536_s9  ;;  %s8545_s9 = smov 125  }
 0x401   : > { %5697 = vrot.lane.b32.xlu0 %v5016_v48, %s8541_s14  ;;  %6898 = vmatprep.mubr.msk.f32.mxu1 %vm5984_vm0, %v5939_v1  ;;  %v5796_v39 = vsel %vm5787_vm12, %v5778_v59, %v8260_v23  ;;  %v5797_v9 = vsel %vm5787_vm12, %v5779_v61, %v8261_v33 }
 0x402   : > { %6139 = vmatmul.mubr.f32.gmra.mxu1 %v5867_v54  ;;  %v5564_v19 = vpop.permute.xlu1 %5563 }
 0x403   : > { %v5496_v25 = vpop.permute.xlu0 %5495 }
 0x404   : > { %5239 = vrot.lane.b32.xlu1 %v5033_v18, %s8535_s8  ;;  %v5886_v53 = vsel %vm5877_vm10, %v5496_v25, %v5564_v19 }
 0x405   : > { %5749 = vrot.lane.b32.xlu0 %v5033_v18, %s8543_s16 }
 0x406   : > { %v5632_v29 = vpop.permute.xlu1 %5631 }
 0x407   : > { %v8264_v40 = vpop.permute.xlu0 %8263  ;;  %v5904_v51 = vsel %vm5895_vm11, %v5886_v53, %v5632_v29 }
 0x408   : > { %5579 = vrot.lane.b32.xlu1 %v5118_v36, %s8537_s10  ;;  %v8265_v32 = vunpack.i.l.bf16 %v8264_v40  ;;  %v8266_v17 = vunpack.i.h.bf16 %v8264_v40  ;;  %s8117_s10 = smul.u32 136, %s12313_s19 }
 0x409   : > { %5511 = vrot.lane.b32.xlu0 %v5101_v43, %s8538_s11 }
 0x40a   : > { %v5684_v20 = vpop.permute.xlu1 %5683  ;;  %v5814_v31 = vsel %vm5805_vm15, %v5796_v39, %v8265_v32  ;;  %v5815_v46 = vsel %vm5805_vm15, %v5797_v9, %v8266_v17 }
 0x40b   : > { %v8269_v52 = vpop.permute.xlu0 %8268  ;;  %v5922_v12 = vsel %vm5913_vm13, %v5904_v51, %v5684_v20 }
 0x40c   : > { %5647 = vrot.lane.b32.xlu1 %v5119_v42, %s8539_s12  ;;  %v8270_v24 = vunpack.i.l.bf16 %v8269_v52  ;;  %v8271_v47 = vunpack.i.h.bf16 %v8269_v52 }
 0x40d   : > { %5307 = vrot.lane.b32.xlu0 %v5050_v27, %s8540_s13  ;;  %s11726_s13 = scalar_lea.vmem %s11812_s5, %s8117_s10 }
 0x40e   : > { %v5736_v37 = vpop.permute.xlu1 %5735  ;;  %v5832_v21 = vsel %vm5823_vm1, %v5814_v31, %v8270_v24  ;;  %v5833_v4 = vsel %vm5823_vm1, %v5815_v46, %v8271_v47 }
 0x40f   : > { %v5940_v45 = vsel %vm5931_vm14, %v5922_v12, %v5736_v37  ;;  %v8274_v56 = vpop.permute.xlu0 %8273 }
 0x410   : > { %v8275_v44 = vunpack.i.l.bf16 %v8274_v56  ;;  %5699 = vrot.lane.b32.xlu1 %v5120_v63, %s8541_s14  ;;  %6899 = vmatprep.mubr.msk.f32.mxu1 %vm5984_vm0, %v5940_v45  ;;  %v8276_v14 = vunpack.i.h.bf16 %v8274_v56 }
 0x411   : > { %5375 = vrot.lane.b32.xlu0 %v5067_v15, %s8542_s15 }
 0x412   : > { %v5566_v55 = vpop.permute.xlu1 %5565  ;;  %v5850_v62 = vsel %vm5841_vm2, %v5832_v21, %v8275_v44  ;;  %v5851_v22 = vsel %vm5841_vm2, %v5833_v4, %v8276_v14 }
 0x413   : > { %v5498_v7 = vpop.permute.xlu0 %5497  ;;  %v5868_v5 = vsel %vm5859_vm3, %v5850_v62, %v5496_v25 }
 0x414   : > { %6144 = vmatmul.mubr.f32.gmra.mxu1 %v5868_v5  ;;  %5751 = vrot.lane.b32.xlu1 %v5121_v2, %s8543_s16  ;;  %v5887_v60 = vsel %vm5877_vm10, %v5498_v7, %v5566_v55  ;;  %v5869_v28 = vsel %vm5859_vm3, %v5851_v22, %v5498_v7 }
 0x415   : > { %5443 = vrot.lane.b32.xlu0 %v5084_v38, %s8544_s17 }
 0x416   : > { %v5686_v10 = vpop.permute.xlu1 %5685 }
 0x417   : > { %v5634_v30 = vpop.permute.xlu0 %5633 }
 0x418   : > { %v5905_v35 = vsel %vm5895_vm11, %v5887_v60, %v5634_v30 }
 0x419   : > { %v5923_v26 = vsel %vm5913_vm13, %v5905_v35, %v5686_v10 }
 0x41a   : > { %v5738_v50 = vpop.permute.xlu1 %5737 }
 0x41b   : > { %v5941_v49 = vsel %vm5931_vm14, %v5923_v26, %v5738_v50  ;;  %v8279_v41 = vpop.permute.xlu0 %8278 }
 0x41c   : > { %6900 = vmatprep.mubr.msk.f32.mxu1 %vm5984_vm0, %v5941_v49  ;;  %v8280_v19 = vunpack.i.l.bf16 %v8279_v41  ;;  %v8281_v39 = vunpack.i.h.bf16 %v8279_v41 }
 0x41d   : > { %6149 = vmatmul.mubr.f32.gmra.mxu1 %v5869_v28 }
 0x41e   : > { %v5500_v58 = vpop.permute.xlu1 %5499  ;;  %v5780_v43 = vsel %vm4963_vm8, %v11371_v13, %v8280_v19  ;;  %v5781_v15 = vsel %vm4963_vm8, %v11395_v57, %v8281_v39 }
 0x41f   : > { %v8284_v48 = vpop.permute.xlu0 %8283 }
 0x420   : > { %v8285_v18 = vunpack.i.l.bf16 %v8284_v48  ;;  %v8286_v56 = vunpack.i.h.bf16 %v8284_v48 }
 0x422   : > { %v8289_v1 = vpop.permute.xlu1 %8288  ;;  %v5798_v20 = vsel %vm5787_vm12, %v5780_v43, %v8285_v18  ;;  %v5799_v33 = vsel %vm5787_vm12, %v5781_v15, %v8286_v56 }
 0x423   : > { %v5568_v54 = vpop.permute.xlu0 %5567  ;;  %v8290_v40 = vunpack.i.l.bf16 %v8289_v1  ;;  %v8291_v31 = vunpack.i.h.bf16 %v8289_v1 }
 0x424   : > { %v5888_v53 = vsel %vm5877_vm10, %v5500_v58, %v5568_v54 }
 0x425   : > { %v5816_v42 = vsel %vm5805_vm15, %v5798_v20, %v8290_v40  ;;  %v5817_v17 = vsel %vm5805_vm15, %v5799_v33, %v8291_v31 }
 0x426   : > { %v8294_v25 = vpop.permute.xlu1 %8293 }
 0x427   : > { %v5636_v29 = vpop.permute.xlu0 %5635  ;;  %v8295_v36 = vunpack.i.l.bf16 %v8294_v25  ;;  %v8296_v44 = vunpack.i.h.bf16 %v8294_v25 }
 0x428   : > { %v5906_v27 = vsel %vm5895_vm11, %v5888_v53, %v5636_v29 }
 0x429   : > { %v5834_v32 = vsel %vm5823_vm1, %v5816_v42, %v8295_v36  ;;  %v5835_v7 = vsel %vm5823_vm1, %v5817_v17, %v8296_v44  ;;  %v11636_v44 = vld [vmem:[%s11811_s4] ss:$0 sm:$0xff] }
 0x42a   : > { %v8299_v11 = vpop.permute.xlu1 %8298 }
 0x42b   : > { %v8300_v23 = vunpack.i.l.bf16 %v8299_v11  ;;  %v5688_v52 = vpop.permute.xlu0 %5687  ;;  %v8301_v16 = vunpack.i.h.bf16 %v8299_v11 }
 0x42c   : > { %v5924_v59 = vsel %vm5913_vm13, %v5906_v27, %v5688_v52 }
 0x42d   : > { %v5852_v24 = vsel %vm5841_vm2, %v5834_v32, %v8300_v23  ;;  %v5853_v5 = vsel %vm5841_vm2, %v5835_v7, %v8301_v16 }
 0x42e   : > { %v5502_v51 = vpop.permute.xlu1 %5501  ;;  %v5870_v37 = vsel %vm5859_vm3, %v5852_v24, %v5500_v58 }
 0x42f   : > { %v5740_v12 = vpop.permute.xlu0 %5739  ;;  %v5871_v14 = vsel %vm5859_vm3, %v5853_v5, %v5502_v51 }
 0x430   : > { %v5942_v13 = vsel %vm5931_vm14, %v5924_v59, %v5740_v12 }
 0x431   : > { %6901 = vmatprep.mubr.msk.f32.mxu1 %vm5984_vm0, %v5942_v13 }
 0x432   : > { %6154 = vmatmul.mubr.f32.gmra.mxu1 %v5870_v37  ;;  %v5638_v45 = vpop.permute.xlu1 %5637 }
 0x433   : > { %v5570_v63 = vpop.permute.xlu0 %5569 }
 0x434   : > { %v5889_v55 = vsel %vm5877_vm10, %v5502_v51, %v5570_v63 }
 0x435   : > { %v5907_v2 = vsel %vm5895_vm11, %v5889_v55, %v5638_v45 }
 0x436   : > { %v8304_v21 = vpop.permute.xlu1 %8303 }
 0x437   : > { %v5690_v62 = vpop.permute.xlu0 %5689  ;;  %v8305_v30 = vunpack.i.l.bf16 %v8304_v21  ;;  %v8306_v29 = vunpack.i.h.bf16 %v8304_v21 }
 0x438   : > { %v5925_v38 = vsel %vm5913_vm13, %v5907_v2, %v5690_v62 }
 0x439   : > { %v5782_v28 = vsel %vm4963_vm8, %v11420_v3, %v8305_v30  ;;  %v5783_v42 = vsel %vm4963_vm8, %v11443_v6, %v8306_v29 }
 0x43a   : > { %v8309_v47 = vpop.permute.xlu1 %8308 }
 0x43b   : > { %v5742_v61 = vpop.permute.xlu0 %5741  ;;  %v8310_v35 = vunpack.i.l.bf16 %v8309_v47  ;;  %v8311_v36 = vunpack.i.h.bf16 %v8309_v47 }
 0x43c   : > { %v5943_v57 = vsel %vm5931_vm14, %v5925_v38, %v5742_v61 }
 0x43d   : > { %6902 = vmatprep.mubr.msk.f32.mxu1 %vm5984_vm0, %v5943_v57  ;;  %v5800_v1 = vsel %vm5787_vm12, %v5782_v28, %v8310_v35  ;;  %v5801_v32 = vsel %vm5787_vm12, %v5783_v42, %v8311_v36 }
 0x43e   : > { %6159 = vmatmul.mubr.f32.gmra.mxu1 %v5871_v14  ;;  %v5572_v9 = vpop.permute.xlu1 %5571 }
 0x43f   : > { %v5504_v10 = vpop.permute.xlu0 %5503 }
 0x440   : > { %v5890_v50 = vsel %vm5877_vm10, %v5504_v10, %v5572_v9 }
 0x442   : > { %v5640_v46 = vpop.permute.xlu1 %5639 }
 0x443   : > { %v8314_v60 = vpop.permute.xlu0 %8313  ;;  %v5908_v49 = vsel %vm5895_vm11, %v5890_v50, %v5640_v46 }
 0x444   : > { %v8315_v26 = vunpack.i.l.bf16 %v8314_v60  ;;  %v8316_v11 = vunpack.i.h.bf16 %v8314_v60 }
 0x446   : > { %v5692_v4 = vpop.permute.xlu1 %5691  ;;  %v5818_v25 = vsel %vm5805_vm15, %v5800_v1, %v8315_v26  ;;  %v5819_v51 = vsel %vm5805_vm15, %v5801_v32, %v8316_v11 }
 0x447   : > { %v8319_v22 = vpop.permute.xlu0 %8318  ;;  %v5926_v58 = vsel %vm5913_vm13, %v5908_v49, %v5692_v4 }
 0x448   : > { %v8320_v41 = vunpack.i.l.bf16 %v8319_v22  ;;  %v8321_v52 = vunpack.i.h.bf16 %v8319_v22 }
 0x44a   : > { %v5744_v48 = vpop.permute.xlu1 %5743  ;;  %v5836_v40 = vsel %vm5823_vm1, %v5818_v25, %v8320_v41  ;;  %v5837_v12 = vsel %vm5823_vm1, %v5819_v51, %v8321_v52 }
 0x44b   : > { %v5944_v54 = vsel %vm5931_vm14, %v5926_v58, %v5744_v48  ;;  %v8324_v19 = vpop.permute.xlu0 %8323 }
 0x44c   : > { %v8325_v18 = vunpack.i.l.bf16 %v8324_v19  ;;  %6903 = vmatprep.mubr.msk.f32.mxu1 %vm5984_vm0, %v5944_v54  ;;  %v8326_v53 = vunpack.i.h.bf16 %v8324_v19 }
 0x44e   : > { %v5574_v43 = vpop.permute.xlu1 %5573  ;;  %v5854_v3 = vsel %vm5841_vm2, %v5836_v40, %v8325_v18  ;;  %v5855_v37 = vsel %vm5841_vm2, %v5837_v12, %v8326_v53 }
 0x44f   : > { %v5506_v20 = vpop.permute.xlu0 %5505  ;;  %v5872_v23 = vsel %vm5859_vm3, %v5854_v3, %v5504_v10 }
 0x450   : > { %6164 = vmatmul.mubr.f32.gmra.mxu1 %v5872_v23  ;;  %v5891_v24 = vsel %vm5877_vm10, %v5506_v20, %v5574_v43  ;;  %v5873_v63 = vsel %vm5859_vm3, %v5855_v37, %v5506_v20 }
 0x452   : > { %v5694_v27 = vpop.permute.xlu1 %5693 }
 0x453   : > { %v5642_v59 = vpop.permute.xlu0 %5641 }
 0x454   : > { %v5909_v13 = vsel %vm5895_vm11, %v5891_v24, %v5642_v59 }
 0x455   : > { %v5927_v45 = vsel %vm5913_vm13, %v5909_v13, %v5694_v27 }
 0x456   : > { %v5746_v39 = vpop.permute.xlu1 %5745 }
 0x457   : > { %v5945_v6 = vsel %vm5931_vm14, %v5927_v45, %v5746_v39  ;;  %v8329_v56 = vpop.permute.xlu0 %8328 }
 0x458   : > { %6904 = vmatprep.mubr.msk.f32.mxu1 %vm5984_vm0, %v5945_v6  ;;  %v8330_v7 = vunpack.i.l.bf16 %v8329_v56  ;;  %v8331_v19 = vunpack.i.h.bf16 %v8329_v56 }
 0x459   : > { %6169 = vmatmul.mubr.f32.gmra.mxu1 %v5873_v63 }
 0x45a   : > { %v5508_v31 = vpop.permute.xlu1 %5507  ;;  %v5784_v14 = vsel %vm4963_vm8, %v11481_v0, %v8330_v7  ;;  %v5785_v3 = vsel %vm4963_vm8, %v11505_v34, %v8331_v19 }
 0x45b   : > { %v8334_v15 = vpop.permute.xlu0 %8333 }
 0x45c   : > { %v6105_v16 = vpop.f32.mrf.mxu1  ;;  %v8335_v2 = vunpack.i.l.bf16 %v8334_v15  ;;  %v8336_v18 = vunpack.i.h.bf16 %v8334_v15 }
 0x45d   : > { %v11639_v21 = vadd.f32 %v11636_v44, %v6105_v16 }
 0x45e   : > { %v6107_v33 = vpop.f32.mrf.mxu1  ;;  %v8339_v55 = vpop.permute.xlu1 %8338  ;;  %v5802_v46 = vsel %vm5787_vm12, %v5784_v14, %v8335_v2  ;;  %v5803_v23 = vsel %vm5787_vm12, %v5785_v3, %v8336_v18 }
 0x45f   : > { %v6908_v62 = vmul.f32 -1.442695, %v11639_v21  ;;  %v5576_v17 = vpop.permute.xlu0 %5575  ;;  %v8340_v38 = vunpack.i.l.bf16 %v8339_v55  ;;  %v8341_v36 = vunpack.i.h.bf16 %v8339_v55 }
 0x460   : > { %v5892_v50 = vsel %vm5877_vm10, %v5508_v31, %v5576_v17 }
 0x461   : > { %8424 = vpow2.f32 %v6908_v62  ;;  %v5820_v35 = vsel %vm5805_vm15, %v5802_v46, %v8340_v38  ;;  %v5821_v53 = vsel %vm5805_vm15, %v5803_v23, %v8341_v36 }
 0x462   : > { %v8344_v5 = vpop.permute.xlu1 %8343 }
 0x463   : > { %v5644_v47 = vpop.permute.xlu0 %5643  ;;  %v8345_v61 = vunpack.i.l.bf16 %v8344_v5  ;;  %v8346_v43 = vunpack.i.h.bf16 %v8344_v5 }
 0x464   : > { %v5910_v49 = vsel %vm5895_vm11, %v5892_v50, %v5644_v47 }
 0x465   : > { %v6110_v57 = vpop.f32.mrf.mxu1  ;;  %v5838_v26 = vsel %vm5823_vm1, %v5820_v35, %v8345_v61  ;;  %v5839_v32 = vsel %vm5823_vm1, %v5821_v53, %v8346_v43 }
 0x466   : > { %v11645_v9 = vadd.f32 %v11636_v44, %v6110_v57  ;;  %v8349_v10 = vpop.permute.xlu1 %8348 }
 0x467   : > { %v8350_v60 = vunpack.i.l.bf16 %v8349_v10  ;;  %v5696_v30 = vpop.permute.xlu0 %5695  ;;  %v6112_v4 = vpop.f32.mrf.mxu1  ;;  %v8351_v11 = vunpack.i.h.bf16 %v8349_v10 }
 0x468   : > { %v6909_v22 = vmul.f32 -1.442695, %v11645_v9  ;;  %v5928_v28 = vsel %vm5913_vm13, %v5910_v49, %v5696_v30 }
 0x469   : > { %v5856_v41 = vsel %vm5841_vm2, %v5838_v26, %v8350_v60  ;;  %v5857_v27 = vsel %vm5841_vm2, %v5839_v32, %v8351_v11 }
 0x46a   : > { %8426 = vpow2.f32 %v6909_v22  ;;  %v5510_v0 = vpop.permute.xlu1 %5509  ;;  %v5874_v1 = vsel %vm5859_vm3, %v5856_v41, %v5508_v31 }
 0x46b   : > { %v5748_v58 = vpop.permute.xlu0 %5747  ;;  %v5875_v39 = vsel %vm5859_vm3, %v5857_v27, %v5510_v0 }
 0x46c   : > { %v5946_v48 = vsel %vm5931_vm14, %v5928_v28, %v5748_v58 }
 0x46d   : > { %6905 = vmatprep.mubr.msk.f32.mxu1 %vm5984_vm0, %v5946_v48 }
 0x46e   : > { %v8425_v54 = vpop.eup %8424  ;;  %6174 = vmatmul.mubr.f32.gmra.mxu1 %v5874_v1  ;;  %v5646_v25 = vpop.permute.xlu1 %5645 }
 0x46f   : > { %v6240_v29 = vadd.f32 1.0, %v8425_v54  ;;  %v5578_v40 = vpop.permute.xlu0 %5577 }
 0x470   : > { %v5893_v52 = vsel %vm5877_vm10, %v5510_v0, %v5578_v40 }
 0x471   : > { %8428 = vrcp.f32 %v6240_v29  ;;  %v5911_v51 = vsel %vm5895_vm11, %v5893_v52, %v5646_v25 }
 0x472   : > { %v5172_v20 = vpop.permute.xlu1 %5171 }
 0x473   : > { %v5698_v42 = vpop.permute.xlu0 %5697  ;;  %v5786_v7 = vsel %vm4963_vm8, %v11530_v8, %v5172_v20 }
 0x474   : > { %v5929_v12 = vsel %vm5913_vm13, %v5911_v51, %v5698_v42 }
 0x476   : > { %v5240_v24 = vpop.permute.xlu1 %5239 }
 0x477   : > { %v8427_v59 = vpop.eup %8426  ;;  %v5750_v34 = vpop.permute.xlu0 %5749  ;;  %v5804_v2 = vsel %vm5787_vm12, %v5786_v7, %v5240_v24 }
 0x478   : > { %v6241_v13 = vadd.f32 1.0, %v8427_v59  ;;  %v5947_v37 = vsel %vm5931_vm14, %v5929_v12, %v5750_v34 }
 0x479   : > { %6906 = vmatprep.mubr.msk.f32.mxu1 %vm5984_vm0, %v5947_v37 }
 0x47a   : > { %8430 = vrcp.f32 %v6241_v13  ;;  %v6115_v45 = vpop.f32.mrf.mxu1  ;;  %6179 = vmatmul.mubr.f32.gmra.mxu1 %v5875_v39  ;;  %v5580_v6 = vpop.permute.xlu1 %5579 }
 0x47b   : > { %v11671_v56 = vadd.f32 %v11636_v44, %v6115_v45  ;;  %v5512_v63 = vpop.permute.xlu0 %5511 }
 0x47c   : > { %v6117_v31 = vpop.f32.mrf.mxu1  ;;  %v5894_v5 = vsel %vm5877_vm10, %v5512_v63, %v5580_v6 }
 0x47d   : > { %v6910_v15 = vmul.f32 -1.442695, %v11671_v56 }
 0x47e   : > { %v8429_v16 = vpop.eup %8428  ;;  %v5648_v33 = vpop.permute.xlu1 %5647 }
 0x47f   : > { %8432 = vpow2.f32 %v6910_v15  ;;  %v5308_v55 = vpop.permute.xlu0 %5307  ;;  %6308 = vrot.lane.b32.xlu0 %v8429_v16, %s8545_s9  ;;  %v5912_v47 = vsel %vm5895_vm11, %v5894_v5, %v5648_v33 }
 0x480   : > { %v5822_v38 = vsel %vm5805_vm15, %v5804_v2, %v5308_v55 }
 0x482   : > { %v5700_v62 = vpop.permute.xlu1 %5699 }
 0x483   : > { %v5376_v17 = vpop.permute.xlu0 %5375  ;;  %v5930_v61 = vsel %vm5913_vm13, %v5912_v47, %v5700_v62 }
 0x484   : > { %v5840_v46 = vsel %vm5823_vm1, %v5822_v38, %v5376_v17 }
 0x486   : > { %v6120_v57 = vpop.f32.mrf.mxu1  ;;  %v5752_v14 = vpop.permute.xlu1 %5751 }
 0x487   : > { %v8431_v10 = vpop.eup %8430  ;;  %v11684_v60 = vadd.f32 %v11636_v44, %v6120_v57  ;;  %v5948_v8 = vsel %vm5931_vm14, %v5930_v61, %v5752_v14  ;;  %v5444_v30 = vpop.permute.xlu0 %5443 }
 0x488   : > { %v5858_v4 = vsel %vm5841_vm2, %v5840_v46, %v5444_v30  ;;  %v6122_v35 = vpop.f32.mrf.mxu1  ;;  %6907 = vmatprep.mubr.msk.f32.mxu1 %vm5984_vm0, %v5948_v8  ;;  %6310 = vrot.lane.b32.xlu1 %v8431_v10, %s8545_s9 }
 0x489   : > { %v6911_v22 = vmul.f32 -1.442695, %v11684_v60  ;;  %v5876_v50 = vsel %vm5859_vm3, %v5858_v4, %v5512_v63 }
 0x48a   : > { %6184 = vmatmul.mubr.f32.gmra.mxu1 %v5876_v50 }
 0x48b   : > { %8434 = vpow2.f32 %v6911_v22 }
 0x48c   : > { %v8433_v26 = vpop.eup %8432 }
 0x48d   : > { %v6242_v49 = vadd.f32 1.0, %v8433_v26 }
 0x48f   : > { %8436 = vrcp.f32 %v6242_v49 }
 0x498   : > { %v8435_v0 = vpop.eup %8434  ;;  %v6125_v41 = vpop.f32.mrf.mxu1 }
 0x499   : > { %v6243_v28 = vadd.f32 1.0, %v8435_v0  ;;  %v11693_v58 = vadd.f32 %v11636_v44, %v6125_v41 }
 0x49a   : > { %v6127_v48 = vpop.f32.mrf.mxu1 }
 0x49b   : > { %8438 = vrcp.f32 %v6243_v28  ;;  %v6912_v1 = vmul.f32 -1.442695, %v11693_v58 }
 0x49c   : > { %v8437_v54 = vpop.eup %8436 }
 0x49d   : > { %8440 = vpow2.f32 %v6912_v1  ;;  %6312 = vrot.lane.b32.xlu0 %v8437_v54, %s8545_s9 }
 0x4a1   : > { %v6130_v19 = vpop.f32.mrf.mxu1 }
 0x4a2   : > { %v11698_v25 = vadd.f32 %v11636_v44, %v6130_v19 }
 0x4a3   : > { %v6132_v18 = vpop.f32.mrf.mxu1 }
 0x4a4   : > { %v6913_v29 = vmul.f32 -1.442695, %v11698_v25 }
 0x4a6   : > { %8442 = vpow2.f32 %v6913_v29 }
 0x4a8   : > { %v8439_v40 = vpop.eup %8438 }
 0x4a9   : > { %6314 = vrot.lane.b32.xlu1 %v8439_v40, %s8545_s9 }
 0x4aa   : > { %v8441_v36 = vpop.eup %8440 }
 0x4ab   : > { %v6244_v43 = vadd.f32 1.0, %v8441_v36 }
 0x4ad   : > { %8444 = vrcp.f32 %v6244_v43 }
 0x4b3   : > { %v8443_v3 = vpop.eup %8442 }
 0x4b4   : > { %v6245_v11 = vadd.f32 1.0, %v8443_v3 }
 0x4b6   : > { %8446 = vrcp.f32 %v6245_v11  ;;  %v6135_v20 = vpop.f32.mrf.mxu1 }
 0x4b7   : > { %v11703_v23 = vadd.f32 %v11636_v44, %v6135_v20 }
 0x4b8   : > { %v6137_v52 = vpop.f32.mrf.mxu1 }
 0x4b9   : > { %v6914_v42 = vmul.f32 -1.442695, %v11703_v23 }
 0x4ba   : > { %v8445_v53 = vpop.eup %8444 }
 0x4bb   : > { %8448 = vpow2.f32 %v6914_v42  ;;  %6316 = vrot.lane.b32.xlu0 %v8445_v53, %s8545_s9 }
 0x4c2   : > { %v6140_v32 = vpop.f32.mrf.mxu1 }
 0x4c3   : > { %v8447_v27 = vpop.eup %8446  ;;  %v11708_v51 = vadd.f32 %v11636_v44, %v6140_v32 }
 0x4c4   : > { %v6142_v24 = vpop.f32.mrf.mxu1  ;;  %6318 = vrot.lane.b32.xlu1 %v8447_v27, %s8545_s9 }
 0x4c5   : > { %v6915_v59 = vmul.f32 -1.442695, %v11708_v51 }
 0x4c7   : > { %8450 = vpow2.f32 %v6915_v59 }
 0x4c8   : > { %v8449_v12 = vpop.eup %8448 }
 0x4c9   : > { %v6246_v34 = vadd.f32 1.0, %v8449_v12 }
 0x4cb   : > { %8452 = vrcp.f32 %v6246_v34 }
 0x4d4   : > { %v8451_v13 = vpop.eup %8450  ;;  %v6145_v37 = vpop.f32.mrf.mxu1 }
 0x4d5   : > { %v6247_v39 = vadd.f32 1.0, %v8451_v13  ;;  %v11713_v45 = vadd.f32 %v11636_v44, %v6145_v37 }
 0x4d6   : > { %v6147_v6 = vpop.f32.mrf.mxu1 }
 0x4d7   : > { %8454 = vrcp.f32 %v6247_v39  ;;  %v6916_v63 = vmul.f32 -1.442695, %v11713_v45 }
 0x4d8   : > { %v8453_v31 = vpop.eup %8452 }
 0x4d9   : > { %8456 = vpow2.f32 %v6916_v63  ;;  %6320 = vrot.lane.b32.xlu0 %v8453_v31, %s8545_s9 }
 0x4dd   : > { %v6150_v15 = vpop.f32.mrf.mxu1 }
 0x4de   : > { %v11718_v16 = vadd.f32 %v11636_v44, %v6150_v15 }
 0x4df   : > { %v6152_v33 = vpop.f32.mrf.mxu1 }
 0x4e0   : > { %v6917_v55 = vmul.f32 -1.442695, %v11718_v16 }
 0x4e2   : > { %8458 = vpow2.f32 %v6917_v55 }
 0x4e4   : > { %v8455_v62 = vpop.eup %8454 }
 0x4e5   : > { %6322 = vrot.lane.b32.xlu1 %v8455_v62, %s8545_s9 }
 0x4e6   : > { %v8457_v17 = vpop.eup %8456 }
 0x4e7   : > { %v6248_v7 = vadd.f32 1.0, %v8457_v17 }
 0x4e9   : > { %8460 = vrcp.f32 %v6248_v7 }
 0x4ef   : > { %v8459_v5 = vpop.eup %8458 }
 0x4f0   : > { %v6249_v2 = vadd.f32 1.0, %v8459_v5 }
 0x4f1   : > { %v6309_v47 = vpop.permute.xlu0 %6308 }
 0x4f2   : > { %8462 = vrcp.f32 %v6249_v2  ;;  %v6359_v38 = vmul.f32 %v6309_v47, %v11639_v21  ;;  %v6155_v61 = vpop.f32.mrf.mxu1 }
 0x4f3   : > { %v11730_v57 = vadd.f32 %v11636_v44, %v6155_v61 }
 0x4f4   : > { %6377 = vst.msk [vmem:[%s11726_s13] sm:$0xff] %vm6376_vm4, %v6359_v38  ;;  %v6157_v14 = vpop.f32.mrf.mxu1 }
 0x4f5   : > { %v6918_v10 = vmul.f32 -1.442695, %v11730_v57 }
 0x4f6   : > { %v8461_v46 = vpop.eup %8460 }
 0x4f7   : > { %8464 = vpow2.f32 %v6918_v10  ;;  %6324 = vrot.lane.b32.xlu0 %v8461_v46, %s8545_s9 }
 0x4fa   : > { %v6311_v8 = vpop.permute.xlu1 %6310 }
 0x4fb   : > { %v6360_v30 = vmul.f32 %v6311_v8, %v11645_v9 }
 0x4fd   : > { %6378 = vst.msk [vmem:[%s11726_s13 + $0x8] sm:$0xff] %vm6376_vm4, %v6360_v30 }
 0x4fe   : > { %v6160_v4 = vpop.f32.mrf.mxu1 }
 0x4ff   : > { %v8463_v21 = vpop.eup %8462  ;;  %v11740_v35 = vadd.f32 %v11636_v44, %v6160_v4 }
 0x500   : > { %v6162_v22 = vpop.f32.mrf.mxu1  ;;  %6326 = vrot.lane.b32.xlu1 %v8463_v21, %s8545_s9 }
 0x501   : > { %v6919_v50 = vmul.f32 -1.442695, %v11740_v35 }
 0x503   : > { %8466 = vpow2.f32 %v6919_v50 }
 0x504   : > { %v8465_v26 = vpop.eup %8464 }
 0x505   : > { %v6250_v49 = vadd.f32 1.0, %v8465_v26 }
 0x507   : > { %8468 = vrcp.f32 %v6250_v49 }
 0x50f   : > { %v6313_v0 = vpop.permute.xlu0 %6312 }
 0x510   : > { %v8467_v41 = vpop.eup %8466  ;;  %v6361_v9 = vmul.f32 %v6313_v0, %v11671_v56  ;;  %v6165_v28 = vpop.f32.mrf.mxu1 }
 0x511   : > { %v6251_v48 = vadd.f32 1.0, %v8467_v41  ;;  %v11746_v1 = vadd.f32 %v11636_v44, %v6165_v28 }
 0x512   : > { %6379 = vst.msk [vmem:[%s11726_s13 + $0x10] sm:$0xff] %vm6376_vm4, %v6361_v9  ;;  %v6167_v54 = vpop.f32.mrf.mxu1 }
 0x513   : > { %8470 = vrcp.f32 %v6251_v48  ;;  %v6920_v19 = vmul.f32 -1.442695, %v11746_v1 }
 0x514   : > { %v8469_v18 = vpop.eup %8468 }
 0x515   : > { %8472 = vpow2.f32 %v6920_v19  ;;  %6328 = vrot.lane.b32.xlu0 %v8469_v18, %s8545_s9 }
 0x519   : > { %v6170_v29 = vpop.f32.mrf.mxu1 }
 0x51a   : > { %v11753_v40 = vadd.f32 %v11636_v44, %v6170_v29 }
 0x51b   : > { %v6315_v56 = vpop.permute.xlu1 %6314  ;;  %v6172_v36 = vpop.f32.mrf.mxu1 }
 0x51c   : > { %v6921_v43 = vmul.f32 -1.442695, %v11753_v40  ;;  %v6362_v3 = vmul.f32 %v6315_v56, %v11684_v60 }
 0x51e   : > { %8474 = vpow2.f32 %v6921_v43  ;;  %6380 = vst.msk [vmem:[%s11726_s13 + $0x18] sm:$0xff] %vm6376_vm4, %v6362_v3 }
 0x520   : > { %v8471_v11 = vpop.eup %8470 }
 0x521   : > { %6330 = vrot.lane.b32.xlu1 %v8471_v11, %s8545_s9 }
 0x522   : > { %v8473_v20 = vpop.eup %8472 }
 0x523   : > { %v6252_v52 = vadd.f32 1.0, %v8473_v20 }
 0x525   : > { %8476 = vrcp.f32 %v6252_v52 }
 0x52b   : > { %v8475_v42 = vpop.eup %8474 }
 0x52c   : > { %v6253_v53 = vadd.f32 1.0, %v8475_v42 }
 0x52d   : > { %v6317_v32 = vpop.permute.xlu0 %6316 }
 0x52e   : > { %8478 = vrcp.f32 %v6253_v53  ;;  %v6363_v27 = vmul.f32 %v6317_v32, %v11693_v58  ;;  %v6175_v24 = vpop.f32.mrf.mxu1 }
 0x52f   : > { %v6176_v59 = vadd.f32 %v11636_v44, %v6175_v24 }
 0x530   : > { %6381 = vst.msk [vmem:[%s11726_s13 + $0x20] sm:$0xff] %vm6376_vm4, %v6363_v27  ;;  %v6177_v60 = vpop.f32.mrf.mxu1 }
 0x531   : > { %v6922_v12 = vmul.f32 -1.442695, %v6176_v59 }
 0x532   : > { %v8477_v34 = vpop.eup %8476 }
 0x533   : > { %8480 = vpow2.f32 %v6922_v12  ;;  %6332 = vrot.lane.b32.xlu0 %v8477_v34, %s8545_s9 }
 0x536   : > { %v6319_v13 = vpop.permute.xlu1 %6318 }
 0x537   : > { %v6364_v37 = vmul.f32 %v6319_v13, %v11698_v25 }
 0x539   : > { %6382 = vst.msk [vmem:[%s11726_s13 + $0x28] sm:$0xff] %vm6376_vm4, %v6364_v37 }
 0x53a   : > { %v6180_v39 = vpop.f32.mrf.mxu1 }
 0x53b   : > { %v8479_v6 = vpop.eup %8478  ;;  %v6181_v58 = vadd.f32 %v11636_v44, %v6180_v39 }
 0x53c   : > { %v6182_v63 = vpop.f32.mrf.mxu1  ;;  %6334 = vrot.lane.b32.xlu1 %v8479_v6, %s8545_s9 }
 0x53d   : > { %v6923_v31 = vmul.f32 -1.442695, %v6181_v58 }
 0x53f   : > { %8482 = vpow2.f32 %v6923_v31 }
 0x540   : > { %v8481_v15 = vpop.eup %8480 }
 0x541   : > { %v6254_v33 = vadd.f32 1.0, %v8481_v15 }
 0x543   : > { %8484 = vrcp.f32 %v6254_v33 }
 0x54a   : > { %v6185_v55 = vpop.f32.mrf.mxu1 }
 0x54b   : > { %v6186_v62 = vadd.f32 %v11636_v44, %v6185_v55  ;;  %v6321_v25 = vpop.permute.xlu0 %6320 }
 0x54c   : > { %v8483_v17 = vpop.eup %8482  ;;  %v6365_v7 = vmul.f32 %v6321_v25, %v11703_v23  ;;  %v6187_v5 = vpop.f32.mrf.mxu1 }
 0x54d   : > { %v6255_v2 = vadd.f32 1.0, %v8483_v17  ;;  %v6924_v47 = vmul.f32 -1.442695, %v6186_v62 }
 0x54e   : > { %6383 = vst.msk [vmem:[%s11726_s13 + $0x30] sm:$0xff] %vm6376_vm4, %v6365_v7 }
 0x54f   : > { %8486 = vrcp.f32 %v6255_v2 }
 0x550   : > { %v8485_v38 = vpop.eup %8484  ;;  %8488 = vpow2.f32 %v6924_v47 }
 0x551   : > { %6336 = vrot.lane.b32.xlu0 %v8485_v38, %s8545_s9 }
 0x557   : > { %v6323_v61 = vpop.permute.xlu1 %6322 }
 0x558   : > { %v6366_v14 = vmul.f32 %v6323_v61, %v11708_v51 }
 0x55a   : > { %6384 = vst.msk [vmem:[%s11726_s13 + $0x38] sm:$0xff] %vm6376_vm4, %v6366_v14 }
 0x55c   : > { %v8487_v44 = vpop.eup %8486 }
 0x55d   : > { %v8489_v23 = vpop.eup %8488  ;;  %6338 = vrot.lane.b32.xlu1 %v8487_v44, %s8545_s9 }
 0x55e   : > { %v6256_v10 = vadd.f32 1.0, %v8489_v23 }
 0x560   : > { %8490 = vrcp.f32 %v6256_v10 }
 0x569   : > { %v6325_v46 = vpop.permute.xlu0 %6324 }
 0x56a   : > { %v6367_v8 = vmul.f32 %v6325_v46, %v11713_v45 }
 0x56c   : > { %6385 = vst.msk [vmem:[%s11726_s13 + $0x40] sm:$0xff] %vm6376_vm4, %v6367_v8 }
 0x56d   : > { %v8491_v30 = vpop.eup %8490 }
 0x56e   : > { %6340 = vrot.lane.b32.xlu0 %v8491_v30, %s8545_s9 }
 0x572   : > { %v6327_v51 = vpop.permute.xlu1 %6326 }
 0x573   : > { %v6368_v4 = vmul.f32 %v6327_v51, %v11718_v16 }
 0x575   : > { %6386 = vst.msk [vmem:[%s11726_s13 + $0x48] sm:$0xff] %vm6376_vm4, %v6368_v4 }
 0x587   : > { %v6329_v21 = vpop.permute.xlu0 %6328 }
 0x588   : > { %v6369_v22 = vmul.f32 %v6329_v21, %v11730_v57 }
 0x58a   : > { %6387 = vst.msk [vmem:[%s11726_s13 + $0x50] sm:$0xff] %vm6376_vm4, %v6369_v22 }
 0x593   : > { %v6331_v50 = vpop.permute.xlu1 %6330 }
 0x594   : > { %v6370_v45 = vmul.f32 %v6331_v50, %v11740_v35 }
 0x596   : > { %6388 = vst.msk [vmem:[%s11726_s13 + $0x58] sm:$0xff] %vm6376_vm4, %v6370_v45 }
 0x5a5   : > { %v6333_v26 = vpop.permute.xlu0 %6332 }
 0x5a6   : > { %v6371_v49 = vmul.f32 %v6333_v26, %v11746_v1 }
 0x5a8   : > { %6389 = vst.msk [vmem:[%s11726_s13 + $0x60] sm:$0xff] %vm6376_vm4, %v6371_v49 }
 0x5ae   : > { %v6335_v16 = vpop.permute.xlu1 %6334 }
 0x5af   : > { %v6372_v0 = vmul.f32 %v6335_v16, %v11753_v40 }
 0x5b1   : > { %6390 = vst.msk [vmem:[%s11726_s13 + $0x68] sm:$0xff] %vm6376_vm4, %v6372_v0 }
 0x5c3   : > { %v6337_v57 = vpop.permute.xlu0 %6336 }
 0x5c4   : > { %v6373_v41 = vmul.f32 %v6337_v57, %v6176_v59 }
 0x5c6   : > { %6391 = vst.msk [vmem:[%s11726_s13 + $0x70] sm:$0xff] %vm6376_vm4, %v6373_v41 }
 0x5cf   : > { %v6339_v9 = vpop.permute.xlu1 %6338 }
 0x5d0   : > { %v6374_v28 = vmul.f32 %v6339_v9, %v6181_v58 }
 0x5d2   : > { %6392 = vst.msk [vmem:[%s11726_s13 + $0x78] sm:$0xff] %vm6376_vm4, %v6374_v28 }
 0x5e0   : > { %v6341_v35 = vpop.permute.xlu0 %6340 }
 0x5e1   : > { %v6375_v48 = vmul.f32 %v6341_v35, %v6186_v62 }
 0x5e3   : > { %6393 = vst.msk [vmem:[%s11726_s13 + $0x80] sm:$0xff] %vm6376_vm4, %v6375_v48 }
 0x5e4 PF: > { %s16_s18 = sadd.s32 1, %s8528_s18  }
 0x5e5   : > { %p13_p1 = scmp.ge.s32.totalorder %s16_s18, 4  }
 0x5e7   :  { %15 = sbr.rel (!%p13_p1) target bundleno = 1 (0x1), region = 95 }
 0x5ec   :  { %6415 = vsyncpa [#allocation4], 1 }
 0x5ed   :  { %6417 = vsyncpa [#allocation4 + $0x1], 1 }

</bundles_post_ra>
